<compile_context>
chip_gen: v6e
topology: v6e:2x2x1
jax: 0.10.0
libtpu: 0.0.40
codegen_flags: <defaults>
</compile_context>

<pallas_src>
import math

import jax
import jax.numpy as jnp
from jax.experimental import pallas as pl
from jax.experimental.pallas import tpu as pltpu

NUM_KERNELS = 6
N_GROUPS = 8
REDUCTION = 16
GN_EPS = 1e-5
LEAKY_SLOPE = 0.2


def conv_specs(num_kernels=NUM_KERNELS):
    # (orientation, kernel size k, padding p)
    # 'w' -> Conv2d kernel [1, k], padding [0, p];  'h' -> kernel [k, 1], padding [p, 0]
    specs = []
    for i in range(num_kernels // 2):
        specs.append(("w", 2 * i + 3, i + 1))
        specs.append(("h", 2 * i + 3, i + 1))
    specs.append(("w", 1, 0))  # final 1x1 conv (grouped with the 'w' branch matmul)
    return specs


def make_kernel(*, W, HW, HWp, Cout, cin_p, n_shift, n_w, n_h, block_b, max_pad):
    n_convs = n_w + n_h
    inv_n = 1.0 / n_convs
    inv_hw = 1.0 / HW
    gper = Cout // N_GROUPS
    inv_cnt = 1.0 / (gper * HW)
    # exact fold of the 1/n_convs branch-mean scale into GroupNorm (scale-invariant up to eps)
    gn_eps_eff = GN_EPS * n_convs * n_convs
    needs_valid = HWp != HW
    base_w = max_pad * W - max_pad          # lane offset of 1xk shift s == base_w + s

    def kernel(xh_ref, mask_ref, valid_ref, wwt_ref, wht_ref, bw_ref, bh_ref,
               w1_ref, w2_ref, gamma_ref, beta_ref, out_ref, winh_ref, winw_ref):
        mask = mask_ref[...]                # (n_shift, HWp) bf16 shift-validity mask

        # --- build both fused im2col windows once per grid step into VMEM scratch ---
        # rows = n_shift*cin_p (contraction), lanes = block_b*HWp (batched MXU N axis)
        for bi in range(block_b):
            for s in range(n_shift):
                r0, r1 = s * cin_p, (s + 1) * cin_p
                c0, c1 = bi * HWp, (bi + 1) * HWp
                winh_ref[r0:r1, c0:c1] = xh_ref[bi, :, s * W:s * W + HWp]
                winw_ref[r0:r1, c0:c1] = (
                    xh_ref[bi, :, base_w + s:base_w + s + HWp] * mask[s:s + 1, :])

        # --- all branches of one orientation, all block_b elements: one MXU matmul each ---
        cw = jnp.dot(wwt_ref[...], winw_ref[...],
                     preferred_element_type=jnp.float32) + bw_ref[...]  # (n_w*C, bb*HWp)
        ch = jnp.dot(wht_ref[...], winh_ref[...],
                     preferred_element_type=jnp.float32) + bh_ref[...]  # (n_h*C, bb*HWp)
        cw = jnp.where(cw > 0, cw, LEAKY_SLOPE * cw)   # per-branch LeakyReLU(0.2)
        ch = jnp.where(ch > 0, ch, LEAKY_SLOPE * ch)

        # sum over branches (1/n_convs folded into pooled stats + gn_eps_eff)
        res = cw[0:Cout, :]
        for j in range(1, n_w):
            res = res + cw[j * Cout:(j + 1) * Cout, :]
        for j in range(n_h):
            res = res + ch[j * Cout:(j + 1) * Cout, :]

        if needs_valid:
            valid = valid_ref[...]                     # (1, HWp) f32
            negpad = (valid - 1.0) * 1e30
        gamma = gamma_ref[...]
        beta = beta_ref[...]
        w1 = w1_ref[...]
        w2 = w2_ref[...]
        row_id = jax.lax.broadcasted_iota(jnp.int32, (Cout, 1), 0)
        in_gs = [(row_id >= g * gper) & (row_id < (g + 1) * gper) for g in range(N_GROUPS)]
        col2 = jax.lax.broadcasted_iota(jnp.int32, (Cout, 2), 1)

        # --- per-batch-element epilogue: ChannelAttention + GroupNorm, ONE store each ---
        for bi in range(block_b):
            r = res[:, bi * HWp:(bi + 1) * HWp]        # (Cout, HWp) f32
            if needs_valid:
                r = r * valid                          # zero the HW->HWp pad tail
                row_max = jnp.max(r + negpad, axis=1, keepdims=True)
            else:
                row_max = jnp.max(r, axis=1, keepdims=True)
            row_sum = jnp.sum(r, axis=1, keepdims=True)           # (Cout, 1)

            # ChannelAttention: sigmoid(fc(avgpool) + fc(maxpool)); bias-free shared MLP
            avg = row_sum * (inv_n * inv_hw)           # true pooled mean of branch-mean
            mx = row_max * inv_n                       # true pooled max  of branch-mean
            pooled = jnp.where(col2 == 0, avg, mx)     # (Cout, 2) = [avg | max]
            hmid = jnp.maximum(
                jnp.dot(w1, pooled, preferred_element_type=jnp.float32), 0.0)
            o = jnp.dot(w2, hmid, preferred_element_type=jnp.float32)  # (Cout, 2)
            att = jax.nn.sigmoid(o[:, 0:1] + o[:, 1:2])                # (Cout, 1)

            y = r * att                                # GroupNorm input (x n_convs)
            ysum = row_sum * att                       # per-row sums of y (reuse reduce)

            # group means broadcast back to rows via tiny selects (no relayout)
            mean_col = jnp.zeros((Cout, 1), jnp.float32)
            for g in range(N_GROUPS):
                gm = jnp.sum(ysum[g * gper:(g + 1) * gper, :],
                             axis=0, keepdims=True) * inv_cnt       # (1, 1)
                mean_col = jnp.where(in_gs[g], gm, mean_col)

            d = y - mean_col
            if needs_valid:
                d = d * valid                          # exclude pad lanes from variance
            drs = jnp.sum(d * d, axis=1, keepdims=True)              # (Cout, 1)
            istd_col = jnp.zeros((Cout, 1), jnp.float32)
            for g in range(N_GROUPS):
                gv = jnp.sum(drs[g * gper:(g + 1) * gper, :],
                             axis=0, keepdims=True) * inv_cnt
                istd_col = jnp.where(in_gs[g], jax.lax.rsqrt(gv + gn_eps_eff), istd_col)

            # lane-dense single store, already in NCHW (channel rows x flat spatial lanes)
            out_ref[bi] = (d * istd_col * gamma + beta).astype(out_ref.dtype)

        # TODO(synk): nn.Dropout2d(0.5) is stochastic in train mode; eval-mode identity used.

    return kernel


def init_params(key, in_channels, out_channels, mxu_dtype=jnp.bfloat16):
    specs = conv_specs()
    max_pad = max(p for _, _, p in specs)
    n_shift = 2 * max_pad + 1
    cin_p = ((in_channels + 7) // 8) * 8            # pad channels to a sublane tile
    keys = jax.random.split(key, len(specs) + 2)

    gain = math.sqrt(2.0)  # kaiming_normal_, mode='fan_out', nonlinearity='leaky_relu'
    taps = []
    for i, (_, k, _) in enumerate(specs):
        fan_out = out_channels * k
        std = gain / math.sqrt(fan_out)
        taps.append(std * jax.random.normal(keys[i], (k, out_channels, in_channels),
                                            jnp.float32))

    w_ids = [i for i, (o, _, _) in enumerate(specs) if o == "w"]
    h_ids = [i for i, (o, _, _) in enumerate(specs) if o == "h"]

    def fuse(ids):
        wf = jnp.zeros((len(ids) * out_channels, n_shift * cin_p), jnp.float32)
        for j, i in enumerate(ids):
            _, k, p = specs[i]
            for t in range(k):
                s = max_pad - p + t                  # shift index this tap reads
                wf = wf.at[j * out_channels:(j + 1) * out_channels,
                           s * cin_p:s * cin_p + in_channels].set(taps[i][t])
        return wf.astype(mxu_dtype)

    wwt = fuse(w_ids)                                # (n_w*Cout, n_shift*Cin_p) bf16
    wht = fuse(h_ids)                                # (n_h*Cout, n_shift*Cin_p) bf16
    bw = jnp.zeros((len(w_ids) * out_channels, 1), jnp.float32)   # conv bias init 0
    bh = jnp.zeros((len(h_ids) * out_channels, 1), jnp.float32)

    hid = out_channels // REDUCTION
    lim1 = 1.0 / math.sqrt(out_channels)
    w1 = jax.random.uniform(keys[-2], (hid, out_channels), jnp.float32, -lim1, lim1)
    lim2 = 1.0 / math.sqrt(hid)
    w2 = jax.random.uniform(keys[-1], (out_channels, hid), jnp.float32, -lim2, lim2)
    gamma = jnp.ones((out_channels, 1), jnp.float32)   # GroupNorm affine defaults
    beta = jnp.zeros((out_channels, 1), jnp.float32)
    return dict(wwt=wwt, wht=wht, bw=bw, bh=bh, w1=w1, w2=w2,
                gamma=gamma, beta=beta, cin_p=cin_p, n_w=len(w_ids), n_h=len(h_ids))


def inception_block_v2(x_nchw, params, out_dtype=jnp.float32):
    specs = conv_specs()
    max_pad = max(p for _, _, p in specs)
    n_shift = 2 * max_pad + 1
    B, Cin, H, W = x_nchw.shape
    HW = H * W
    HWp = ((HW + 127) // 128) * 128                  # lane-dense flat spatial
    Cout = params["gamma"].shape[0]
    cin_p = params["cin_p"]
    n_w, n_h = params["n_w"], params["n_h"]
    assert Cout % N_GROUPS == 0 and Cout >= REDUCTION

    # bf16 activations (halves input HBM traffic); single row-padded buffer.
    x = x_nchw.astype(jnp.bfloat16).reshape(B, Cin, HW)
    if cin_p > Cin:
        x = jnp.pad(x, ((0, 0), (0, cin_p - Cin), (0, 0)))
    xh = jnp.pad(x, ((0, 0), (0, 0), (max_pad * W, max_pad * W + (HWp - HW))))
    Lh = xh.shape[-1]

    # 1xk shift validity mask (kills row wrap-around in the flat layout); 0 on pad tail.
    w_idx = jnp.arange(HW, dtype=jnp.int32) % W
    d = jnp.arange(n_shift, dtype=jnp.int32)[:, None] - max_pad
    mask = (((w_idx[None, :] + d) >= 0) & ((w_idx[None, :] + d) < W)).astype(jnp.bfloat16)
    mask = jnp.pad(mask, ((0, 0), (0, HWp - HW)))
    valid = (jnp.arange(HWp, dtype=jnp.int32) < HW).astype(jnp.float32).reshape(1, HWp)

    out_bytes = jnp.dtype(out_dtype).itemsize

    def vmem_est(bb):
        xh_blk = 2 * bb * cin_p * Lh * 2                       # double-buffered bf16 input
        out_blk = 2 * bb * Cout * HWp * out_bytes              # double-buffered output
        win = 2 * (n_shift * cin_p) * (bb * HWp) * 2           # winh + winw bf16 scratch
        mats = (n_w + n_h) * Cout * bb * HWp * 4               # cw + ch f32 intermediates
        resv = 2 * Cout * bb * HWp * 4                         # res + working copy
        consts = (n_w + n_h) * Cout * (n_shift * cin_p) * 2 + 2 * n_shift * HWp * 4
        return xh_blk + out_blk + win + mats + resv + consts

    block_b = 1
    for bb in (4, 2, 1):
        if B % bb:
            continue
        if bb > 1 and B // bb < 2:
            continue                   # keep >= 2 grid steps so both v7x TCs get work
        if vmem_est(bb) <= 40 * 1024 * 1024:   # stay well under v7x's 64 MiB VMEM
            block_b = bb
            break
    # TODO(synk): if Cout*HW is too large even at block_b=1 (v7x 64 MiB VMEM), add an HW
    # tile grid axis with two-pass pooling/GroupNorm stats instead of one-block epilogue.

    vmem_limit = int(max(32 * 1024 * 1024, min(96 * 1024 * 1024, 2 * vmem_est(block_b))))

    consts = [mask, valid, params["wwt"], params["wht"], params["bw"], params["bh"],
              params["w1"], params["w2"], params["gamma"], params["beta"]]
    in_specs = [pl.BlockSpec((block_b, cin_p, Lh), lambda b: (b, 0, 0))]
    for arr in consts:
        in_specs.append(pl.BlockSpec(arr.shape, lambda b, nd=arr.ndim: (0,) * nd))

    kernel = make_kernel(W=W, HW=HW, HWp=HWp, Cout=Cout, cin_p=cin_p, n_shift=n_shift,
                         n_w=n_w, n_h=n_h, block_b=block_b, max_pad=max_pad)
    out = pl.pallas_call(
        kernel,
        out_shape=jax.ShapeDtypeStruct((B, Cout, HWp), out_dtype),
        grid=(B // block_b,),
        in_specs=in_specs,
        out_specs=pl.BlockSpec((block_b, Cout, HWp), lambda b: (b, 0, 0)),
        scratch_shapes=[pltpu.VMEM((n_shift * cin_p, block_b * HWp), jnp.bfloat16),
                        pltpu.VMEM((n_shift * cin_p, block_b * HWp), jnp.bfloat16)],
        compiler_params=pltpu.CompilerParams(
            dimension_semantics=("parallel",), vmem_limit_bytes=vmem_limit),
    )(xh, *consts)

    # Output is already NCHW-ordered (channel rows x flat spatial lanes).
    return out[..., :HW].reshape(B, Cout, H, W)


if __name__ == "__main__":
    key = jax.random.PRNGKey(0)
    kp, kx = jax.random.split(key)
    B, Cin, H, W = 2, 4, 16, 16
    Cout = 64  # divisible by 8 groups; Cout // 16 = 4 hidden units in the attention MLP
    x = jax.random.normal(kx, (B, Cin, H, W), jnp.float32)
    params = init_params(kp, Cin, Cout)
    fwd = jax.jit(lambda inp: inception_block_v2(inp, params))
    out = fwd(x)
    jax.block_until_ready(out)
    assert out.shape == (B, Cout, H, W)
    assert bool(jnp.all(jnp.isfinite(out)))
    print("KERNEL_OK")
</pallas_src>

<mosaic_0001>
module attributes {stable_mosaic.version = 11 : i64} {
  func.func @kernel(%arg0: i32, %arg1: memref<1x8x352xbf16, #tpu.memory_space<vmem>>, %arg2: memref<7x256xbf16, #tpu.memory_space<vmem>>, %arg3: memref<1x256xf32, #tpu.memory_space<vmem>>, %arg4: memref<256x56xbf16, #tpu.memory_space<vmem>>, %arg5: memref<192x56xbf16, #tpu.memory_space<vmem>>, %arg6: memref<256x1xf32, #tpu.memory_space<vmem>>, %arg7: memref<192x1xf32, #tpu.memory_space<vmem>>, %arg8: memref<4x64xf32, #tpu.memory_space<vmem>>, %arg9: memref<64x4xf32, #tpu.memory_space<vmem>>, %arg10: memref<64x1xf32, #tpu.memory_space<vmem>>, %arg11: memref<64x1xf32, #tpu.memory_space<vmem>>, %arg12: memref<1x64x256xf32, #tpu.memory_space<vmem>>, %arg13: memref<56x256xbf16, #tpu.memory_space<vmem>>, %arg14: memref<56x256xbf16, #tpu.memory_space<vmem>>) attributes {dimension_semantics = [#tpu.dimension_semantics<parallel>], iteration_bounds = array<i64: 2>, scalar_prefetch = 0 : i64, scratch_operands = 2 : i64, tpu.core_type = #tpu.core_type<tc>, window_params = [{transform_indices = @transform_0, window_bounds = array<i64: 1, 8, 352>}, {pipeline_mode = #tpu.pipeline_mode<synchronous>, transform_indices = @transform_1, window_bounds = array<i64: 7, 256>}, {pipeline_mode = #tpu.pipeline_mode<synchronous>, transform_indices = @transform_2, window_bounds = array<i64: 1, 256>}, {pipeline_mode = #tpu.pipeline_mode<synchronous>, transform_indices = @transform_3, window_bounds = array<i64: 256, 56>}, {pipeline_mode = #tpu.pipeline_mode<synchronous>, transform_indices = @transform_4, window_bounds = array<i64: 192, 56>}, {pipeline_mode = #tpu.pipeline_mode<synchronous>, transform_indices = @transform_5, window_bounds = array<i64: 256, 1>}, {pipeline_mode = #tpu.pipeline_mode<synchronous>, transform_indices = @transform_6, window_bounds = array<i64: 192, 1>}, {pipeline_mode = #tpu.pipeline_mode<synchronous>, transform_indices = @transform_7, window_bounds = array<i64: 4, 64>}, {pipeline_mode = #tpu.pipeline_mode<synchronous>, transform_indices = @transform_8, window_bounds = array<i64: 64, 4>}, {pipeline_mode = #tpu.pipeline_mode<synchronous>, transform_indices = @transform_9, window_bounds = array<i64: 64, 1>}, {pipeline_mode = #tpu.pipeline_mode<synchronous>, transform_indices = @transform_10, window_bounds = array<i64: 64, 1>}, {transform_indices = @transform_11, window_bounds = array<i64: 1, 64, 256>}]} {
    %c0 = arith.constant 0 : index
    %c0_0 = arith.constant 0 : index
    %0 = vector.load %arg2[%c0, %c0_0] : memref<7x256xbf16, #tpu.memory_space<vmem>>, vector<7x256xbf16>
    %c0_1 = arith.constant 0 : index
    %c0_2 = arith.constant 0 : index
    %c0_3 = arith.constant 0 : index
    %1 = vector.load %arg1[%c0_1, %c0_2, %c0_3] : memref<1x8x352xbf16, #tpu.memory_space<vmem>>, vector<1x8x256xbf16>
    %2 = vector.shape_cast %1 : vector<1x8x256xbf16> to vector<8x256xbf16>
    %c0_4 = arith.constant 0 : index
    %c0_5 = arith.constant 0 : index
    %3 = vector.load %arg13[%c0_4, %c0_5] : memref<56x256xbf16, #tpu.memory_space<vmem>>, vector<8x256xbf16>
    tpu.vector_store %arg13[%c0_4, %c0_5], %2 {strides = array<i32>} : memref<56x256xbf16, #tpu.memory_space<vmem>>, vector<8x256xbf16>,
    %c0_6 = arith.constant 0 : index
    %c0_7 = arith.constant 0 : index
    %c45 = arith.constant 45 : index
    %4 = vector.load %arg1[%c0_6, %c0_7, %c45] : memref<1x8x352xbf16, #tpu.memory_space<vmem>>, vector<1x8x256xbf16>
    %5 = vector.shape_cast %4 : vector<1x8x256xbf16> to vector<8x256xbf16>
    %6 = vector.extract_strided_slice %0 {offsets = [0, 0], sizes = [1, 256], strides = [1, 1]} : vector<7x256xbf16> to vector<1x256xbf16>
    %7 = vector.broadcast %6 : vector<1x256xbf16> to vector<8x256xbf16>
    %8 = arith.mulf %5, %7 : vector<8x256xbf16>
    %c0_8 = arith.constant 0 : index
    %c0_9 = arith.constant 0 : index
    %9 = vector.load %arg14[%c0_8, %c0_9] : memref<56x256xbf16, #tpu.memory_space<vmem>>, vector<8x256xbf16>
    tpu.vector_store %arg14[%c0_8, %c0_9], %8 {strides = array<i32>} : memref<56x256xbf16, #tpu.memory_space<vmem>>, vector<8x256xbf16>,
    %c0_10 = arith.constant 0 : index
    %c0_11 = arith.constant 0 : index
    %c16 = arith.constant 16 : index
    %10 = vector.load %arg1[%c0_10, %c0_11, %c16] : memref<1x8x352xbf16, #tpu.memory_space<vmem>>, vector<1x8x256xbf16>
    %11 = vector.shape_cast %10 : vector<1x8x256xbf16> to vector<8x256xbf16>
    %c8 = arith.constant 8 : index
    %c0_12 = arith.constant 0 : index
    %12 = vector.load %arg13[%c8, %c0_12] : memref<56x256xbf16, #tpu.memory_space<vmem>>, vector<8x256xbf16>
    tpu.vector_store %arg13[%c8, %c0_12], %11 {strides = array<i32>} : memref<56x256xbf16, #tpu.memory_space<vmem>>, vector<8x256xbf16>,
    %c0_13 = arith.constant 0 : index
    %c0_14 = arith.constant 0 : index
    %c46 = arith.constant 46 : index
    %13 = vector.load %arg1[%c0_13, %c0_14, %c46] : memref<1x8x352xbf16, #tpu.memory_space<vmem>>, vector<1x8x256xbf16>
    %14 = vector.shape_cast %13 : vector<1x8x256xbf16> to vector<8x256xbf16>
    %15 = vector.extract_strided_slice %0 {offsets = [1, 0], sizes = [1, 256], strides = [1, 1]} : vector<7x256xbf16> to vector<1x256xbf16>
    %16 = vector.broadcast %15 : vector<1x256xbf16> to vector<8x256xbf16>
    %17 = arith.mulf %14, %16 : vector<8x256xbf16>
    %c8_15 = arith.constant 8 : index
    %c0_16 = arith.constant 0 : index
    %18 = vector.load %arg14[%c8_15, %c0_16] : memref<56x256xbf16, #tpu.memory_space<vmem>>, vector<8x256xbf16>
    tpu.vector_store %arg14[%c8_15, %c0_16], %17 {strides = array<i32>} : memref<56x256xbf16, #tpu.memory_space<vmem>>, vector<8x256xbf16>,
    %c0_17 = arith.constant 0 : index
    %c0_18 = arith.constant 0 : index
    %c32 = arith.constant 32 : index
    %19 = vector.load %arg1[%c0_17, %c0_18, %c32] : memref<1x8x352xbf16, #tpu.memory_space<vmem>>, vector<1x8x256xbf16>
    %20 = vector.shape_cast %19 : vector<1x8x256xbf16> to vector<8x256xbf16>
    %c16_19 = arith.constant 16 : index
    %c0_20 = arith.constant 0 : index
    %21 = vector.load %arg13[%c16_19, %c0_20] : memref<56x256xbf16, #tpu.memory_space<vmem>>, vector<8x256xbf16>
    tpu.vector_store %arg13[%c16_19, %c0_20], %20 {strides = array<i32>} : memref<56x256xbf16, #tpu.memory_space<vmem>>, vector<8x256xbf16>,
    %c0_21 = arith.constant 0 : index
    %c0_22 = arith.constant 0 : index
    %c47 = arith.constant 47 : index
    %22 = vector.load %arg1[%c0_21, %c0_22, %c47] : memref<1x8x352xbf16, #tpu.memory_space<vmem>>, vector<1x8x256xbf16>
    %23 = vector.shape_cast %22 : vector<1x8x256xbf16> to vector<8x256xbf16>
    %24 = vector.extract_strided_slice %0 {offsets = [2, 0], sizes = [1, 256], strides = [1, 1]} : vector<7x256xbf16> to vector<1x256xbf16>
    %25 = vector.broadcast %24 : vector<1x256xbf16> to vector<8x256xbf16>
    %26 = arith.mulf %23, %25 : vector<8x256xbf16>
    %c16_23 = arith.constant 16 : index
    %c0_24 = arith.constant 0 : index
    %27 = vector.load %arg14[%c16_23, %c0_24] : memref<56x256xbf16, #tpu.memory_space<vmem>>, vector<8x256xbf16>
    tpu.vector_store %arg14[%c16_23, %c0_24], %26 {strides = array<i32>} : memref<56x256xbf16, #tpu.memory_space<vmem>>, vector<8x256xbf16>,
    %c0_25 = arith.constant 0 : index
    %c0_26 = arith.constant 0 : index
    %c48 = arith.constant 48 : index
    %28 = vector.load %arg1[%c0_25, %c0_26, %c48] : memref<1x8x352xbf16, #tpu.memory_space<vmem>>, vector<1x8x256xbf16>
    %29 = vector.shape_cast %28 : vector<1x8x256xbf16> to vector<8x256xbf16>
    %c24 = arith.constant 24 : index
    %c0_27 = arith.constant 0 : index
    %30 = vector.load %arg13[%c24, %c0_27] : memref<56x256xbf16, #tpu.memory_space<vmem>>, vector<8x256xbf16>
    tpu.vector_store %arg13[%c24, %c0_27], %29 {strides = array<i32>} : memref<56x256xbf16, #tpu.memory_space<vmem>>, vector<8x256xbf16>,
    %c0_28 = arith.constant 0 : index
    %c0_29 = arith.constant 0 : index
    %c48_30 = arith.constant 48 : index
    %31 = vector.load %arg1[%c0_28, %c0_29, %c48_30] : memref<1x8x352xbf16, #tpu.memory_space<vmem>>, vector<1x8x256xbf16>
    %32 = vector.shape_cast %31 : vector<1x8x256xbf16> to vector<8x256xbf16>
    %33 = vector.extract_strided_slice %0 {offsets = [3, 0], sizes = [1, 256], strides = [1, 1]} : vector<7x256xbf16> to vector<1x256xbf16>
    %34 = vector.broadcast %33 : vector<1x256xbf16> to vector<8x256xbf16>
    %35 = arith.mulf %32, %34 : vector<8x256xbf16>
    %c24_31 = arith.constant 24 : index
    %c0_32 = arith.constant 0 : index
    %36 = vector.load %arg14[%c24_31, %c0_32] : memref<56x256xbf16, #tpu.memory_space<vmem>>, vector<8x256xbf16>
    tpu.vector_store %arg14[%c24_31, %c0_32], %35 {strides = array<i32>} : memref<56x256xbf16, #tpu.memory_space<vmem>>, vector<8x256xbf16>,
    %c0_33 = arith.constant 0 : index
    %c0_34 = arith.constant 0 : index
    %c64 = arith.constant 64 : index
    %37 = vector.load %arg1[%c0_33, %c0_34, %c64] : memref<1x8x352xbf16, #tpu.memory_space<vmem>>, vector<1x8x256xbf16>
    %38 = vector.shape_cast %37 : vector<1x8x256xbf16> to vector<8x256xbf16>
    %c32_35 = arith.constant 32 : index
    %c0_36 = arith.constant 0 : index
    %39 = vector.load %arg13[%c32_35, %c0_36] : memref<56x256xbf16, #tpu.memory_space<vmem>>, vector<8x256xbf16>
    tpu.vector_store %arg13[%c32_35, %c0_36], %38 {strides = array<i32>} : memref<56x256xbf16, #tpu.memory_space<vmem>>, vector<8x256xbf16>,
    %c0_37 = arith.constant 0 : index
    %c0_38 = arith.constant 0 : index
    %c49 = arith.constant 49 : index
    %40 = vector.load %arg1[%c0_37, %c0_38, %c49] : memref<1x8x352xbf16, #tpu.memory_space<vmem>>, vector<1x8x256xbf16>
    %41 = vector.shape_cast %40 : vector<1x8x256xbf16> to vector<8x256xbf16>
    %42 = vector.extract_strided_slice %0 {offsets = [4, 0], sizes = [1, 256], strides = [1, 1]} : vector<7x256xbf16> to vector<1x256xbf16>
    %43 = vector.broadcast %42 : vector<1x256xbf16> to vector<8x256xbf16>
    %44 = arith.mulf %41, %43 : vector<8x256xbf16>
    %c32_39 = arith.constant 32 : index
    %c0_40 = arith.constant 0 : index
    %45 = vector.load %arg14[%c32_39, %c0_40] : memref<56x256xbf16, #tpu.memory_space<vmem>>, vector<8x256xbf16>
    tpu.vector_store %arg14[%c32_39, %c0_40], %44 {strides = array<i32>} : memref<56x256xbf16, #tpu.memory_space<vmem>>, vector<8x256xbf16>,
    %c0_41 = arith.constant 0 : index
    %c0_42 = arith.constant 0 : index
    %c80 = arith.constant 80 : index
    %46 = vector.load %arg1[%c0_41, %c0_42, %c80] : memref<1x8x352xbf16, #tpu.memory_space<vmem>>, vector<1x8x256xbf16>
    %47 = vector.shape_cast %46 : vector<1x8x256xbf16> to vector<8x256xbf16>
    %c40 = arith.constant 40 : index
    %c0_43 = arith.constant 0 : index
    %48 = vector.load %arg13[%c40, %c0_43] : memref<56x256xbf16, #tpu.memory_space<vmem>>, vector<8x256xbf16>
    tpu.vector_store %arg13[%c40, %c0_43], %47 {strides = array<i32>} : memref<56x256xbf16, #tpu.memory_space<vmem>>, vector<8x256xbf16>,
    %c0_44 = arith.constant 0 : index
    %c0_45 = arith.constant 0 : index
    %c50 = arith.constant 50 : index
    %49 = vector.load %arg1[%c0_44, %c0_45, %c50] : memref<1x8x352xbf16, #tpu.memory_space<vmem>>, vector<1x8x256xbf16>
    %50 = vector.shape_cast %49 : vector<1x8x256xbf16> to vector<8x256xbf16>
    %51 = vector.extract_strided_slice %0 {offsets = [5, 0], sizes = [1, 256], strides = [1, 1]} : vector<7x256xbf16> to vector<1x256xbf16>
    %52 = vector.broadcast %51 : vector<1x256xbf16> to vector<8x256xbf16>
    %53 = arith.mulf %50, %52 : vector<8x256xbf16>
    %c40_46 = arith.constant 40 : index
    %c0_47 = arith.constant 0 : index
    %54 = vector.load %arg14[%c40_46, %c0_47] : memref<56x256xbf16, #tpu.memory_space<vmem>>, vector<8x256xbf16>
    tpu.vector_store %arg14[%c40_46, %c0_47], %53 {strides = array<i32>} : memref<56x256xbf16, #tpu.memory_space<vmem>>, vector<8x256xbf16>,
    %c0_48 = arith.constant 0 : index
    %c0_49 = arith.constant 0 : index
    %c96 = arith.constant 96 : index
    %55 = vector.load %arg1[%c0_48, %c0_49, %c96] : memref<1x8x352xbf16, #tpu.memory_space<vmem>>, vector<1x8x256xbf16>
    %56 = vector.shape_cast %55 : vector<1x8x256xbf16> to vector<8x256xbf16>
    %c48_50 = arith.constant 48 : index
    %c0_51 = arith.constant 0 : index
    %57 = vector.load %arg13[%c48_50, %c0_51] : memref<56x256xbf16, #tpu.memory_space<vmem>>, vector<8x256xbf16>
    tpu.vector_store %arg13[%c48_50, %c0_51], %56 {strides = array<i32>} : memref<56x256xbf16, #tpu.memory_space<vmem>>, vector<8x256xbf16>,
    %c0_52 = arith.constant 0 : index
    %c0_53 = arith.constant 0 : index
    %c51 = arith.constant 51 : index
    %58 = vector.load %arg1[%c0_52, %c0_53, %c51] : memref<1x8x352xbf16, #tpu.memory_space<vmem>>, vector<1x8x256xbf16>
    %59 = vector.shape_cast %58 : vector<1x8x256xbf16> to vector<8x256xbf16>
    %60 = vector.extract_strided_slice %0 {offsets = [6, 0], sizes = [1, 256], strides = [1, 1]} : vector<7x256xbf16> to vector<1x256xbf16>
    %61 = vector.broadcast %60 : vector<1x256xbf16> to vector<8x256xbf16>
    %62 = arith.mulf %59, %61 : vector<8x256xbf16>
    %c48_54 = arith.constant 48 : index
    %c0_55 = arith.constant 0 : index
    %63 = vector.load %arg14[%c48_54, %c0_55] : memref<56x256xbf16, #tpu.memory_space<vmem>>, vector<8x256xbf16>
    tpu.vector_store %arg14[%c48_54, %c0_55], %62 {strides = array<i32>} : memref<56x256xbf16, #tpu.memory_space<vmem>>, vector<8x256xbf16>,
    %c0_56 = arith.constant 0 : index
    %c0_57 = arith.constant 0 : index
    %64 = vector.load %arg4[%c0_56, %c0_57] : memref<256x56xbf16, #tpu.memory_space<vmem>>, vector<256x56xbf16>
    %c0_58 = arith.constant 0 : index
    %c0_59 = arith.constant 0 : index
    %65 = vector.load %arg14[%c0_58, %c0_59] : memref<56x256xbf16, #tpu.memory_space<vmem>>, vector<56x256xbf16>
    %cst = arith.constant dense<0.000000e+00> : vector<256x256xf32>
    %66 = tpu.matmul %64, %65, %cst {dimension_numbers = #tpu.dot_dimension_numbers<[1], [0], [0], [1], [0, 0, 1, 1], [], []>} : vector<256x56xbf16>, vector<56x256xbf16>, vector<256x256xf32> -> vector<256x256xf32>
    %c0_60 = arith.constant 0 : index
    %c0_61 = arith.constant 0 : index
    %67 = vector.load %arg6[%c0_60, %c0_61] : memref<256x1xf32, #tpu.memory_space<vmem>>, vector<256x1xf32>
    %68 = vector.broadcast %67 : vector<256x1xf32> to vector<256x256xf32>
    %69 = arith.addf %66, %68 : vector<256x256xf32>
    %c0_62 = arith.constant 0 : index
    %c0_63 = arith.constant 0 : index
    %70 = vector.load %arg5[%c0_62, %c0_63] : memref<192x56xbf16, #tpu.memory_space<vmem>>, vector<192x56xbf16>
    %c0_64 = arith.constant 0 : index
    %c0_65 = arith.constant 0 : index
    %71 = vector.load %arg13[%c0_64, %c0_65] : memref<56x256xbf16, #tpu.memory_space<vmem>>, vector<56x256xbf16>
    %cst_66 = arith.constant dense<0.000000e+00> : vector<192x256xf32>
    %72 = tpu.matmul %70, %71, %cst_66 {dimension_numbers = #tpu.dot_dimension_numbers<[1], [0], [0], [1], [0, 0, 1, 1], [], []>} : vector<192x56xbf16>, vector<56x256xbf16>, vector<192x256xf32> -> vector<192x256xf32>
    %c0_67 = arith.constant 0 : index
    %c0_68 = arith.constant 0 : index
    %73 = vector.load %arg7[%c0_67, %c0_68] : memref<192x1xf32, #tpu.memory_space<vmem>>, vector<192x1xf32>
    %74 = vector.broadcast %73 : vector<192x1xf32> to vector<192x256xf32>
    %75 = arith.addf %72, %74 : vector<192x256xf32>
    %cst_69 = arith.constant 0.000000e+00 : f32
    %76 = vector.broadcast %cst_69 : f32 to vector<256x256xf32>
    %77 = arith.cmpf ogt, %69, %76 : vector<256x256xf32>
    %cst_70 = arith.constant 2.000000e-01 : f32
    %78 = vector.broadcast %cst_70 : f32 to vector<256x256xf32>
    %79 = arith.mulf %78, %69 : vector<256x256xf32>
    %80 = arith.select %77, %69, %79 : vector<256x256xi1>, vector<256x256xf32>
    %cst_71 = arith.constant 0.000000e+00 : f32
    %81 = vector.broadcast %cst_71 : f32 to vector<192x256xf32>
    %82 = arith.cmpf ogt, %75, %81 : vector<192x256xf32>
    %cst_72 = arith.constant 2.000000e-01 : f32
    %83 = vector.broadcast %cst_72 : f32 to vector<192x256xf32>
    %84 = arith.mulf %83, %75 : vector<192x256xf32>
    %85 = arith.select %82, %75, %84 : vector<192x256xi1>, vector<192x256xf32>
    %86 = vector.extract_strided_slice %80 {offsets = [0, 0], sizes = [64, 256], strides = [1, 1]} : vector<256x256xf32> to vector<64x256xf32>
    %87 = vector.extract_strided_slice %80 {offsets = [64, 0], sizes = [64, 256], strides = [1, 1]} : vector<256x256xf32> to vector<64x256xf32>
    %88 = arith.addf %86, %87 : vector<64x256xf32>
    %89 = vector.extract_strided_slice %80 {offsets = [128, 0], sizes = [64, 256], strides = [1, 1]} : vector<256x256xf32> to vector<64x256xf32>
    %90 = arith.addf %88, %89 : vector<64x256xf32>
    %91 = vector.extract_strided_slice %80 {offsets = [192, 0], sizes = [64, 256], strides = [1, 1]} : vector<256x256xf32> to vector<64x256xf32>
    %92 = arith.addf %90, %91 : vector<64x256xf32>
    %93 = vector.extract_strided_slice %85 {offsets = [0, 0], sizes = [64, 256], strides = [1, 1]} : vector<192x256xf32> to vector<64x256xf32>
    %94 = arith.addf %92, %93 : vector<64x256xf32>
    %95 = vector.extract_strided_slice %85 {offsets = [64, 0], sizes = [64, 256], strides = [1, 1]} : vector<192x256xf32> to vector<64x256xf32>
    %96 = arith.addf %94, %95 : vector<64x256xf32>
    %97 = vector.extract_strided_slice %85 {offsets = [128, 0], sizes = [64, 256], strides = [1, 1]} : vector<192x256xf32> to vector<64x256xf32>
    %98 = arith.addf %96, %97 : vector<64x256xf32>
    %c0_73 = arith.constant 0 : index
    %c0_74 = arith.constant 0 : index
    %99 = vector.load %arg10[%c0_73, %c0_74] : memref<64x1xf32, #tpu.memory_space<vmem>>, vector<64x1xf32>
    %c0_75 = arith.constant 0 : index
    %c0_76 = arith.constant 0 : index
    %100 = vector.load %arg11[%c0_75, %c0_76] : memref<64x1xf32, #tpu.memory_space<vmem>>, vector<64x1xf32>
    %c0_77 = arith.constant 0 : index
    %c0_78 = arith.constant 0 : index
    %101 = vector.load %arg8[%c0_77, %c0_78] : memref<4x64xf32, #tpu.memory_space<vmem>>, vector<4x64xf32>
    %c0_79 = arith.constant 0 : index
    %c0_80 = arith.constant 0 : index
    %102 = vector.load %arg9[%c0_79, %c0_80] : memref<64x4xf32, #tpu.memory_space<vmem>>, vector<64x4xf32>
    %103 = tpu.iota {dimensions = array<i32: 0>} : vector<64x1xi32>
    %c0_i32 = arith.constant 0 : i32
    %104 = vector.broadcast %c0_i32 : i32 to vector<64x1xi32>
    %105 = arith.cmpi sge, %103, %104 : vector<64x1xi32>
    %c8_i32 = arith.constant 8 : i32
    %106 = vector.broadcast %c8_i32 : i32 to vector<64x1xi32>
    %107 = arith.cmpi slt, %103, %106 : vector<64x1xi32>
    %108 = arith.andi %105, %107 : vector<64x1xi1>
    %c8_i32_81 = arith.constant 8 : i32
    %109 = vector.broadcast %c8_i32_81 : i32 to vector<64x1xi32>
    %110 = arith.cmpi sge, %103, %109 : vector<64x1xi32>
    %c16_i32 = arith.constant 16 : i32
    %111 = vector.broadcast %c16_i32 : i32 to vector<64x1xi32>
    %112 = arith.cmpi slt, %103, %111 : vector<64x1xi32>
    %113 = arith.andi %110, %112 : vector<64x1xi1>
    %c16_i32_82 = arith.constant 16 : i32
    %114 = vector.broadcast %c16_i32_82 : i32 to vector<64x1xi32>
    %115 = arith.cmpi sge, %103, %114 : vector<64x1xi32>
    %c24_i32 = arith.constant 24 : i32
    %116 = vector.broadcast %c24_i32 : i32 to vector<64x1xi32>
    %117 = arith.cmpi slt, %103, %116 : vector<64x1xi32>
    %118 = arith.andi %115, %117 : vector<64x1xi1>
    %c24_i32_83 = arith.constant 24 : i32
    %119 = vector.broadcast %c24_i32_83 : i32 to vector<64x1xi32>
    %120 = arith.cmpi sge, %103, %119 : vector<64x1xi32>
    %c32_i32 = arith.constant 32 : i32
    %121 = vector.broadcast %c32_i32 : i32 to vector<64x1xi32>
    %122 = arith.cmpi slt, %103, %121 : vector<64x1xi32>
    %123 = arith.andi %120, %122 : vector<64x1xi1>
    %c32_i32_84 = arith.constant 32 : i32
    %124 = vector.broadcast %c32_i32_84 : i32 to vector<64x1xi32>
    %125 = arith.cmpi sge, %103, %124 : vector<64x1xi32>
    %c40_i32 = arith.constant 40 : i32
    %126 = vector.broadcast %c40_i32 : i32 to vector<64x1xi32>
    %127 = arith.cmpi slt, %103, %126 : vector<64x1xi32>
    %128 = arith.andi %125, %127 : vector<64x1xi1>
    %c40_i32_85 = arith.constant 40 : i32
    %129 = vector.broadcast %c40_i32_85 : i32 to vector<64x1xi32>
    %130 = arith.cmpi sge, %103, %129 : vector<64x1xi32>
    %c48_i32 = arith.constant 48 : i32
    %131 = vector.broadcast %c48_i32 : i32 to vector<64x1xi32>
    %132 = arith.cmpi slt, %103, %131 : vector<64x1xi32>
    %133 = arith.andi %130, %132 : vector<64x1xi1>
    %c48_i32_86 = arith.constant 48 : i32
    %134 = vector.broadcast %c48_i32_86 : i32 to vector<64x1xi32>
    %135 = arith.cmpi sge, %103, %134 : vector<64x1xi32>
    %c56_i32 = arith.constant 56 : i32
    %136 = vector.broadcast %c56_i32 : i32 to vector<64x1xi32>
    %137 = arith.cmpi slt, %103, %136 : vector<64x1xi32>
    %138 = arith.andi %135, %137 : vector<64x1xi1>
    %c56_i32_87 = arith.constant 56 : i32
    %139 = vector.broadcast %c56_i32_87 : i32 to vector<64x1xi32>
    %140 = arith.cmpi sge, %103, %139 : vector<64x1xi32>
    %c64_i32 = arith.constant 64 : i32
    %141 = vector.broadcast %c64_i32 : i32 to vector<64x1xi32>
    %142 = arith.cmpi slt, %103, %141 : vector<64x1xi32>
    %143 = arith.andi %140, %142 : vector<64x1xi1>
    %144 = tpu.iota {dimensions = array<i32: 1>} : vector<64x2xi32>
    %cst_88 = arith.constant dense<0xFF800000> : vector<64xf32>
    %145 = vector.multi_reduction <maximumf>, %98, %cst_88 [1] : vector<64x256xf32> to vector<64xf32>
    %146 = vector.shape_cast %145 : vector<64xf32> to vector<64x1xf32>
    %cst_89 = arith.constant dense<0.000000e+00> : vector<64xf32>
    %147 = vector.multi_reduction <add>, %98, %cst_89 [1] : vector<64x256xf32> to vector<64xf32>
    %148 = vector.shape_cast %147 : vector<64xf32> to vector<64x1xf32>
    %cst_90 = arith.constant 5.58035739E-4 : f32
    %149 = vector.broadcast %cst_90 : f32 to vector<64x1xf32>
    %150 = arith.mulf %148, %149 : vector<64x1xf32>
    %cst_91 = arith.constant 0.142857149 : f32
    %151 = vector.broadcast %cst_91 : f32 to vector<64x1xf32>
    %152 = arith.mulf %146, %151 : vector<64x1xf32>
    %c0_i32_92 = arith.constant 0 : i32
    %153 = vector.broadcast %c0_i32_92 : i32 to vector<64x2xi32>
    %154 = arith.cmpi eq, %144, %153 : vector<64x2xi32>
    %155 = vector.shape_cast %150 : vector<64x1xf32> to vector<64x1xf32>
    %156 = vector.broadcast %155 : vector<64x1xf32> to vector<64x2xf32>
    %157 = vector.shape_cast %152 : vector<64x1xf32> to vector<64x1xf32>
    %158 = vector.broadcast %157 : vector<64x1xf32> to vector<64x2xf32>
    %159 = arith.select %154, %156, %158 : vector<64x2xi1>, vector<64x2xf32>
    %cst_93 = arith.constant dense<0.000000e+00> : vector<4x2xf32>
    %160 = tpu.matmul %101, %159, %cst_93 {dimension_numbers = #tpu.dot_dimension_numbers<[1], [0], [0], [1], [0, 0, 1, 1], [], []>} : vector<4x64xf32>, vector<64x2xf32>, vector<4x2xf32> -> vector<4x2xf32>
    %cst_94 = arith.constant 0.000000e+00 : f32
    %161 = vector.broadcast %cst_94 : f32 to vector<4x2xf32>
    %162 = arith.maximumf %160, %161 : vector<4x2xf32>
    %cst_95 = arith.constant dense<0.000000e+00> : vector<64x2xf32>
    %163 = tpu.matmul %102, %162, %cst_95 {dimension_numbers = #tpu.dot_dimension_numbers<[1], [0], [0], [1], [0, 0, 1, 1], [], []>} : vector<64x4xf32>, vector<4x2xf32>, vector<64x2xf32> -> vector<64x2xf32>
    %164 = vector.extract_strided_slice %163 {offsets = [0, 0], sizes = [64, 1], strides = [1, 1]} : vector<64x2xf32> to vector<64x1xf32>
    %165 = vector.extract_strided_slice %163 {offsets = [0, 1], sizes = [64, 1], strides = [1, 1]} : vector<64x2xf32> to vector<64x1xf32>
    %166 = arith.addf %164, %165 : vector<64x1xf32>
    %167 = arith.negf %166 : vector<64x1xf32>
    %168 = math.exp %167 : vector<64x1xf32>
    %cst_96 = arith.constant 1.000000e+00 : f32
    %169 = vector.broadcast %cst_96 : f32 to vector<64x1xf32>
    %170 = arith.addf %169, %168 : vector<64x1xf32>
    %171 = arith.divf %169, %170 : vector<64x1xf32>
    %172 = vector.broadcast %171 : vector<64x1xf32> to vector<64x256xf32>
    %173 = arith.mulf %98, %172 : vector<64x256xf32>
    %174 = arith.mulf %148, %171 : vector<64x1xf32>
    %cst_97 = arith.constant 0.000000e+00 : f32
    %175 = vector.broadcast %cst_97 : f32 to vector<64x1xf32>
    %176 = vector.extract_strided_slice %174 {offsets = [0, 0], sizes = [8, 1], strides = [1, 1]} : vector<64x1xf32> to vector<8x1xf32>
    %cst_98 = arith.constant dense<0.000000e+00> : vector<1xf32>
    %177 = vector.multi_reduction <add>, %176, %cst_98 [0] : vector<8x1xf32> to vector<1xf32>
    %178 = vector.shape_cast %177 : vector<1xf32> to vector<1x1xf32>
    %cst_99 = arith.constant 4.8828125E-4 : f32
    %179 = vector.broadcast %cst_99 : f32 to vector<1x1xf32>
    %180 = arith.mulf %178, %179 : vector<1x1xf32>
    %181 = vector.shape_cast %180 : vector<1x1xf32> to vector<1x1xf32>
    %182 = vector.broadcast %181 : vector<1x1xf32> to vector<64x1xf32>
    %183 = arith.select %108, %182, %175 : vector<64x1xi1>, vector<64x1xf32>
    %184 = vector.extract_strided_slice %174 {offsets = [8, 0], sizes = [8, 1], strides = [1, 1]} : vector<64x1xf32> to vector<8x1xf32>
    %cst_100 = arith.constant dense<0.000000e+00> : vector<1xf32>
    %185 = vector.multi_reduction <add>, %184, %cst_100 [0] : vector<8x1xf32> to vector<1xf32>
    %186 = vector.shape_cast %185 : vector<1xf32> to vector<1x1xf32>
    %cst_101 = arith.constant 4.8828125E-4 : f32
    %187 = vector.broadcast %cst_101 : f32 to vector<1x1xf32>
    %188 = arith.mulf %186, %187 : vector<1x1xf32>
    %189 = vector.shape_cast %188 : vector<1x1xf32> to vector<1x1xf32>
    %190 = vector.broadcast %189 : vector<1x1xf32> to vector<64x1xf32>
    %191 = arith.select %113, %190, %183 : vector<64x1xi1>, vector<64x1xf32>
    %192 = vector.extract_strided_slice %174 {offsets = [16, 0], sizes = [8, 1], strides = [1, 1]} : vector<64x1xf32> to vector<8x1xf32>
    %cst_102 = arith.constant dense<0.000000e+00> : vector<1xf32>
    %193 = vector.multi_reduction <add>, %192, %cst_102 [0] : vector<8x1xf32> to vector<1xf32>
    %194 = vector.shape_cast %193 : vector<1xf32> to vector<1x1xf32>
    %cst_103 = arith.constant 4.8828125E-4 : f32
    %195 = vector.broadcast %cst_103 : f32 to vector<1x1xf32>
    %196 = arith.mulf %194, %195 : vector<1x1xf32>
    %197 = vector.shape_cast %196 : vector<1x1xf32> to vector<1x1xf32>
    %198 = vector.broadcast %197 : vector<1x1xf32> to vector<64x1xf32>
    %199 = arith.select %118, %198, %191 : vector<64x1xi1>, vector<64x1xf32>
    %200 = vector.extract_strided_slice %174 {offsets = [24, 0], sizes = [8, 1], strides = [1, 1]} : vector<64x1xf32> to vector<8x1xf32>
    %cst_104 = arith.constant dense<0.000000e+00> : vector<1xf32>
    %201 = vector.multi_reduction <add>, %200, %cst_104 [0] : vector<8x1xf32> to vector<1xf32>
    %202 = vector.shape_cast %201 : vector<1xf32> to vector<1x1xf32>
    %cst_105 = arith.constant 4.8828125E-4 : f32
    %203 = vector.broadcast %cst_105 : f32 to vector<1x1xf32>
    %204 = arith.mulf %202, %203 : vector<1x1xf32>
    %205 = vector.shape_cast %204 : vector<1x1xf32> to vector<1x1xf32>
    %206 = vector.broadcast %205 : vector<1x1xf32> to vector<64x1xf32>
    %207 = arith.select %123, %206, %199 : vector<64x1xi1>, vector<64x1xf32>
    %208 = vector.extract_strided_slice %174 {offsets = [32, 0], sizes = [8, 1], strides = [1, 1]} : vector<64x1xf32> to vector<8x1xf32>
    %cst_106 = arith.constant dense<0.000000e+00> : vector<1xf32>
    %209 = vector.multi_reduction <add>, %208, %cst_106 [0] : vector<8x1xf32> to vector<1xf32>
    %210 = vector.shape_cast %209 : vector<1xf32> to vector<1x1xf32>
    %cst_107 = arith.constant 4.8828125E-4 : f32
    %211 = vector.broadcast %cst_107 : f32 to vector<1x1xf32>
    %212 = arith.mulf %210, %211 : vector<1x1xf32>
    %213 = vector.shape_cast %212 : vector<1x1xf32> to vector<1x1xf32>
    %214 = vector.broadcast %213 : vector<1x1xf32> to vector<64x1xf32>
    %215 = arith.select %128, %214, %207 : vector<64x1xi1>, vector<64x1xf32>
    %216 = vector.extract_strided_slice %174 {offsets = [40, 0], sizes = [8, 1], strides = [1, 1]} : vector<64x1xf32> to vector<8x1xf32>
    %cst_108 = arith.constant dense<0.000000e+00> : vector<1xf32>
    %217 = vector.multi_reduction <add>, %216, %cst_108 [0] : vector<8x1xf32> to vector<1xf32>
    %218 = vector.shape_cast %217 : vector<1xf32> to vector<1x1xf32>
    %cst_109 = arith.constant 4.8828125E-4 : f32
    %219 = vector.broadcast %cst_109 : f32 to vector<1x1xf32>
    %220 = arith.mulf %218, %219 : vector<1x1xf32>
    %221 = vector.shape_cast %220 : vector<1x1xf32> to vector<1x1xf32>
    %222 = vector.broadcast %221 : vector<1x1xf32> to vector<64x1xf32>
    %223 = arith.select %133, %222, %215 : vector<64x1xi1>, vector<64x1xf32>
    %224 = vector.extract_strided_slice %174 {offsets = [48, 0], sizes = [8, 1], strides = [1, 1]} : vector<64x1xf32> to vector<8x1xf32>
    %cst_110 = arith.constant dense<0.000000e+00> : vector<1xf32>
    %225 = vector.multi_reduction <add>, %224, %cst_110 [0] : vector<8x1xf32> to vector<1xf32>
    %226 = vector.shape_cast %225 : vector<1xf32> to vector<1x1xf32>
    %cst_111 = arith.constant 4.8828125E-4 : f32
    %227 = vector.broadcast %cst_111 : f32 to vector<1x1xf32>
    %228 = arith.mulf %226, %227 : vector<1x1xf32>
    %229 = vector.shape_cast %228 : vector<1x1xf32> to vector<1x1xf32>
    %230 = vector.broadcast %229 : vector<1x1xf32> to vector<64x1xf32>
    %231 = arith.select %138, %230, %223 : vector<64x1xi1>, vector<64x1xf32>
    %232 = vector.extract_strided_slice %174 {offsets = [56, 0], sizes = [8, 1], strides = [1, 1]} : vector<64x1xf32> to vector<8x1xf32>
    %cst_112 = arith.constant dense<0.000000e+00> : vector<1xf32>
    %233 = vector.multi_reduction <add>, %232, %cst_112 [0] : vector<8x1xf32> to vector<1xf32>
    %234 = vector.shape_cast %233 : vector<1xf32> to vector<1x1xf32>
    %cst_113 = arith.constant 4.8828125E-4 : f32
    %235 = vector.broadcast %cst_113 : f32 to vector<1x1xf32>
    %236 = arith.mulf %234, %235 : vector<1x1xf32>
    %237 = vector.shape_cast %236 : vector<1x1xf32> to vector<1x1xf32>
    %238 = vector.broadcast %237 : vector<1x1xf32> to vector<64x1xf32>
    %239 = arith.select %143, %238, %231 : vector<64x1xi1>, vector<64x1xf32>
    %240 = vector.broadcast %239 : vector<64x1xf32> to vector<64x256xf32>
    %241 = arith.subf %173, %240 : vector<64x256xf32>
    %242 = arith.mulf %241, %241 : vector<64x256xf32>
    %cst_114 = arith.constant dense<0.000000e+00> : vector<64xf32>
    %243 = vector.multi_reduction <add>, %242, %cst_114 [1] : vector<64x256xf32> to vector<64xf32>
    %244 = vector.shape_cast %243 : vector<64xf32> to vector<64x1xf32>
    %cst_115 = arith.constant 0.000000e+00 : f32
    %245 = vector.broadcast %cst_115 : f32 to vector<64x1xf32>
    %246 = vector.extract_strided_slice %244 {offsets = [0, 0], sizes = [8, 1], strides = [1, 1]} : vector<64x1xf32> to vector<8x1xf32>
    %cst_116 = arith.constant dense<0.000000e+00> : vector<1xf32>
    %247 = vector.multi_reduction <add>, %246, %cst_116 [0] : vector<8x1xf32> to vector<1xf32>
    %248 = vector.shape_cast %247 : vector<1xf32> to vector<1x1xf32>
    %cst_117 = arith.constant 4.8828125E-4 : f32
    %249 = vector.broadcast %cst_117 : f32 to vector<1x1xf32>
    %250 = arith.mulf %248, %249 : vector<1x1xf32>
    %cst_118 = arith.constant 4.900000e-04 : f32
    %251 = vector.broadcast %cst_118 : f32 to vector<1x1xf32>
    %252 = arith.addf %250, %251 : vector<1x1xf32>
    %253 = math.rsqrt %252 : vector<1x1xf32>
    %254 = vector.shape_cast %253 : vector<1x1xf32> to vector<1x1xf32>
    %255 = vector.broadcast %254 : vector<1x1xf32> to vector<64x1xf32>
    %256 = arith.select %108, %255, %245 : vector<64x1xi1>, vector<64x1xf32>
    %257 = vector.extract_strided_slice %244 {offsets = [8, 0], sizes = [8, 1], strides = [1, 1]} : vector<64x1xf32> to vector<8x1xf32>
    %cst_119 = arith.constant dense<0.000000e+00> : vector<1xf32>
    %258 = vector.multi_reduction <add>, %257, %cst_119 [0] : vector<8x1xf32> to vector<1xf32>
    %259 = vector.shape_cast %258 : vector<1xf32> to vector<1x1xf32>
    %cst_120 = arith.constant 4.8828125E-4 : f32
    %260 = vector.broadcast %cst_120 : f32 to vector<1x1xf32>
    %261 = arith.mulf %259, %260 : vector<1x1xf32>
    %cst_121 = arith.constant 4.900000e-04 : f32
    %262 = vector.broadcast %cst_121 : f32 to vector<1x1xf32>
    %263 = arith.addf %261, %262 : vector<1x1xf32>
    %264 = math.rsqrt %263 : vector<1x1xf32>
    %265 = vector.shape_cast %264 : vector<1x1xf32> to vector<1x1xf32>
    %266 = vector.broadcast %265 : vector<1x1xf32> to vector<64x1xf32>
    %267 = arith.select %113, %266, %256 : vector<64x1xi1>, vector<64x1xf32>
    %268 = vector.extract_strided_slice %244 {offsets = [16, 0], sizes = [8, 1], strides = [1, 1]} : vector<64x1xf32> to vector<8x1xf32>
    %cst_122 = arith.constant dense<0.000000e+00> : vector<1xf32>
    %269 = vector.multi_reduction <add>, %268, %cst_122 [0] : vector<8x1xf32> to vector<1xf32>
    %270 = vector.shape_cast %269 : vector<1xf32> to vector<1x1xf32>
    %cst_123 = arith.constant 4.8828125E-4 : f32
    %271 = vector.broadcast %cst_123 : f32 to vector<1x1xf32>
    %272 = arith.mulf %270, %271 : vector<1x1xf32>
    %cst_124 = arith.constant 4.900000e-04 : f32
    %273 = vector.broadcast %cst_124 : f32 to vector<1x1xf32>
    %274 = arith.addf %272, %273 : vector<1x1xf32>
    %275 = math.rsqrt %274 : vector<1x1xf32>
    %276 = vector.shape_cast %275 : vector<1x1xf32> to vector<1x1xf32>
    %277 = vector.broadcast %276 : vector<1x1xf32> to vector<64x1xf32>
    %278 = arith.select %118, %277, %267 : vector<64x1xi1>, vector<64x1xf32>
    %279 = vector.extract_strided_slice %244 {offsets = [24, 0], sizes = [8, 1], strides = [1, 1]} : vector<64x1xf32> to vector<8x1xf32>
    %cst_125 = arith.constant dense<0.000000e+00> : vector<1xf32>
    %280 = vector.multi_reduction <add>, %279, %cst_125 [0] : vector<8x1xf32> to vector<1xf32>
    %281 = vector.shape_cast %280 : vector<1xf32> to vector<1x1xf32>
    %cst_126 = arith.constant 4.8828125E-4 : f32
    %282 = vector.broadcast %cst_126 : f32 to vector<1x1xf32>
    %283 = arith.mulf %281, %282 : vector<1x1xf32>
    %cst_127 = arith.constant 4.900000e-04 : f32
    %284 = vector.broadcast %cst_127 : f32 to vector<1x1xf32>
    %285 = arith.addf %283, %284 : vector<1x1xf32>
    %286 = math.rsqrt %285 : vector<1x1xf32>
    %287 = vector.shape_cast %286 : vector<1x1xf32> to vector<1x1xf32>
    %288 = vector.broadcast %287 : vector<1x1xf32> to vector<64x1xf32>
    %289 = arith.select %123, %288, %278 : vector<64x1xi1>, vector<64x1xf32>
    %290 = vector.extract_strided_slice %244 {offsets = [32, 0], sizes = [8, 1], strides = [1, 1]} : vector<64x1xf32> to vector<8x1xf32>
    %cst_128 = arith.constant dense<0.000000e+00> : vector<1xf32>
    %291 = vector.multi_reduction <add>, %290, %cst_128 [0] : vector<8x1xf32> to vector<1xf32>
    %292 = vector.shape_cast %291 : vector<1xf32> to vector<1x1xf32>
    %cst_129 = arith.constant 4.8828125E-4 : f32
    %293 = vector.broadcast %cst_129 : f32 to vector<1x1xf32>
    %294 = arith.mulf %292, %293 : vector<1x1xf32>
    %cst_130 = arith.constant 4.900000e-04 : f32
    %295 = vector.broadcast %cst_130 : f32 to vector<1x1xf32>
    %296 = arith.addf %294, %295 : vector<1x1xf32>
    %297 = math.rsqrt %296 : vector<1x1xf32>
    %298 = vector.shape_cast %297 : vector<1x1xf32> to vector<1x1xf32>
    %299 = vector.broadcast %298 : vector<1x1xf32> to vector<64x1xf32>
    %300 = arith.select %128, %299, %289 : vector<64x1xi1>, vector<64x1xf32>
    %301 = vector.extract_strided_slice %244 {offsets = [40, 0], sizes = [8, 1], strides = [1, 1]} : vector<64x1xf32> to vector<8x1xf32>
    %cst_131 = arith.constant dense<0.000000e+00> : vector<1xf32>
    %302 = vector.multi_reduction <add>, %301, %cst_131 [0] : vector<8x1xf32> to vector<1xf32>
    %303 = vector.shape_cast %302 : vector<1xf32> to vector<1x1xf32>
    %cst_132 = arith.constant 4.8828125E-4 : f32
    %304 = vector.broadcast %cst_132 : f32 to vector<1x1xf32>
    %305 = arith.mulf %303, %304 : vector<1x1xf32>
    %cst_133 = arith.constant 4.900000e-04 : f32
    %306 = vector.broadcast %cst_133 : f32 to vector<1x1xf32>
    %307 = arith.addf %305, %306 : vector<1x1xf32>
    %308 = math.rsqrt %307 : vector<1x1xf32>
    %309 = vector.shape_cast %308 : vector<1x1xf32> to vector<1x1xf32>
    %310 = vector.broadcast %309 : vector<1x1xf32> to vector<64x1xf32>
    %311 = arith.select %133, %310, %300 : vector<64x1xi1>, vector<64x1xf32>
    %312 = vector.extract_strided_slice %244 {offsets = [48, 0], sizes = [8, 1], strides = [1, 1]} : vector<64x1xf32> to vector<8x1xf32>
    %cst_134 = arith.constant dense<0.000000e+00> : vector<1xf32>
    %313 = vector.multi_reduction <add>, %312, %cst_134 [0] : vector<8x1xf32> to vector<1xf32>
    %314 = vector.shape_cast %313 : vector<1xf32> to vector<1x1xf32>
    %cst_135 = arith.constant 4.8828125E-4 : f32
    %315 = vector.broadcast %cst_135 : f32 to vector<1x1xf32>
    %316 = arith.mulf %314, %315 : vector<1x1xf32>
    %cst_136 = arith.constant 4.900000e-04 : f32
    %317 = vector.broadcast %cst_136 : f32 to vector<1x1xf32>
    %318 = arith.addf %316, %317 : vector<1x1xf32>
    %319 = math.rsqrt %318 : vector<1x1xf32>
    %320 = vector.shape_cast %319 : vector<1x1xf32> to vector<1x1xf32>
    %321 = vector.broadcast %320 : vector<1x1xf32> to vector<64x1xf32>
    %322 = arith.select %138, %321, %311 : vector<64x1xi1>, vector<64x1xf32>
    %323 = vector.extract_strided_slice %244 {offsets = [56, 0], sizes = [8, 1], strides = [1, 1]} : vector<64x1xf32> to vector<8x1xf32>
    %cst_137 = arith.constant dense<0.000000e+00> : vector<1xf32>
    %324 = vector.multi_reduction <add>, %323, %cst_137 [0] : vector<8x1xf32> to vector<1xf32>
    %325 = vector.shape_cast %324 : vector<1xf32> to vector<1x1xf32>
    %cst_138 = arith.constant 4.8828125E-4 : f32
    %326 = vector.broadcast %cst_138 : f32 to vector<1x1xf32>
    %327 = arith.mulf %325, %326 : vector<1x1xf32>
    %cst_139 = arith.constant 4.900000e-04 : f32
    %328 = vector.broadcast %cst_139 : f32 to vector<1x1xf32>
    %329 = arith.addf %327, %328 : vector<1x1xf32>
    %330 = math.rsqrt %329 : vector<1x1xf32>
    %331 = vector.shape_cast %330 : vector<1x1xf32> to vector<1x1xf32>
    %332 = vector.broadcast %331 : vector<1x1xf32> to vector<64x1xf32>
    %333 = arith.select %143, %332, %322 : vector<64x1xi1>, vector<64x1xf32>
    %334 = vector.broadcast %333 : vector<64x1xf32> to vector<64x256xf32>
    %335 = arith.mulf %241, %334 : vector<64x256xf32>
    %336 = vector.broadcast %99 : vector<64x1xf32> to vector<64x256xf32>
    %337 = arith.mulf %335, %336 : vector<64x256xf32>
    %338 = vector.broadcast %100 : vector<64x1xf32> to vector<64x256xf32>
    %339 = arith.addf %337, %338 : vector<64x256xf32>
    %c0_140 = arith.constant 0 : index
    %c0_141 = arith.constant 0 : index
    %c0_142 = arith.constant 0 : index
    %340 = vector.load %arg12[%c0_140, %c0_141, %c0_142] : memref<1x64x256xf32, #tpu.memory_space<vmem>>, vector<1x64x256xf32>
    %341 = vector.shape_cast %340 : vector<1x64x256xf32> to vector<64x256xf32>
    %342 = vector.shape_cast %339 : vector<64x256xf32> to vector<1x64x256xf32>
    tpu.vector_store %arg12[%c0_140, %c0_141, %c0_142], %342 {strides = array<i32>} : memref<1x64x256xf32, #tpu.memory_space<vmem>>, vector<1x64x256xf32>,
    return
  }
  func.func @transform_0(%arg0: i32) -> (i32, i32, i32) {
    %c0_i32 = arith.constant 0 : i32
    %c0_i32_0 = arith.constant 0 : i32
    %c0_i32_1 = arith.constant 0 : i32
    return %arg0, %c0_i32, %c0_i32_0 : i32, i32, i32
  }
  func.func @transform_1(%arg0: i32) -> (i32, i32) {
    %c0_i32 = arith.constant 0 : i32
    %c0_i32_0 = arith.constant 0 : i32
    %c0_i32_1 = arith.constant 0 : i32
    return %c0_i32, %c0_i32_0 : i32, i32
  }
  func.func @transform_2(%arg0: i32) -> (i32, i32) {
    %c0_i32 = arith.constant 0 : i32
    %c0_i32_0 = arith.constant 0 : i32
    %c0_i32_1 = arith.constant 0 : i32
    return %c0_i32, %c0_i32_0 : i32, i32
  }
  func.func @transform_3(%arg0: i32) -> (i32, i32) {
    %c0_i32 = arith.constant 0 : i32
    %c0_i32_0 = arith.constant 0 : i32
    %c0_i32_1 = arith.constant 0 : i32
    return %c0_i32, %c0_i32_0 : i32, i32
  }
  func.func @transform_4(%arg0: i32) -> (i32, i32) {
    %c0_i32 = arith.constant 0 : i32
    %c0_i32_0 = arith.constant 0 : i32
    %c0_i32_1 = arith.constant 0 : i32
    return %c0_i32, %c0_i32_0 : i32, i32
  }
  func.func @transform_5(%arg0: i32) -> (i32, i32) {
    %c0_i32 = arith.constant 0 : i32
    %c0_i32_0 = arith.constant 0 : i32
    %c0_i32_1 = arith.constant 0 : i32
    return %c0_i32, %c0_i32_0 : i32, i32
  }
  func.func @transform_6(%arg0: i32) -> (i32, i32) {
    %c0_i32 = arith.constant 0 : i32
    %c0_i32_0 = arith.constant 0 : i32
    %c0_i32_1 = arith.constant 0 : i32
    return %c0_i32, %c0_i32_0 : i32, i32
  }
  func.func @transform_7(%arg0: i32) -> (i32, i32) {
    %c0_i32 = arith.constant 0 : i32
    %c0_i32_0 = arith.constant 0 : i32
    %c0_i32_1 = arith.constant 0 : i32
    return %c0_i32, %c0_i32_0 : i32, i32
  }
  func.func @transform_8(%arg0: i32) -> (i32, i32) {
    %c0_i32 = arith.constant 0 : i32
    %c0_i32_0 = arith.constant 0 : i32
    %c0_i32_1 = arith.constant 0 : i32
    return %c0_i32, %c0_i32_0 : i32, i32
  }
  func.func @transform_9(%arg0: i32) -> (i32, i32) {
    %c0_i32 = arith.constant 0 : i32
    %c0_i32_0 = arith.constant 0 : i32
    %c0_i32_1 = arith.constant 0 : i32
    return %c0_i32, %c0_i32_0 : i32, i32
  }
  func.func @transform_10(%arg0: i32) -> (i32, i32) {
    %c0_i32 = arith.constant 0 : i32
    %c0_i32_0 = arith.constant 0 : i32
    %c0_i32_1 = arith.constant 0 : i32
    return %c0_i32, %c0_i32_0 : i32, i32
  }
  func.func @transform_11(%arg0: i32) -> (i32, i32, i32) {
    %c0_i32 = arith.constant 0 : i32
    %c0_i32_0 = arith.constant 0 : i32
    %c0_i32_1 = arith.constant 0 : i32
    return %arg0, %c0_i32, %c0_i32_0 : i32, i32, i32
  }
}

</mosaic_0001>

<bundles_post_ra>
// kernel: _lambda_.1
= control target key start
LH: loop header
LB: loop body
LE: loop exit
PB: predicated region body
PF: predicated region fallthrough
CT: control target
= control target key end

     0   :  { %s3833_s16 = smov 0   ;;  %s5286_s0 = inlined_call_operand.vmem [shape: bf16[2,8,352], index: 0, kind: input, shape index: {}]   ;;  %s5287_s1 = inlined_call_operand.vmem [shape: bf16[7,256], index: 1, kind: input, shape index: {}]   ;;  %s5288_s2 = inlined_call_operand.vmem [shape: f32[1,256], index: 2, kind: input, shape index: {}]   ;;  %s5289_s3 = inlined_call_operand.vmem [shape: bf16[256,56], index: 3, kind: input, shape index: {}]   ;;  %s5290_s4 = inlined_call_operand.vmem [shape: bf16[192,56], index: 4, kind: input, shape index: {}]   ;;  %s5291_s5 = inlined_call_operand.vmem [shape: f32[256,1], index: 5, kind: input, shape index: {}]   ;;  %s5292_s6 = inlined_call_operand.vmem [shape: f32[192,1], index: 6, kind: input, shape index: {}]   ;;  %s5293_s7 = inlined_call_operand.vmem [shape: f32[4,64], index: 7, kind: input, shape index: {}]   ;;  %s5294_s8 = inlined_call_operand.vmem [shape: f32[64,4], index: 8, kind: input, shape index: {}]   ;;  %s5295_s9 = inlined_call_operand.vmem [shape: f32[64,1], index: 9, kind: input, shape index: {}]   ;;  %s5296_s10 = inlined_call_operand.vmem [shape: f32[64,1], index: 10, kind: input, shape index: {}]   ;;  %s5297_s11 = inlined_call_operand.vmem [shape: f32[2,64,256], index: 11, kind: output, shape index: {}]  }
   0x1 LB: > { %s3469_s17 = sadd.s32 4294967295, %s3749_s16   ;;  %p3473_p0 = scmp.ge.s32.totalorder %s3749_s16, 1  ;;  %s3749_s16 = sphi %s3833_s16, %s21_s16  }
   0x2   : > { %p337_p1 = scmp.lt.s32.totalorder %s3749_s16, 3 }
   0x4   : > { %p338_p2 = pnand %p3473_p0, %p337_p1 }
   0x6   : > { %341 = sbr.rel (%p338_p2) target bundleno = 1732 (0x6c4), region = 64 }
   0xb   : > { %v388_v0 = vld [vmem:[%s5287_s1] sm:$0xff]  ;;  %v5298_v1 = vlaneseq  ;;  %s3751_s20 = smov 51   ;;  %s3752_s21 = smov 50   ;;  %vm737_vm0 = vcmask 416768   ;;  %vm634_vm1 = vcmask 400384   ;;  %vm531_vm2 = vcmask 384000  }
   0xc   : > { %v3477_v2 = vcombine.low %v388_v0, %v388_v0  ;;  %v3478_v3 = vcombine.high %v388_v0, %v388_v0  ;;  %s3753_s22 = smov 49   ;;  %s3754_s23 = smov 47   ;;  %vm420_vm3 = vcmask 367616   ;;  %v3760_v58 = vmov 0  }
   0xd   : > { %v402_v4 = vshrl.u32 %v5298_v1, 7  ;;  %s3755_s24 = smov 48   ;;  %s3756_s25 = smov 45   ;;  %3663 = vset.pattern.permute.xlu1 %v3760_v58  ;;  %1190 = vmatprep.mubr.bf16.mxu0 %v3760_v58  ;;  %vm685_vm4 = vcmask 408576   ;;  %vm583_vm5 = vcmask 392192   ;;  %vm479_vm6 = vcmask 375808  }
   0xe   : > { %v399_v5 = vpack.i.b16 %v3477_v2, %v3477_v2  ;;  %v406_v6 = vpack.i.b16 %v3478_v3, %v3478_v3  ;;  %v457_v7 = vshrl.u32 %v3477_v2, 16  ;;  %v464_v8 = vshrl.u32 %v3478_v3, 16  ;;  %s3757_s26 = smov 46   ;;  %p377_p3 = scmp.lt.s32.totalorder %s3469_s17, 1  ;;  %3664 = vset.pattern.permute.xlu0 %v3760_v58  ;;  %1695 = vmatprep.mubr.bf16.mxu1 %v3760_v58 }
   0xf   : > { %v723_v9 = vsub.s32 3, %v402_v4  ;;  %v620_v10 = vsub.s32 2, %v402_v4  ;;  %v517_v11 = vsub.s32 1, %v402_v4  ;;  %v403_v14 = vsub.s32 0, %v402_v4  ;;  %s3758_s2 = smov 77   ;;  %s3759_s12 = smov 79  }
  0x10   : > { %v458_v12 = vpack.i.b16 %v457_v7, %v457_v7  ;;  %v465_v13 = vpack.i.b16 %v464_v8, %v464_v8  ;;  %s5427_s17 = smov (!%p377_p3, %s3469_s17), 1  ;;  %s3761_s13 = smov 81   ;;  %vm434_vm7 = vcmask 1043456   ;;  %vm752_vm8 = vcmask 629760  }
  0x11   : > { %v724_v15 = vrot.slane %v399_v5, %v723_v9  ;;  %v728_v16 = vrot.slane %v406_v6, %v723_v9  ;;  %v621_v17 = vrot.slane %v399_v5, %v620_v10  ;;  %v625_v18 = vrot.slane %v406_v6, %v620_v10  ;;  %s3632_s27 = smul.u32 12, %s5427_s17  ;;  %s3762_s14 = smov 83  }
  0x12   : > { %v672_v19 = vrot.slane %v458_v12, %v620_v10  ;;  %v676_v20 = vrot.slane %v465_v13, %v620_v10  ;;  %v518_v21 = vrot.slane %v399_v5, %v517_v11  ;;  %v522_v22 = vrot.slane %v406_v6, %v517_v11  ;;  %s3763_s15 = smov 78   ;;  %s3764_s18 = smov 80  }
  0x13   : > { %v3485_v23 = vcombine.low %v724_v15, %v728_v16  ;;  %v3483_v25 = vcombine.low %v621_v17, %v625_v18  ;;  %v570_v26 = vrot.slane %v458_v12, %v517_v11  ;;  %v574_v27 = vrot.slane %v465_v13, %v517_v11  ;;  %s3856_s30 = scalar_lea.vmem %s5286_s0, %s3632_s27  ;;  %s3765_s19 = smov 82  }
  0x14   : > { %v3484_v24 = vcombine.low %v672_v19, %v676_v20  ;;  %v3481_v28 = vcombine.low %v518_v21, %v522_v22  ;;  %v404_v29 = vrot.slane %v399_v5, %v403_v14  ;;  %v411_v30 = vrot.slane %v406_v6, %v403_v14  ;;  %v720_v37 = vld [vmem:[%s3856_s30 + $0x8] sm:$0xf]  ;;  %v3860_v40 = vld [vmem:[%s3856_s30] sm:$0xff] }
  0x15   : > { %734 = vrot.lane.b32.xlu0 %v3485_v23, %s3751_s20  ;;  %v3482_v31 = vcombine.low %v570_v26, %v574_v27  ;;  %v463_v32 = vrot.slane %v458_v12, %v403_v14  ;;  %v470_v33 = vrot.slane %v465_v13, %v403_v14  ;;  %v617_v45 = vld [vmem:[%s3856_s30 + $0x8] sm:$0xf]  ;;  %s3766_s20 = smov 32   ;;  %v810_v23 = vld [vmem:[%s5291_s5 + $0x78] sm:$0xff]  ;;  %v801_v26 = vld [vmem:[%s5291_s5 + $0x30] sm:$0xff]  ;;  %vm649_vm9 = vcmask 646144  }
  0x16   : > { %682 = vrot.lane.b32.xlu1 %v3484_v24, %s3752_s21  ;;  %v3479_v34 = vcombine.low %v404_v29, %v411_v30  ;;  %v514_v49 = vld [vmem:[%s3856_s30 + $0x8] sm:$0xf]  ;;  %s3767_s21 = smov 64   ;;  %v802_v24 = vld [vmem:[%s5291_s5 + $0x38] sm:$0xff]  ;;  %vm700_vm10 = vcmask 637952   ;;  %vm546_vm11 = vcmask 662528  }
  0x17   : > { %v3480_v35 = vcombine.low %v463_v32, %v470_v33  ;;  %v392_v57 = vld [vmem:[%s3856_s30 + $0x8] sm:$0xf]  ;;  %v826_v29 = vld [vmem:[%s5291_s5 + $0xf8] sm:$0xff]  ;;  %v817_v32 = vld [vmem:[%s5291_s5 + $0xb0] sm:$0xff]  ;;  %vm561_vm12 = vcmask 654336   ;;  %vm436_vm13 = vcmask 678912  }
  0x18   : > { %v668_v2 = vld [vmem:[%s3856_s30 + $0x8] sm:$0xf]  ;;  %v825_v33 = vld [vmem:[%s5291_s5 + $0xf0] sm:$0xff]  ;;  %vm494_vm14 = vcmask 670720   ;;  %vm715_vm15 = vcmask 261120  }
  0x19   : > { %631 = vrot.lane.b32.xlu0 %v3483_v25, %s3753_s22  ;;  %v566_v6 = vld [vmem:[%s3856_s30 + $0x8] sm:$0xf]  ;;  %s3768_s22 = smov 96   ;;  %v818_v25 = vld [vmem:[%s5291_s5 + $0xb8] sm:$0xff] }
  0x1a   : > { %528 = vrot.lane.b32.xlu1 %v3481_v28, %s3754_s23  ;;  %v456_v12 = vld [vmem:[%s3856_s30 + $0x8] sm:$0xf]  ;;  %s3769_s23 = smov 112   ;;  %v809_v28 = vld [vmem:[%s5291_s5 + $0x70] sm:$0xff] }
  0x1b   : > { %v705_v17 = vld [vmem:[%s3856_s30 + $0x8] sm:$0xf] }
  0x1c   : > { %v602_v18 = vld [vmem:[%s3856_s30 + $0x8] sm:$0xf] }
  0x1d   : > { %580 = vrot.lane.b32.xlu0 %v3482_v31, %s3755_s24  ;;  %v654_v19 = vld [vmem:[%s3856_s30 + $0x8] sm:$0xf]  ;;  %v807_v31 = vld [vmem:[%s5291_s5 + $0x60] sm:$0xff] }
  0x1e   : > { %417 = vrot.lane.b32.xlu1 %v3479_v34, %s3756_s25  ;;  %v499_v20 = vld [vmem:[%s3856_s30 + $0x8] sm:$0xf]  ;;  %v799_v34 = vld [vmem:[%s5291_s5 + $0x20] sm:$0xff] }
  0x1f   : > { %v551_v21 = vld [vmem:[%s3856_s30 + $0x8] sm:$0xf] }
  0x20   : > { %v441_v22 = vld [vmem:[%s3856_s30 + $0x8] sm:$0xf] }
  0x21   : > { %476 = vrot.lane.b32.xlu0 %v3480_v35, %s3757_s26  ;;  %v808_v27 = vld [vmem:[%s5291_s5 + $0x68] sm:$0xff]  ;;  %v798_v35 = vld [vmem:[%s5291_s5 + $0x18] sm:$0xff] }
  0x22   : > { %v800_v30 = vld [vmem:[%s5291_s5 + $0x28] sm:$0xff] }
  0x87   : > { %v735_v36 = vpop.permute.xlu0 %734 }
  0x88   : > { %v736_v38 = vrot.slane %v735_v36, 4  ;;  %v683_v39 = vpop.permute.xlu1 %682 }
  0x89   : > { %v684_v61 = vrot.slane %v683_v39, 4 }
  0x8a   : > { %v738_v41 = vsel %vm737_vm0, %v736_v38, %v735_v36  ;;  %v742_v42 = vmul.bf16 %v736_v38, %v720_v37  ;;  %v816_v36 = vld [vmem:[%s5291_s5 + $0xa8] sm:$0xff]  ;;  %v815_v37 = vld [vmem:[%s5291_s5 + $0xa0] sm:$0xff]  ;;  %v1389_v38 = vld [vmem:[%s5292_s6 + $0x38] sm:$0xff]  ;;  %vm1102_vm0 = vcmask 457728  }
  0x8b   : > { %v632_v43 = vpop.permute.xlu0 %631  ;;  %v741_v44 = vmul.bf16 %v738_v41, %v3860_v40  ;;  %v686_v3 = vsel %vm685_vm4, %v684_v61, %v683_v39  ;;  %v690_v7 = vmul.bf16 %v684_v61, %v668_v2  ;;  %v1388_v39 = vld [vmem:[%s5292_s6 + $0x30] sm:$0xff]  ;;  %v806_v41 = vld [vmem:[%s5291_s5 + $0x58] sm:$0xff] }
  0x8c   : > { %v633_v46 = vrot.slane %v632_v43, 4  ;;  %747 = vrot.lane.b32.xlu0 %v742_v42, %s3758_s2  ;;  %v529_v47 = vpop.permute.xlu1 %528  ;;  %v689_v8 = vmul.bf16 %v3860_v40, %v686_v3  ;;  %v797_v42 = vld [vmem:[%s5291_s5 + $0x10] sm:$0xff] }
  0x8d   : > { %v530_v48 = vrot.slane %v529_v47, 4  ;;  %745 = vrot.lane.b32.xlu1 %v741_v44, %s3758_s2  ;;  %v814_v44 = vld [vmem:[%s5291_s5 + $0x98] sm:$0xff]  ;;  %v1404_v3 = vld [vmem:[%s5292_s6 + $0xb0] sm:$0xff]  ;;  %s3772_s2 = smov 127  }
  0x8e   : > { %v635_v50 = vsel %vm634_vm1, %v633_v46, %v632_v43  ;;  %v639_v51 = vmul.bf16 %v633_v46, %v617_v45  ;;  %v824_v43 = vld [vmem:[%s5291_s5 + $0xe8] sm:$0xff]  ;;  %v1397_v45 = vld [vmem:[%s5292_s6 + $0x78] sm:$0xff]  ;;  %vm612_vm1 = vcmask 523264  }
  0x8f   : > { %v638_v52 = vmul.bf16 %v3860_v40, %v635_v50  ;;  %v532_v53 = vsel %vm531_vm2, %v530_v48, %v529_v47  ;;  %v536_v55 = vmul.bf16 %v530_v48, %v514_v49  ;;  %v581_v60 = vpop.permute.xlu0 %580  ;;  %v1387_v46 = vld [vmem:[%s5292_s6 + $0x28] sm:$0xff]  ;;  %v805_v47 = vld [vmem:[%s5291_s5 + $0x50] sm:$0xff]  ;;  %v1405_v48 = vld [vmem:[%s5292_s6 + $0xb8] sm:$0xff]  ;;  %vm509_vm2 = vcmask 785408  }
  0x90   : > { %644 = vrot.lane.b32.xlu0 %v639_v51, %s3759_s12  ;;  %v418_v54 = vpop.permute.xlu1 %417  ;;  %v535_v59 = vmul.bf16 %v3860_v40, %v532_v53  ;;  %v582_v4 = vrot.slane %v581_v60, 4  ;;  %v823_v49 = vld [vmem:[%s5291_s5 + $0xe0] sm:$0xff]  ;;  %v804_v50 = vld [vmem:[%s5291_s5 + $0x48] sm:$0xff]  ;;  %v1396_v51 = vld [vmem:[%s5292_s6 + $0x70] sm:$0xff] }
  0x91   : > { %v419_v56 = vrot.slane %v418_v54, 4  ;;  %642 = vrot.lane.b32.xlu1 %v638_v52, %s3759_s12  ;;  %v822_v52 = vld [vmem:[%s5291_s5 + $0xd8] sm:$0xff]  ;;  %v796_v53 = vld [vmem:[%s5291_s5 + $0x8] sm:$0xff] }
  0x92   : > { %v584_v9 = vsel %vm583_vm5, %v582_v4, %v581_v60  ;;  %v588_v11 = vmul.bf16 %v582_v4, %v566_v6 }
  0x93   : > { %v421_v62 = vsel %vm420_vm3, %v419_v56, %v418_v54  ;;  %v425_v63 = vmul.bf16 %v419_v56, %v392_v57  ;;  %v477_v5 = vpop.permute.xlu0 %476  ;;  %v587_v13 = vmul.bf16 %v3860_v40, %v584_v9  ;;  %v1395_v54 = vld [vmem:[%s5292_s6 + $0x68] sm:$0xff]  ;;  %v795_v56 = vld [vmem:[%s5291_s5] sm:$0xff]  ;;  %vm451_vm3 = vcmask 916480  }
  0x94   : > { %541 = vrot.lane.b32.xlu0 %v536_v55, %s3761_s13  ;;  %v424_v0 = vmul.bf16 %v3860_v40, %v421_v62  ;;  %v478_v10 = vrot.slane %v477_v5, 4  ;;  %v813_v55 = vld [vmem:[%s5291_s5 + $0x90] sm:$0xff] }
  0x95   : > { %539 = vrot.lane.b32.xlu1 %v535_v59, %s3761_s13  ;;  %v1386_v59 = vld [vmem:[%s5292_s6 + $0x20] sm:$0xff] }
  0x96   : > { %v480_v14 = vsel %vm479_vm6, %v478_v10, %v477_v5  ;;  %v484_v15 = vmul.bf16 %v478_v10, %v456_v12 }
  0x97   : > { %v483_v16 = vmul.bf16 %v3860_v40, %v480_v14 }
  0x98   : > { %430 = vrot.lane.b32.xlu0 %v425_v63, %s3762_s14  ;;  %v812_v63 = vld [vmem:[%s5291_s5 + $0x88] sm:$0xff] }
  0x99   : > { %428 = vrot.lane.b32.xlu1 %v424_v0, %s3762_s14 }
  0x9c   : > { %695 = vrot.lane.b32.xlu0 %v690_v7, %s3763_s15 }
  0x9d   : > { %693 = vrot.lane.b32.xlu1 %v689_v8, %s3763_s15  ;;  %v1385_v8 = vld [vmem:[%s5292_s6 + $0x18] sm:$0xff] }
  0xa0   : > { %593 = vrot.lane.b32.xlu0 %v588_v11, %s3764_s18  ;;  %v803_v11 = vld [vmem:[%s5291_s5 + $0x40] sm:$0xff] }
  0xa1   : > { %591 = vrot.lane.b32.xlu1 %v587_v13, %s3764_s18  ;;  %v1403_v13 = vld [vmem:[%s5292_s6 + $0xa8] sm:$0xff] }
  0xa4   : > { %489 = vrot.lane.b32.xlu0 %v484_v15, %s3765_s19  ;;  %v821_v15 = vld [vmem:[%s5291_s5 + $0xd0] sm:$0xff] }
  0xa5   : > { %487 = vrot.lane.b32.xlu1 %v483_v16, %s3765_s19 }
  0xa8   : > { %710 = vrot.lane.b32.xlu0 %v705_v17, %s3766_s20 }
  0xa9   : > { %708 = vrot.lane.b32.xlu1 %v3860_v40, %s3766_s20 }
  0xac   : > { %607 = vrot.lane.b32.xlu0 %v602_v18, %s3767_s21 }
  0xad   : > { %605 = vrot.lane.b32.xlu1 %v3860_v40, %s3767_s21 }
  0xb0   : > { %659 = vrot.lane.b32.xlu0 %v654_v19, %s3755_s24  ;;  %v820_v19 = vld [vmem:[%s5291_s5 + $0xc8] sm:$0xff] }
  0xb1   : > { %657 = vrot.lane.b32.xlu1 %v3860_v40, %s3755_s24  ;;  %s3580_s24 = sshll.u32 %s5427_s17, 7 }
  0xb4   : > { %504 = vrot.lane.b32.xlu0 %v499_v20, %s3768_s22 }
  0xb5   : > { %502 = vrot.lane.b32.xlu1 %v3860_v40, %s3768_s22 }
  0xb8   : > { %556 = vrot.lane.b32.xlu0 %v551_v21, %s3764_s18  ;;  %v1394_v21 = vld [vmem:[%s5292_s6 + $0x60] sm:$0xff] }
  0xb9   : > { %554 = vrot.lane.b32.xlu1 %v3860_v40, %s3764_s18 }
  0xbc   : > { %446 = vrot.lane.b32.xlu0 %v441_v22, %s3769_s23 }
  0xbd   : > { %444 = vrot.lane.b32.xlu1 %v3860_v40, %s3769_s23 }
  0xc0   : > { %904 = vperm.xlu0 %3664, %v810_v23  }
  0xc1   : > { %864 = vperm.xlu1 %3663, %v802_v24  }
  0xc4   : > { %944 = vperm.xlu0 %3664, %v818_v25  }
  0xc5   : > { %859 = vperm.xlu1 %3663, %v801_v26  }
  0xc8   : > { %894 = vperm.xlu0 %3664, %v808_v27  }
  0xc9   : > { %899 = vperm.xlu1 %3663, %v809_v28   ;;  %v1393_v28 = vld [vmem:[%s5292_s6 + $0x58] sm:$0xff] }
  0xcc   : > { %984 = vperm.xlu0 %3664, %v826_v29  }
  0xcd   : > { %854 = vperm.xlu1 %3663, %v800_v30  }
  0xd0   : > { %889 = vperm.xlu0 %3664, %v807_v31  }
  0xd1   : > { %939 = vperm.xlu1 %3663, %v817_v32   ;;  %v811_v32 = vld [vmem:[%s5291_s5 + $0x80] sm:$0xff] }
  0xd4   : > { %979 = vperm.xlu0 %3664, %v825_v33  }
  0xd5   : > { %849 = vperm.xlu1 %3663, %v799_v34  }
  0xd8   : > { %844 = vperm.xlu0 %3664, %v798_v35  }
  0xd9   : > { %934 = vperm.xlu1 %3663, %v816_v36  }
  0xdc   : > { %929 = vperm.xlu0 %3664, %v815_v37  }
  0xdd   : > { %1443 = vperm.xlu1 %3663, %v1389_v38  }
  0xe0   : > { %1438 = vperm.xlu0 %3664, %v1388_v39  }
  0xe1   : > { %884 = vperm.xlu1 %3663, %v806_v41  }
  0xe4   : > { %839 = vperm.xlu0 %3664, %v797_v42  }
  0xe5   : > { %974 = vperm.xlu1 %3663, %v824_v43   ;;  %v819_v43 = vld [vmem:[%s5291_s5 + $0xc0] sm:$0xff] }
  0xe8   : > { %924 = vperm.xlu0 %3664, %v814_v44  }
  0xe9   : > { %1483 = vperm.xlu1 %3663, %v1397_v45  }
  0xec   : > { %1433 = vperm.xlu0 %3664, %v1387_v46   ;;  %v1384_v46 = vld [vmem:[%s5292_s6 + $0x10] sm:$0xff] }
  0xed   : > { %879 = vperm.xlu1 %3663, %v805_v47  }
  0xf0   : > { %1523 = vperm.xlu0 %3664, %v1405_v48  }
  0xf1   : > { %969 = vperm.xlu1 %3663, %v823_v49  }
  0xf4   : > { %874 = vperm.xlu0 %3664, %v804_v50  }
  0xf5   : > { %1478 = vperm.xlu1 %3663, %v1396_v51  }
  0xf8   : > { %964 = vperm.xlu0 %3664, %v822_v52  }
  0xf9   : > { %834 = vperm.xlu1 %3663, %v796_v53  }
  0xfc   : > { %1473 = vperm.xlu0 %3664, %v1395_v54  }
  0xfd   : > { %919 = vperm.xlu1 %3663, %v813_v55   ;;  %v1392_v55 = vld [vmem:[%s5292_s6 + $0x50] sm:$0xff] }
  0xfe   : > { %v748_v57 = vpop.permute.xlu0 %747 }
  0xff   : > { %v750_v60 = vrot.slane %v748_v57, 4  ;;  %v746_v61 = vpop.permute.xlu1 %745 }
 0x100   : > { %v749_v62 = vrot.slane %v746_v61, 4  ;;  %829 = vperm.xlu0 %3664, %v795_v56  }
 0x101   : > { %1428 = vperm.xlu1 %3663, %v1386_v59   ;;  %v1402_v59 = vld [vmem:[%s5292_s6 + $0xa0] sm:$0xff] }
 0x102   : > { %v645_v0 = vpop.permute.xlu0 %644  ;;  %v751_v2 = vsel %vm434_vm7, %v749_v62, %v750_v60 }
 0x103   : > { %v643_v4 = vpop.permute.xlu1 %642  ;;  %v753_v5 = vsel %vm752_vm8, %v746_v61, %v751_v2  ;;  %v647_v16 = vrot.slane %v645_v0, 4 }
 0x104   : > { %v3509_v6 = vcombine.high %v753_v5, %v753_v5  ;;  %v3508_v7 = vcombine.low %v753_v5, %v753_v5  ;;  %914 = vperm.xlu0 %3664, %v812_v63   ;;  %v646_v17 = vrot.slane %v643_v4, 4 }
 0x105   : > { %1518 = vperm.xlu1 %3663, %v1404_v3  }
 0x106   : > { %3510 = vmatprep.subr.msk.bf16.mxu0 %vm434_vm7, %v3509_v6  ;;  %v542_v9 = vpop.permute.xlu0 %541  ;;  %v1153_v10 = vsel %vm434_vm7, %v3508_v7, 0  ;;  %v648_v22 = vsel %vm434_vm7, %v646_v17, %v647_v16  ;;  %v3667_v6 = vld [vmem:[%s5289_s3] sm:$0xff]  }
 0x107   : > { %1167 = vmatpush1.bf16.msra.mxu0 %v1153_v10  ;;  %v540_v12 = vpop.permute.xlu1 %539  ;;  %v544_v23 = vrot.slane %v542_v9, 4  ;;  %v650_v29 = vsel %vm649_vm9, %v643_v4, %v648_v22  ;;  %v1382_v4 = vld [vmem:[%s5292_s6] sm:$0xff] }
 0x108   : > { %1423 = vperm.xlu0 %3664, %v1385_v8   ;;  %v543_v24 = vrot.slane %v540_v12, 4  ;;  %v1383_v8 = vld [vmem:[%s5292_s6 + $0x8] sm:$0xff] }
 0x109   : > { %869 = vperm.xlu1 %3663, %v803_v11  }
 0x10a   : > { %v431_v14 = vpop.permute.xlu0 %430  ;;  %v545_v33 = vsel %vm434_vm7, %v543_v24, %v544_v23  ;;  %v1399_v24 = vld [vmem:[%s5292_s6 + $0x88] sm:$0xff] }
 0x10b   : > { %v429_v18 = vpop.permute.xlu1 %428  ;;  %v433_v34 = vrot.slane %v431_v14, 4  ;;  %v547_v47 = vsel %vm546_vm11, %v540_v12, %v545_v33 }
 0x10c   : > { %1513 = vperm.xlu0 %3664, %v1403_v13   ;;  %v432_v38 = vrot.slane %v429_v18, 4 }
 0x10d   : > { %959 = vperm.xlu1 %3663, %v821_v15   ;;  %v1400_v15 = vld [vmem:[%s5292_s6 + $0x90] sm:$0xff] }
 0x10e   : > { %v696_v20 = vpop.permute.xlu0 %695  ;;  %v435_v51 = vsel %vm434_vm7, %v432_v38, %v433_v34 }
 0x10f   : > { %v698_v25 = vrot.slane %v696_v20, 4  ;;  %v694_v26 = vpop.permute.xlu1 %693  ;;  %v437_v60 = vsel %vm436_vm13, %v429_v18, %v435_v51 }
 0x110   : > { %v697_v27 = vrot.slane %v694_v26, 4  ;;  %954 = vperm.xlu0 %3664, %v820_v19   ;;  %v1401_v19 = vld [vmem:[%s5292_s6 + $0x98] sm:$0xff] }
 0x111   : > { %1468 = vperm.xlu1 %3663, %v1394_v21  }
 0x112   : > { %v699_v30 = vsel %vm434_vm7, %v697_v27, %v698_v25  ;;  %v594_v31 = vpop.permute.xlu0 %593  ;;  %v3668_v27 = vld [vmem:[%s5289_s3 + $0x8] sm:$0xff]  }
 0x113   : > { %v701_v35 = vsel %vm700_vm10, %v694_v26, %v699_v30  ;;  %v596_v36 = vrot.slane %v594_v31, 4  ;;  %v592_v37 = vpop.permute.xlu1 %591 }
 0x114   : > { %v595_v39 = vrot.slane %v592_v37, 4  ;;  %v3507_v41 = vcombine.high %v650_v29, %v701_v35  ;;  %v3506_v42 = vcombine.low %v650_v29, %v701_v35  ;;  %1463 = vperm.xlu0 %3664, %v1393_v28   ;;  %v1391_v28 = vld [vmem:[%s5292_s6 + $0x48] sm:$0xff] }
 0x115   : > { %909 = vperm.xlu1 %3663, %v811_v32  }
 0x116   : > { %v597_v44 = vsel %vm434_vm7, %v595_v39, %v596_v36  ;;  %v490_v45 = vpop.permute.xlu0 %489  ;;  %1168 = vmatprep.subr.bf16.mxu0 %v3507_v41 }
 0x117   : > { %v598_v48 = vsel %vm561_vm12, %v592_v37, %v597_v44  ;;  %v492_v49 = vrot.slane %v490_v45, 4  ;;  %1169 = vmatpush1.bf16.msra.mxu0 %v3506_v42  ;;  %v488_v50 = vpop.permute.xlu1 %487  ;;  %v1390_v37 = vld [vmem:[%s5292_s6 + $0x40] sm:$0xff]  ;;  %v3669_v45 = vld [vmem:[%s5289_s3 + $0x10] sm:$0xff]  }
 0x118   : > { %v491_v52 = vrot.slane %v488_v50, 4  ;;  %v3505_v53 = vcombine.high %v547_v47, %v598_v48  ;;  %v3504_v54 = vcombine.low %v547_v47, %v598_v48  ;;  %949 = vperm.xlu0 %3664, %v819_v43  }
 0x119   : > { %1418 = vperm.xlu1 %3663, %v1384_v46   ;;  %v1398_v46 = vld [vmem:[%s5292_s6 + $0x80] sm:$0xff] }
 0x11a   : > { %v493_v56 = vsel %vm434_vm7, %v491_v52, %v492_v49  ;;  %1170 = vmatprep.subr.bf16.mxu0 %v3505_v53  ;;  %v711_v57 = vpop.permute.xlu0 %710 }
 0x11b   : > { %v495_v61 = vsel %vm494_vm14, %v488_v50, %v493_v56  ;;  %v713_v62 = vrot.slane %v711_v57, 4  ;;  %1171 = vmatpush1.bf16.msra.mxu0 %v3504_v54  ;;  %v709_v63 = vpop.permute.xlu1 %708  ;;  %v3670_v57 = vld [vmem:[%s5289_s3 + $0x18] sm:$0xff]  }
 0x11c   : > { %v712_v0 = vrot.slane %v709_v63, 4  ;;  %v3503_v2 = vcombine.high %v437_v60, %v495_v61  ;;  %v3502_v3 = vcombine.low %v437_v60, %v495_v61  ;;  %1458 = vperm.xlu0 %3664, %v1392_v55   ;;  %v3673_v60 = vld [vmem:[%s5290_s4 + $0x8] sm:$0xff]  }
 0x11d   : > { %1508 = vperm.xlu1 %3663, %v1402_v59   ;;  %v3671_v59 = vld [vmem:[%s5290_s4] sm:$0xff]   ;;  %v3674_v61 = vld [vmem:[%s5289_s3 + $0x28] sm:$0xff]  }
 0x11e   : > { %1172 = vmatprep.subr.bf16.mxu0 %v3503_v2  ;;  %v608_v5 = vpop.permute.xlu0 %607  ;;  %v714_v7 = vsel %vm434_vm7, %v712_v0, %v713_v62  ;;  %v3675_v62 = vld [vmem:[%s5290_s4 + $0x10] sm:$0xff]   ;;  %v3677_v0 = vld [vmem:[%s5290_s4 + $0x18] sm:$0xff]  }
 0x11f   : > { %v610_v9 = vrot.slane %v608_v5, 4  ;;  %1173 = vmatpush1.bf16.msra.mxu0 %v3502_v3  ;;  %v606_v10 = vpop.permute.xlu1 %605  ;;  %v716_v11 = vsel %vm715_vm15, %v709_v63, %v714_v7  ;;  %v3676_v63 = vld [vmem:[%s5289_s3 + $0x30] sm:$0xff]   ;;  %v3678_v2 = vld [vmem:[%s5289_s3 + $0x38] sm:$0xff]   ;;  %v3679_v3 = vld [vmem:[%s5290_s4 + $0x20] sm:$0xff]  }
 0x120   : > { %v609_v12 = vrot.slane %v606_v10, 4  ;;  %v3546_v13 = vcombine.high %v716_v11, %v716_v11  ;;  %v3545_v14 = vcombine.low %v716_v11, %v716_v11  ;;  %1408 = vperm.xlu0 %3664, %v1382_v4   ;;  %v3680_v4 = vld [vmem:[%s5289_s3 + $0x40] sm:$0xff]   ;;  %v3681_v5 = vld [vmem:[%s5290_s4 + $0x28] sm:$0xff]   ;;  %v3683_v7 = vld [vmem:[%s5290_s4 + $0x30] sm:$0xff]  }
 0x121   : > { %1413 = vperm.xlu1 %3663, %v1383_v8   ;;  %v3684_v8 = vld [vmem:[%s5289_s3 + $0x50] sm:$0xff]   ;;  %v3687_v11 = vld [vmem:[%s5290_s4 + $0x40] sm:$0xff]  }
 0x122   : > { %v611_v16 = vsel %vm434_vm7, %v609_v12, %v610_v9  ;;  %3511 = vmatmul.mubr.msk.bf16.vlgmr.msra.gmra.mxu0 %vm1102_vm0, %v3667_v6  ;;  %v660_v17 = vpop.permute.xlu0 %659  ;;  %3547 = vmatprep.subr.msk.bf16.mxu1 %vm434_vm7, %v3546_v13  ;;  %v1658_v18 = vsel %vm434_vm7, %v3545_v14, 0  ;;  %v3682_v6 = vld [vmem:[%s5289_s3 + $0x48] sm:$0xff]   ;;  %v3685_v9 = vld [vmem:[%s5290_s4 + $0x38] sm:$0xff]   ;;  %v3688_v13 = vld [vmem:[%s5289_s3 + $0x60] sm:$0xff]  }
 0x123   : > { %v662_v20 = vrot.slane %v660_v17, 4  ;;  %v658_v21 = vpop.permute.xlu1 %657  ;;  %1200 = vmatprep.mubr.bf16.mxu0 %v3760_v58  ;;  %1672 = vmatpush1.bf16.msra.mxu1 %v1658_v18  ;;  %v613_v23 = vsel %vm612_vm1, %v606_v10, %v611_v16  ;;  %v3686_v10 = vld [vmem:[%s5289_s3 + $0x58] sm:$0xff]   ;;  %v3689_v14 = vld [vmem:[%s5290_s4 + $0x48] sm:$0xff]  }
 0x124   : > { %v661_v22 = vrot.slane %v658_v21, 4  ;;  %1498 = vperm.xlu0 %3664, %v1400_v15   ;;  %v3690_v18 = vld [vmem:[%s5289_s3 + $0x68] sm:$0xff]  }
 0x125   : > { %1503 = vperm.xlu1 %3663, %v1401_v19   ;;  %v3691_v19 = vld [vmem:[%s5290_s4 + $0x50] sm:$0xff]  }
 0x126   : > { %v663_v25 = vsel %vm434_vm7, %v661_v22, %v662_v20  ;;  %v505_v26 = vpop.permute.xlu0 %504 }
 0x127   : > { %v664_v29 = vsel %vm583_vm5, %v658_v21, %v663_v25  ;;  %v507_v30 = vrot.slane %v505_v26, 4  ;;  %v503_v31 = vpop.permute.xlu1 %502 }
 0x128   : > { %v506_v32 = vrot.slane %v503_v31, 4  ;;  %v3544_v33 = vcombine.high %v613_v23, %v664_v29  ;;  %v3543_v34 = vcombine.low %v613_v23, %v664_v29  ;;  %1493 = vperm.xlu0 %3664, %v1399_v24   ;;  %v3692_v23 = vld [vmem:[%s5289_s3 + $0x70] sm:$0xff]   ;;  %v3693_v24 = vld [vmem:[%s5290_s4 + $0x58] sm:$0xff]  }
 0x129   : > { %1453 = vperm.xlu1 %3663, %v1391_v28  }
 0x12a   : > { %v508_v35 = vsel %vm434_vm7, %v506_v32, %v507_v30  ;;  %3512 = vmatmul.mubr.msk.bf16.gmra.mxu0 %vm1102_vm0, %v3668_v27  ;;  %v557_v36 = vpop.permute.xlu0 %556  ;;  %1673 = vmatprep.subr.bf16.mxu1 %v3544_v33  ;;  %v3694_v27 = vld [vmem:[%s5289_s3 + $0x78] sm:$0xff]  }
 0x12b   : > { %v559_v38 = vrot.slane %v557_v36, 4  ;;  %v555_v39 = vpop.permute.xlu1 %554  ;;  %1674 = vmatpush1.bf16.msra.mxu1 %v3543_v34  ;;  %1210 = vmatprep.mubr.bf16.mxu0 %v3760_v58  ;;  %v510_v42 = vsel %vm509_vm2, %v503_v31, %v508_v35 }
 0x12c   : > { %v558_v41 = vrot.slane %v555_v39, 4 }
 0x12d   : > { %1448 = vperm.xlu1 %3663, %v1390_v37  }
 0x12e   : > { %v560_v43 = vsel %vm434_vm7, %v558_v41, %v559_v38  ;;  %v447_v44 = vpop.permute.xlu0 %446 }
 0x12f   : > { %v562_v47 = vsel %vm561_vm12, %v555_v39, %v560_v43  ;;  %v449_v48 = vrot.slane %v447_v44, 4  ;;  %v445_v49 = vpop.permute.xlu1 %444 }
 0x130   : > { %v448_v50 = vrot.slane %v445_v49, 4  ;;  %v3542_v51 = vcombine.high %v510_v42, %v562_v47  ;;  %v3541_v52 = vcombine.low %v510_v42, %v562_v47 }
 0x131   : > { %1488 = vperm.xlu1 %3663, %v1398_v46  }
 0x132   : > { %v450_v53 = vsel %vm434_vm7, %v448_v50, %v449_v48  ;;  %3513 = vmatmul.mubr.msk.bf16.gmra.mxu0 %vm1102_vm0, %v3669_v45  ;;  %1675 = vmatprep.subr.bf16.mxu1 %v3542_v51 }
 0x133   : > { %v452_v54 = vsel %vm451_vm3, %v445_v49, %v450_v53  ;;  %1676 = vmatpush1.bf16.msra.mxu1 %v3541_v52  ;;  %1220 = vmatprep.mubr.bf16.mxu0 %v3760_v58 }
 0x134   : > { %v3540_v55 = vcombine.high %v3860_v40, %v452_v54  ;;  %v3539_v56 = vcombine.low %v3860_v40, %v452_v54  ;;  %v3672_v40 = vld [vmem:[%s5289_s3 + $0x20] sm:$0xff]  }
 0x136   : > { %1677 = vmatprep.subr.bf16.mxu1 %v3540_v55 }
 0x137   : > { %1678 = vmatpush1.bf16.msra.mxu1 %v3539_v56 }
 0x13a   : > { %3514 = vmatmul.mubr.msk.bf16.gmra.mxu0 %vm1102_vm0, %v3670_v57  ;;  %3548 = vmatmul.mubr.msk.bf16.vlgmr.msra.gmra.mxu1 %vm1102_vm0, %v3671_v59 }
 0x13b   : > { %1230 = vmatprep.mubr.bf16.mxu0 %v3760_v58  ;;  %1705 = vmatprep.mubr.bf16.mxu1 %v3760_v58  ;;  %v4188_v12 = vpop.permute.xlu0 %904 }
 0x13c   : > { %v4202_v16 = vpop.permute.xlu1 %864 }
 0x13f   : > { %v4200_v15 = vpop.permute.xlu0 %944 }
 0x140   : > { %5325 = vst [vmem:[#allocation4_spill] sm:$0xff] %v4200_v15  ;;  %v4216_v20 = vpop.permute.xlu1 %859 }
 0x142   : > { %3515 = vmatmul.mubr.msk.bf16.gmra.mxu0 %vm1102_vm0, %v3672_v40  ;;  %3549 = vmatmul.mubr.msk.bf16.gmra.mxu1 %vm1102_vm0, %v3673_v60 }
 0x143   : > { %1240 = vmatprep.mubr.bf16.mxu0 %v3760_v58  ;;  %1715 = vmatprep.mubr.bf16.mxu1 %v3760_v58  ;;  %v4208_v17 = vpop.permute.xlu0 %894 }
 0x144   : > { %v4224_v22 = vpop.permute.xlu1 %899 }
 0x147   : > { %v4222_v21 = vpop.permute.xlu0 %984 }
 0x148   : > { %5326 = vst [vmem:[#allocation5_spill] sm:$0xff] %v4222_v21  ;;  %v4237_v26 = vpop.permute.xlu1 %854 }
 0x14a   : > { %3516 = vmatmul.mubr.msk.bf16.gmra.mxu0 %vm1102_vm0, %v3674_v61  ;;  %3550 = vmatmul.mubr.msk.bf16.gmra.mxu1 %vm1102_vm0, %v3675_v62 }
 0x14b   : > { %1250 = vmatprep.mubr.bf16.mxu0 %v3760_v58  ;;  %1725 = vmatprep.mubr.bf16.mxu1 %v3760_v58  ;;  %v4232_v25 = vpop.permute.xlu0 %889 }
 0x14c   : > { %v4244_v29 = vpop.permute.xlu1 %939 }
 0x14d   : > { %5328 = vst [vmem:[#allocation7_spill] sm:$0xff] %v4244_v29 }
 0x14f   : > { %v4242_v28 = vpop.permute.xlu0 %979 }
 0x150   : > { %5327 = vst [vmem:[#allocation6_spill] sm:$0xff] %v4242_v28  ;;  %v4249_v31 = vpop.permute.xlu1 %849 }
 0x152   : > { %3517 = vmatmul.mubr.msk.bf16.gmra.mxu0 %vm1102_vm0, %v3676_v63  ;;  %3551 = vmatmul.mubr.msk.bf16.gmra.mxu1 %vm1102_vm0, %v3677_v0 }
 0x153   : > { %1260 = vmatprep.mubr.bf16.mxu0 %v3760_v58  ;;  %1735 = vmatprep.mubr.bf16.mxu1 %v3760_v58  ;;  %v4247_v30 = vpop.permute.xlu0 %844 }
 0x154   : > { %v4253_v33 = vpop.permute.xlu1 %934 }
 0x155   : > { %5330 = vst [vmem:[#allocation9_spill] sm:$0xff] %v4253_v33 }
 0x157   : > { %v4251_v32 = vpop.permute.xlu0 %929 }
 0x158   : > { %5329 = vst [vmem:[#allocation8_spill] sm:$0xff] %v4251_v32  ;;  %v4257_v34 = vpop.permute.xlu1 %1443 }
 0x15a   : > { %3518 = vmatmul.mubr.msk.bf16.gmra.mxu0 %vm1102_vm0, %v3678_v2  ;;  %3552 = vmatmul.mubr.msk.bf16.gmra.mxu1 %vm1102_vm0, %v3679_v3 }
 0x15b   : > { %1270 = vmatprep.mubr.bf16.mxu0 %v3760_v58  ;;  %1745 = vmatprep.mubr.bf16.mxu1 %v3760_v58 }
 0x15c   : > { %v4259_v36 = vpop.permute.xlu1 %884 }
 0x160   : > { %v4263_v38 = vpop.permute.xlu1 %974 }
 0x161   : > { %5332 = vst [vmem:[#allocation11_spill] sm:$0xff] %v4263_v38 }
 0x162   : > { %3519 = vmatmul.mubr.msk.bf16.gmra.mxu0 %vm1102_vm0, %v3680_v4  ;;  %3553 = vmatmul.mubr.msk.bf16.gmra.mxu1 %vm1102_vm0, %v3681_v5 }
 0x163   : > { %1280 = vmatprep.mubr.bf16.mxu0 %v3760_v58  ;;  %1755 = vmatprep.mubr.bf16.mxu1 %v3760_v58 }
 0x164   : > { %v4267_v41 = vpop.permute.xlu1 %1483 }
 0x165   : > { %5333 = vst [vmem:[#allocation12_spill] sm:$0xff] %v4267_v41 }
 0x168   : > { %v4271_v43 = vpop.permute.xlu1 %879 }
 0x16a   : > { %3520 = vmatmul.mubr.msk.bf16.gmra.mxu0 %vm1102_vm0, %v3682_v6  ;;  %3554 = vmatmul.mubr.msk.bf16.gmra.mxu1 %vm1102_vm0, %v3683_v7 }
 0x16b   : > { %1290 = vmatprep.mubr.bf16.mxu0 %v3760_v58  ;;  %1765 = vmatprep.mubr.bf16.mxu1 %v3760_v58 }
 0x16c   : > { %v4275_v45 = vpop.permute.xlu1 %969 }
 0x16d   : > { %5335 = vst [vmem:[#allocation14_spill] sm:$0xff] %v4275_v45 }
 0x170   : > { %v4279_v47 = vpop.permute.xlu1 %1478 }
 0x171   : > { %5337 = vst [vmem:[#allocation16_spill] sm:$0xff] %v4279_v47 }
 0x172   : > { %3521 = vmatmul.mubr.msk.bf16.gmra.mxu0 %vm1102_vm0, %v3684_v8  ;;  %3555 = vmatmul.mubr.msk.bf16.gmra.mxu1 %vm1102_vm0, %v3685_v9 }
 0x173   : > { %1300 = vmatprep.mubr.bf16.mxu0 %v3760_v58  ;;  %1775 = vmatprep.mubr.bf16.mxu1 %v3760_v58 }
 0x174   : > { %v835_v49 = vpop.permute.xlu1 %834 }
 0x178   : > { %v4283_v51 = vpop.permute.xlu1 %919 }
 0x17a   : > { %3522 = vmatmul.mubr.msk.bf16.gmra.mxu0 %vm1102_vm0, %v3686_v10  ;;  %3556 = vmatmul.mubr.msk.bf16.gmra.mxu1 %vm1102_vm0, %v3687_v11 }
 0x17b   : > { %1310 = vmatprep.mubr.bf16.mxu0 %v3760_v58  ;;  %1785 = vmatprep.mubr.bf16.mxu1 %v3760_v58 }
 0x17c   : > { %v4287_v53 = vpop.permute.xlu1 %1428 }
 0x180   : > { %v4291_v59 = vpop.permute.xlu1 %1518 }
 0x181   : > { %5339 = vst [vmem:[#allocation18_spill] sm:$0xff] %v4291_v59 }
 0x182   : > { %3523 = vmatmul.mubr.msk.bf16.gmra.mxu0 %vm1102_vm0, %v3688_v13  ;;  %3557 = vmatmul.mubr.msk.bf16.gmra.mxu1 %vm1102_vm0, %v3689_v14 }
 0x183   : > { %1320 = vmatprep.mubr.bf16.mxu0 %v3760_v58  ;;  %1795 = vmatprep.mubr.bf16.mxu1 %v3760_v58 }
 0x184   : > { %v4295_v63 = vpop.permute.xlu1 %869 }
 0x188   : > { %v4299_v5 = vpop.permute.xlu1 %959 }
 0x189   : > { %5342 = vst [vmem:[#allocation21_spill] sm:$0xff] %v4299_v5 }
 0x18a   : > { %3524 = vmatmul.mubr.msk.bf16.gmra.mxu0 %vm1102_vm0, %v3690_v18  ;;  %3558 = vmatmul.mubr.msk.bf16.gmra.mxu1 %vm1102_vm0, %v3691_v19 }
 0x18b   : > { %1330 = vmatprep.mubr.bf16.mxu0 %v3760_v58  ;;  %1805 = vmatprep.mubr.bf16.mxu1 %v3760_v58 }
 0x18c   : > { %v4303_v13 = vpop.permute.xlu1 %1468 }
 0x18d   : > { %5343 = vst [vmem:[#allocation22_spill] sm:$0xff] %v4303_v13 }
 0x192   : > { %3525 = vmatmul.mubr.msk.bf16.gmra.mxu0 %vm1102_vm0, %v3692_v23  ;;  %3559 = vmatmul.mubr.msk.bf16.gmra.mxu1 %vm1102_vm0, %v3693_v24 }
 0x193   : > { %1340 = vmatprep.mubr.bf16.mxu0 %v3760_v58  ;;  %v4255_v58 = vpop.permute.xlu0 %1438 }
 0x197   : > { %v840_v35 = vpop.permute.xlu0 %839 }
 0x19a   : > { %3526 = vmatmul.mubr.msk.bf16.gmra.mxu0 %vm1102_vm0, %v3694_v27 }
 0x19b   : > { %v4261_v37 = vpop.permute.xlu0 %924 }
 0x19c   : > { %5331 = vst [vmem:[#allocation10_spill] sm:$0xff] %v4261_v37 }
 0x19f   : > { %v4265_v39 = vpop.permute.xlu0 %1433 }
 0x1a3   : > { %v4269_v42 = vpop.permute.xlu0 %1523 }
 0x1a4   : > { %5334 = vst [vmem:[#allocation13_spill] sm:$0xff] %v4269_v42 }
 0x1a7   : > { %v4273_v44 = vpop.permute.xlu0 %874 }
 0x1ab   : > { %v4277_v46 = vpop.permute.xlu0 %964 }
 0x1ac   : > { %5336 = vst [vmem:[#allocation15_spill] sm:$0xff] %v4277_v46 }
 0x1af   : > { %v4281_v48 = vpop.permute.xlu0 %1473 }
 0x1b0   : > { %5338 = vst [vmem:[#allocation17_spill] sm:$0xff] %v4281_v48 }
 0x1b3   : > { %v830_v50 = vpop.permute.xlu0 %829 }
 0x1b7   : > { %v4285_v52 = vpop.permute.xlu0 %914 }
 0x1bb   : > { %v4289_v55 = vpop.permute.xlu0 %1423 }
 0x1bf   : > { %v4293_v60 = vpop.permute.xlu0 %1513 }
 0x1c0   : > { %5340 = vst [vmem:[#allocation19_spill] sm:$0xff] %v4293_v60 }
 0x1c3   : > { %v4297_v2 = vpop.permute.xlu0 %954 }
 0x1c4   : > { %5341 = vst [vmem:[#allocation20_spill] sm:$0xff] %v4297_v2 }
 0x1c7   : > { %v4301_v7 = vpop.permute.xlu0 %1463 }
 0x1cb   : > { %v4307_v1 = vpop.permute.xlu0 %949 }
 0x1cc   : > { %5344 = vst [vmem:[#allocation23_spill] sm:$0xff] %v4307_v1 }
 0x1cf   : > { %v4333_v15 = vpop.permute.xlu0 %1458 }
 0x1d3   : > { %v1409_v48 = vpop.permute.xlu0 %1408 }
 0x1e2   : > { %v1192_v54 = vpop.f32.mrf.mxu0 }
 0x1e3   : > { %v1193_v9 = vadd.f32 %v1192_v54, %v830_v50 }
 0x1e4   : > { %v1194_v56 = vpop.f32.mrf.mxu0 }
 0x1e5   : > { %v1195_v10 = vadd.f32 %v1194_v56, %v830_v50  ;;  %vm1816_vm4 = vcmp.gt.f32.partialorder %v1193_v9, 0.0  ;;  %v1880_v21 = vmul.f32 0.2, %v1193_v9 }
 0x1e6   : > { %v1196_v57 = vpop.f32.mrf.mxu0 }
 0x1e7   : > { %v1197_v14 = vadd.f32 %v1196_v57, %v835_v49  ;;  %v1881_v28 = vmul.f32 0.2, %v1195_v10  ;;  %vm1817_vm5 = vcmp.gt.f32.partialorder %v1195_v10, 0.0 }
 0x1e8   : > { %v1198_v40 = vpop.f32.mrf.mxu0 }
 0x1e9   : > { %v1199_v18 = vadd.f32 %v1198_v40, %v835_v49  ;;  %vm1818_vm6 = vcmp.gt.f32.partialorder %v1197_v14, 0.0  ;;  %v1882_v50 = vmul.f32 0.2, %v1197_v14 }
 0x1ea   : > { %v1202_v61 = vpop.f32.mrf.mxu0 }
 0x1eb   : > { %v1203_v19 = vadd.f32 %v1202_v61, %v840_v35  ;;  %v1883_v54 = vmul.f32 0.2, %v1199_v18  ;;  %vm1819_vm8 = vcmp.gt.f32.partialorder %v1199_v18, 0.0  ;;  %v4319_v61 = vpop.permute.xlu1 %909 }
 0x1ec   : > { %v1204_v62 = vpop.f32.mrf.mxu0 }
 0x1ed   : > { %v1205_v27 = vadd.f32 %v1204_v62, %v840_v35  ;;  %v1884_v49 = vmul.f32 0.2, %v1203_v19  ;;  %vm1820_vm9 = vcmp.gt.f32.partialorder %v1203_v19, 0.0  ;;  %v4331_v5 = vsel %vm1819_vm8, %v1199_v18, %v1883_v54 }
 0x1ee   : > { %v1206_v0 = vpop.f32.mrf.mxu0 }
 0x1ef   : > { %v1207_v56 = vadd.f32 %v1206_v0, %v4247_v30  ;;  %v1885_v62 = vmul.f32 0.2, %v1205_v27  ;;  %vm1821_vm10 = vcmp.gt.f32.partialorder %v1205_v27, 0.0  ;;  %v1944_v0 = vsel %vm1816_vm4, %v1193_v9, %v1880_v21 }
 0x1f0   : > { %v1208_v3 = vpop.f32.mrf.mxu0  ;;  %v4335_v2 = vsel %vm1820_vm9, %v1203_v19, %v1884_v49  ;;  %v4346_v19 = vpop.permute.xlu1 %1418 }
 0x1f1   : > { %v1209_v57 = vadd.f32 %v1208_v3, %v4247_v30  ;;  %v1945_v30 = vsel %vm1817_vm5, %v1195_v10, %v1881_v28  ;;  %v1946_v3 = vsel %vm1818_vm6, %v1197_v14, %v1882_v50  ;;  %v4341_v21 = vsel %vm1821_vm10, %v1205_v27, %v1885_v62 }
 0x1f2   : > { %v1212_v4 = vpop.f32.mrf.mxu0  ;;  %vm1822_vm11 = vcmp.gt.f32.partialorder %v1207_v56, 0.0 }
 0x1f3   : > { %v1213_v59 = vadd.f32 %v1212_v4, %v4249_v31  ;;  %v1886_v4 = vmul.f32 0.2, %v1207_v56  ;;  %v1887_v29 = vmul.f32 0.2, %v1209_v57  ;;  %vm1823_vm12 = vcmp.gt.f32.partialorder %v1209_v57, 0.0 }
 0x1f4   : > { %v1214_v6 = vpop.f32.mrf.mxu0 }
 0x1f5   : > { %v1215_v45 = vadd.f32 %v1214_v6, %v4249_v31  ;;  %vm1824_vm13 = vcmp.gt.f32.partialorder %v1213_v59, 0.0  ;;  %v1888_v9 = vmul.f32 0.2, %v1213_v59  ;;  %v4350_v54 = vsel %vm1822_vm11, %v1207_v56, %v1886_v4 }
 0x1f6   : > { %v1216_v8 = vpop.f32.mrf.mxu0  ;;  %v4352_v49 = vsel %vm1823_vm12, %v1209_v57, %v1887_v29 }
 0x1f7   : > { %v1217_v31 = vadd.f32 %v1216_v8, %v4237_v26  ;;  %vm1825_vm14 = vcmp.gt.f32.partialorder %v1215_v45, 0.0  ;;  %v1889_v10 = vmul.f32 0.2, %v1215_v45 }
 0x1f8   : > { %v1218_v11 = vpop.f32.mrf.mxu0 }
 0x1f9   : > { %v1219_v8 = vadd.f32 %v1218_v11, %v4237_v26  ;;  %v1890_v62 = vmul.f32 0.2, %v1217_v31  ;;  %v4359_v11 = vsel %vm1824_vm13, %v1213_v59, %v1888_v9  ;;  %vm1826_vm2 = vcmp.gt.f32.partialorder %v1217_v31, 0.0 }
 0x1fa   : > { %v1222_v23 = vpop.f32.mrf.mxu0  ;;  %v4305_v24 = vpop.f32.mrf.mxu1 }
 0x1fb   : > { %v1891_v57 = vmul.f32 0.2, %v1219_v8  ;;  %vm1827_vm4 = vcmp.gt.f32.partialorder %v1219_v8, 0.0 }
 0x1fc   : > { %v4309_v42 = vpop.f32.mrf.mxu0  ;;  %v4311_v38 = vpop.f32.mrf.mxu1 }
 0x1fe   : > { %v4315_v35 = vpop.f32.mrf.mxu0  ;;  %v4317_v40 = vpop.f32.mrf.mxu1 }
 0x200   : > { %v4323_v60 = vpop.f32.mrf.mxu0  ;;  %v4325_v46 = vpop.f32.mrf.mxu1 }
 0x202   : > { %v1232_v6 = vpop.f32.mrf.mxu0  ;;  %v4338_v1 = vpop.f32.mrf.mxu1 }
 0x203   : > { %v1233_v28 = vadd.f32 %v1232_v6, %v4295_v63  ;;  %v1223_v6 = vadd.f32 %v1222_v23, %v4216_v20 }
 0x204   : > { %v1234_v14 = vpop.f32.mrf.mxu0  ;;  %v4344_v18 = vpop.f32.mrf.mxu1 }
 0x205   : > { %vm1832_vm15 = vcmp.gt.f32.partialorder %v1233_v28, 0.0  ;;  %v1896_v50 = vmul.f32 0.2, %v1233_v28  ;;  %v1235_v27 = vadd.f32 %v1234_v14, %v4295_v63  ;;  %v4362_v63 = vsel %vm1825_vm14, %v1215_v45, %v1889_v10  ;;  %v4374_v10 = vpop.permute.xlu1 %1508 }
 0x206   : > { %v1236_v41 = vpop.f32.mrf.mxu0  ;;  %v4355_v47 = vpop.f32.mrf.mxu1  ;;  %5345 = vst [vmem:[#allocation24_spill] sm:$0xff] %v4374_v10  ;;  %vm1828_vm6 = vcmp.gt.f32.partialorder %v1223_v6, 0.0 }
 0x207   : > { %v1960_v33 = vsel %vm1832_vm15, %v1233_v28, %v1896_v50  ;;  %vm1833_vm0 = vcmp.gt.f32.partialorder %v1235_v27, 0.0  ;;  %v1897_v32 = vmul.f32 0.2, %v1235_v27  ;;  %v1237_v26 = vadd.f32 %v1236_v41, %v4273_v44 }
 0x208   : > { %v4364_v29 = vadd.f32 %v1960_v33, %v1944_v0  ;;  %v1238_v56 = vpop.f32.mrf.mxu0  ;;  %v4366_v23 = vpop.f32.mrf.mxu1  ;;  %v1698_v41 = vadd.f32 %v4305_v24, %v1409_v48  ;;  %v4376_v33 = vsel %vm1826_vm2, %v1217_v31, %v1890_v62  ;;  %v1892_v0 = vmul.f32 0.2, %v1223_v6 }
 0x209   : > { %v1961_v4 = vsel %vm1833_vm0, %v1235_v27, %v1897_v32  ;;  %vm1834_vm3 = vcmp.gt.f32.partialorder %v1237_v26, 0.0  ;;  %v1898_v28 = vmul.f32 0.2, %v1237_v26  ;;  %v1239_v59 = vadd.f32 %v1238_v56, %v4273_v44 }
 0x20a   : > { %v4368_v14 = vadd.f32 %v1961_v4, %v1945_v30  ;;  %v1242_v9 = vpop.f32.mrf.mxu0  ;;  %v4372_v45 = vpop.f32.mrf.mxu1  ;;  %v1225_v27 = vadd.f32 %v4309_v42, %v4216_v20  ;;  %v4386_v56 = vsel %vm1827_vm4, %v1219_v8, %v1891_v57  ;;  %v4389_v62 = vadd.f32 %v4311_v38, %v1409_v48 }
 0x20b   : > { %v1962_v50 = vsel %vm1834_vm3, %v1237_v26, %v1898_v28  ;;  %v1243_v32 = vadd.f32 %v1242_v9, %v4271_v43  ;;  %vm1835_vm5 = vcmp.gt.f32.partialorder %v1239_v59, 0.0  ;;  %v1899_v24 = vmul.f32 0.2, %v1239_v59 }
 0x20c   : > { %v4381_v30 = vadd.f32 %v1962_v50, %v1946_v3  ;;  %v1244_v4 = vpop.f32.mrf.mxu0  ;;  %v4383_v44 = vpop.f32.mrf.mxu1  ;;  %vm2008_vm9 = vcmp.gt.f32.partialorder %v1698_v41, 0.0  ;;  %v2056_v28 = vmul.f32 0.2, %v1698_v41  ;;  %v4398_v57 = vsel %vm1828_vm6, %v1223_v6, %v1892_v0 }
 0x20d   : > { %vm1836_vm8 = vcmp.gt.f32.partialorder %v1243_v32, 0.0  ;;  %v1900_v31 = vmul.f32 0.2, %v1243_v32  ;;  %v1963_v26 = vsel %vm1835_vm5, %v1239_v59, %v1899_v24  ;;  %v1245_v20 = vadd.f32 %v1244_v4, %v4271_v43  ;;  %v1414_v43 = vpop.permute.xlu1 %1413 }
 0x20e   : > { %v1246_v42 = vpop.f32.mrf.mxu0  ;;  %v4392_v3 = vpop.f32.mrf.mxu1  ;;  %v4395_v9 = vadd.f32 %v1963_v26, %v4331_v5  ;;  %v1893_v10 = vmul.f32 0.2, %v1225_v27  ;;  %vm1829_vm11 = vcmp.gt.f32.partialorder %v1225_v27, 0.0  ;;  %v1227_v24 = vadd.f32 %v4315_v35, %v4202_v16 }
 0x20f   : > { %v1964_v50 = vsel %vm1836_vm8, %v1243_v32, %v1900_v31  ;;  %v1247_v8 = vadd.f32 %v1246_v42, %v4259_v36  ;;  %vm1837_vm10 = vcmp.gt.f32.partialorder %v1245_v20, 0.0  ;;  %v1901_v5 = vmul.f32 0.2, %v1245_v20 }
 0x210   : > { %v4401_v38 = vadd.f32 %v1964_v50, %v4335_v2  ;;  %v1248_v48 = vpop.f32.mrf.mxu0  ;;  %v4403_v59 = vpop.f32.mrf.mxu1  ;;  %v1702_v32 = vadd.f32 %v4317_v40, %v1414_v43  ;;  %vm2009_vm13 = vcmp.gt.f32.partialorder %v4389_v62, 0.0  ;;  %v2057_v31 = vmul.f32 0.2, %v4389_v62 }
 0x211   : > { %vm1838_vm12 = vcmp.gt.f32.partialorder %v1247_v8, 0.0  ;;  %v1902_v6 = vmul.f32 0.2, %v1247_v8  ;;  %v1249_v0 = vadd.f32 %v1248_v48, %v4259_v36  ;;  %v4414_v26 = vsel %vm2008_vm9, %v1698_v41, %v2056_v28 }
 0x212   : > { %5346 = vst [vmem:[#allocation25_spill] sm:$0xff] %v4401_v38  ;;  %v1252_v2 = vpop.f32.mrf.mxu0  ;;  %v4410_v4 = vpop.f32.mrf.mxu1  ;;  %5347 = vst [vmem:[#allocation26_spill] sm:$0xff] %v4414_v26  ;;  %v1965_v42 = vsel %vm1837_vm10, %v1245_v20, %v1901_v5  ;;  %v4418_v50 = vsel %vm1829_vm11, %v1225_v27, %v1893_v10  ;;  %v1229_v40 = vadd.f32 %v4323_v60, %v4202_v16  ;;  %vm1830_vm15 = vcmp.gt.f32.partialorder %v1227_v24, 0.0 }
 0x213   : > { %v1253_v35 = vadd.f32 %v1252_v2, %v4232_v25  ;;  %v4423_v38 = vadd.f32 %v1965_v42, %v4341_v21  ;;  %v1966_v36 = vsel %vm1838_vm12, %v1247_v8, %v1902_v6  ;;  %v1704_v37 = vadd.f32 %v4325_v46, %v1414_v43 }
 0x214   : > { %v1254_v48 = vpop.f32.mrf.mxu0  ;;  %v4425_v13 = vpop.f32.mrf.mxu1  ;;  %v4429_v41 = vadd.f32 %v1966_v36, %v4350_v54  ;;  %vm1839_vm14 = vcmp.gt.f32.partialorder %v1249_v0, 0.0  ;;  %v1903_v20 = vmul.f32 0.2, %v1249_v0  ;;  %v1894_v10 = vmul.f32 0.2, %v1227_v24 }
 0x215   : > { %vm1840_vm0 = vcmp.gt.f32.partialorder %v1253_v35, 0.0  ;;  %v1904_v27 = vmul.f32 0.2, %v1253_v35  ;;  %vm2010_vm2 = vcmp.gt.f32.partialorder %v1702_v32, 0.0  ;;  %v2058_v60 = vmul.f32 0.2, %v1702_v32 }
 0x216   : > { %v1256_v28 = vpop.f32.mrf.mxu0  ;;  %v4431_v16 = vpop.f32.mrf.mxu1  ;;  %v1967_v21 = vsel %vm1839_vm14, %v1249_v0, %v1903_v20  ;;  %v1255_v8 = vadd.f32 %v1254_v48, %v4232_v25  ;;  %v1895_v5 = vmul.f32 0.2, %v1229_v40  ;;  %vm1831_vm3 = vcmp.gt.f32.partialorder %v1229_v40, 0.0 }
 0x217   : > { %v4435_v46 = vadd.f32 %v1967_v21, %v4352_v49  ;;  %v1968_v54 = vsel %vm1840_vm0, %v1253_v35, %v1904_v27  ;;  %v1257_v43 = vadd.f32 %v1256_v28, %v4208_v17  ;;  %v2059_v42 = vmul.f32 0.2, %v1704_v37 }
 0x218   : > { %v1258_v6 = vpop.f32.mrf.mxu0  ;;  %v4438_v2 = vpop.f32.mrf.mxu1  ;;  %v4441_v36 = vadd.f32 %v1968_v54, %v4359_v11  ;;  %vm1841_vm4 = vcmp.gt.f32.partialorder %v1255_v8, 0.0  ;;  %vm2011_vm5 = vcmp.gt.f32.partialorder %v1704_v37, 0.0  ;;  %v1708_v25 = vadd.f32 %v4338_v1, %v4346_v19 }
 0x219   : > { %v1905_v0 = vmul.f32 0.2, %v1255_v8  ;;  %vm1842_vm6 = vcmp.gt.f32.partialorder %v1257_v43, 0.0  ;;  %v4448_v35 = vsel %vm1830_vm15, %v1227_v24, %v1894_v10  ;;  %v4453_v20 = vsel %vm2009_vm13, %v4389_v62, %v2057_v31 }
 0x21a   : > { %5348 = vst [vmem:[#allocation27_spill] sm:$0xff] %v4441_v36  ;;  %v1262_v49 = vpop.f32.mrf.mxu0  ;;  %v4445_v48 = vpop.f32.mrf.mxu1  ;;  %v1906_v11 = vmul.f32 0.2, %v1257_v43  ;;  %v1259_v27 = vadd.f32 %v1258_v6, %v4208_v17  ;;  %v4457_v28 = vsel %vm2010_vm2, %v1702_v32, %v2058_v60  ;;  %v4459_v1 = vsel %vm1831_vm3, %v1229_v40, %v1895_v5 }
 0x21b   : > { %v1969_v21 = vsel %vm1841_vm4, %v1255_v8, %v1905_v0  ;;  %v1263_v54 = vadd.f32 %v1262_v49, %v4224_v22  ;;  %v4465_v24 = vsel %vm2011_vm5, %v1704_v37, %v2059_v42  ;;  %v1710_v62 = vadd.f32 %v4344_v18, %v4346_v19  ;;  %v4491_v42 = vpop.permute.xlu1 %1503 }
 0x21c   : > { %v1264_v26 = vpop.f32.mrf.mxu0  ;;  %v4462_v36 = vpop.f32.mrf.mxu1  ;;  %v4470_v31 = vadd.f32 %v1969_v21, %v4362_v63  ;;  %v1970_v17 = vsel %vm1842_vm6, %v1257_v43, %v1906_v11  ;;  %v2060_v32 = vmul.f32 0.2, %v1708_v25  ;;  %vm1843_vm8 = vcmp.gt.f32.partialorder %v1259_v27, 0.0  ;;  %5349 = vst [vmem:[#allocation28_spill] sm:$0xff] %v4491_v42 }
 0x21d   : > { %v4474_v40 = vadd.f32 %v1970_v17, %v4376_v33  ;;  %v1907_v10 = vmul.f32 0.2, %v1259_v27  ;;  %v1712_v37 = vadd.f32 %v4355_v47, %v4289_v55  ;;  %v1714_v18 = vadd.f32 %v4366_v23, %v4289_v55 }
 0x21e   : > { %v4476_v60 = vpop.f32.mrf.mxu0  ;;  %v4478_v8 = vpop.f32.mrf.mxu1  ;;  %vm1844_vm9 = vcmp.gt.f32.partialorder %v1263_v54, 0.0  ;;  %v1908_v19 = vmul.f32 0.2, %v1263_v54  ;;  %vm2012_vm10 = vcmp.gt.f32.partialorder %v1708_v25, 0.0  ;;  %v1718_v63 = vadd.f32 %v4372_v45, %v4287_v53 }
 0x21f   : > { %v1971_v33 = vsel %vm1843_vm8, %v1259_v27, %v1907_v10  ;;  %v1265_v5 = vadd.f32 %v1264_v26, %v4224_v22  ;;  %vm2013_vm11 = vcmp.gt.f32.partialorder %v1710_v62, 0.0  ;;  %v1720_v47 = vadd.f32 %v4383_v44, %v4287_v53 }
 0x220   : > { %v4487_v43 = vpop.f32.mrf.mxu0  ;;  %v4489_v6 = vpop.f32.mrf.mxu1  ;;  %v4496_v55 = vadd.f32 %v1971_v33, %v4386_v56  ;;  %v1972_v23 = vsel %vm1844_vm9, %v1263_v54, %v1908_v19  ;;  %v2061_v0 = vmul.f32 0.2, %v1710_v62  ;;  %v1722_v45 = vadd.f32 %v4392_v3, %v4265_v39 }
 0x221   : > { %v4501_v22 = vadd.f32 %v1972_v23, %v4398_v57  ;;  %vm1845_vm12 = vcmp.gt.f32.partialorder %v1265_v5, 0.0  ;;  %v4506_v11 = vsel %vm2012_vm10, %v1708_v25, %v2060_v32  ;;  %v2062_v27 = vmul.f32 0.2, %v1712_v37 }
 0x222   : > { %v1272_v26 = vpop.f32.mrf.mxu0  ;;  %v4503_v49 = vpop.f32.mrf.mxu1  ;;  %5350 = vst [vmem:[#allocation29_spill] sm:$0xff] %v4506_v11  ;;  %v2063_v53 = vmul.f32 0.2, %v1714_v18  ;;  %v1909_v44 = vmul.f32 0.2, %v1265_v5  ;;  %vm2014_vm13 = vcmp.gt.f32.partialorder %v1712_v37, 0.0  ;;  %v1724_v56 = vadd.f32 %v4403_v59, %v4265_v39 }
 0x223   : > { %vm2015_vm14 = vcmp.gt.f32.partialorder %v1714_v18, 0.0  ;;  %vm2016_vm15 = vcmp.gt.f32.partialorder %v1718_v63, 0.0  ;;  %v2064_v57 = vmul.f32 0.2, %v1718_v63  ;;  %v2065_v54 = vmul.f32 0.2, %v1720_v47  ;;  %v4520_v39 = vpop.permute.xlu1 %1453 }
 0x224   : > { %v1274_v3 = vpop.f32.mrf.mxu0  ;;  %v4510_v21 = vpop.f32.mrf.mxu1  ;;  %v1973_v17 = vsel %vm1845_vm12, %v1265_v5, %v1909_v44  ;;  %v1273_v10 = vadd.f32 %v1272_v26, %v4319_v61  ;;  %vm2017_vm0 = vcmp.gt.f32.partialorder %v1720_v47, 0.0  ;;  %v2066_v25 = vmul.f32 0.2, %v1722_v45 }
 0x225   : > { %v1728_v32 = vadd.f32 %v4410_v4, %v4255_v58  ;;  %v4516_v19 = vadd.f32 %v1973_v17, %v4418_v50  ;;  %v4523_v59 = vsel %vm2013_vm11, %v1710_v62, %v2061_v0  ;;  %v4526_v5 = vsel %vm2014_vm13, %v1712_v37, %v2062_v27 }
 0x226   : > { %v1276_v33 = vpop.f32.mrf.mxu0  ;;  %v4518_v23 = vpop.f32.mrf.mxu1  ;;  %v4529_v26 = vsel %vm2015_vm14, %v1714_v18, %v2063_v53  ;;  %vm2018_vm2 = vcmp.gt.f32.partialorder %v1722_v45, 0.0  ;;  %v2067_v44 = vmul.f32 0.2, %v1724_v56  ;;  %v1730_v4 = vadd.f32 %v4425_v13, %v4255_v58 }
 0x227   : > { %vm1848_vm3 = vcmp.gt.f32.partialorder %v1273_v10, 0.0  ;;  %v1912_v50 = vmul.f32 0.2, %v1273_v10  ;;  %v4536_v11 = vsel %vm2016_vm15, %v1718_v63, %v2064_v57  ;;  %v4539_v62 = vsel %vm2017_vm0, %v1720_v47, %v2065_v54  ;;  %v1449_v54 = vpop.permute.xlu1 %1448 }
 0x228   : > { %v1278_v17 = vpop.f32.mrf.mxu0  ;;  %v4533_v42 = vpop.f32.mrf.mxu1  ;;  %5351 = vst [vmem:[#allocation30_spill] sm:$0xff] %v4536_v11  ;;  %5352 = vst [vmem:[#allocation31_spill] sm:$0xff] %v4539_v62  ;;  %vm2019_vm4 = vcmp.gt.f32.partialorder %v1724_v56, 0.0  ;;  %v1275_v37 = vadd.f32 %v1274_v3, %v4319_v61  ;;  %v4542_v18 = vsel %vm2018_vm2, %v1722_v45, %v2066_v25  ;;  %v2068_v0 = vmul.f32 0.2, %v1728_v32 }
 0x229   : > { %5353 = vst [vmem:[#allocation32_spill] sm:$0xff] %v4542_v18  ;;  %v1976_v27 = vsel %vm1848_vm3, %v1273_v10, %v1912_v50  ;;  %v1277_v58 = vadd.f32 %v1276_v33, %v4285_v52  ;;  %vm2020_vm5 = vcmp.gt.f32.partialorder %v1728_v32, 0.0  ;;  %v1267_v63 = vadd.f32 %v4476_v60, %v4188_v12 }
 0x22a   : > { %v1282_v13 = vpop.f32.mrf.mxu0  ;;  %v4545_v53 = vpop.f32.mrf.mxu1  ;;  %v4550_v57 = vadd.f32 %v4364_v29, %v1976_v27  ;;  %vm1849_vm6 = vcmp.gt.f32.partialorder %v1275_v37, 0.0  ;;  %v4552_v47 = vsel %vm2019_vm4, %v1724_v56, %v2067_v44  ;;  %vm2021_vm8 = vcmp.gt.f32.partialorder %v1730_v4, 0.0 }
 0x22b   : > { %5354 = vst [vmem:[#allocation33_spill] sm:$0xff] %v4552_v47  ;;  %v1913_v61 = vmul.f32 0.2, %v1275_v37  ;;  %vm1850_vm9 = vcmp.gt.f32.partialorder %v1277_v58, 0.0  ;;  %v2069_v10 = vmul.f32 0.2, %v1730_v4  ;;  %v1732_v25 = vadd.f32 %v4431_v16, %v4257_v34 }
 0x22c   : > { %v1284_v45 = vpop.f32.mrf.mxu0  ;;  %v4554_v3 = vpop.f32.mrf.mxu1  ;;  %v1914_v33 = vmul.f32 0.2, %v1277_v58  ;;  %v1279_v60 = vadd.f32 %v1278_v17, %v4285_v52  ;;  %v4559_v50 = vsel %vm2020_vm5, %v1728_v32, %v2068_v0  ;;  %v1734_v29 = vadd.f32 %v4438_v2, %v4257_v34 }
 0x22d   : > { %5355 = vst [vmem:[#allocation34_spill] sm:$0xff] %v4559_v50  ;;  %v1738_v56 = vadd.f32 %v4445_v48, %v1449_v54  ;;  %v1977_v44 = vsel %vm1849_vm6, %v1275_v37, %v1913_v61  ;;  %v1740_v18 = vadd.f32 %v4462_v36, %v1449_v54  ;;  %v1910_v62 = vmul.f32 0.2, %v1267_v63 }
 0x22e   : > { %v1286_v27 = vpop.f32.mrf.mxu0  ;;  %v4564_v47 = vpop.f32.mrf.mxu1  ;;  %v4568_v11 = vadd.f32 %v4368_v14, %v1977_v44  ;;  %v1978_v16 = vsel %vm1850_vm9, %v1277_v58, %v1914_v33  ;;  %v1269_v52 = vadd.f32 %v4487_v43, %v4188_v12  ;;  %vm1851_vm10 = vcmp.gt.f32.partialorder %v1279_v60, 0.0 }
 0x22f   : > { %v4574_v32 = vadd.f32 %v4381_v30, %v1978_v16  ;;  %v1915_v34 = vmul.f32 0.2, %v1279_v60  ;;  %vm2022_vm11 = vcmp.gt.f32.partialorder %v1732_v25, 0.0  ;;  %v2070_v17 = vmul.f32 0.2, %v1732_v25 }
 0x230   : > { %v1288_v2 = vpop.f32.mrf.mxu0  ;;  %v4576_v48 = vpop.f32.mrf.mxu1  ;;  %vm1846_vm12 = vcmp.gt.f32.partialorder %v1267_v63, 0.0  ;;  %v1742_v14 = vadd.f32 %v4478_v8, %v4520_v39  ;;  %vm2023_vm13 = vcmp.gt.f32.partialorder %v1734_v29, 0.0  ;;  %v2071_v36 = vmul.f32 0.2, %v1734_v29 }
 0x231   : > { %v2072_v37 = vmul.f32 0.2, %v1738_v56  ;;  %v1979_v0 = vsel %vm1851_vm10, %v1279_v60, %v1915_v34  ;;  %vm2024_vm14 = vcmp.gt.f32.partialorder %v1738_v56, 0.0  ;;  %v2073_v30 = vmul.f32 0.2, %v1740_v18 }
 0x232   : > { %v4580_v58 = vpop.f32.mrf.mxu0  ;;  %v4582_v12 = vpop.f32.mrf.mxu1  ;;  %v1744_v43 = vadd.f32 %v4489_v6, %v4520_v39  ;;  %v4587_v61 = vadd.f32 %v4395_v9, %v1979_v0  ;;  %v4590_v54 = vsel %vm2021_vm8, %v1730_v4, %v2069_v10  ;;  %vm2025_vm15 = vcmp.gt.f32.partialorder %v1740_v18, 0.0 }
 0x233   : > { %5356 = vst [vmem:[#allocation35_spill] sm:$0xff] %v4590_v54  ;;  %v1974_v8 = vsel %vm1846_vm12, %v1267_v63, %v1910_v62  ;;  %v1911_v33 = vmul.f32 0.2, %v1269_v52  ;;  %v4595_v16 = vsel %vm2022_vm11, %v1732_v25, %v2070_v17  ;;  %v2074_v34 = vmul.f32 0.2, %v1742_v14  ;;  %v5373_v54 = vld [vmem:[#allocation25_spill] sm:$0xff] }
 0x234   : > { %v1294_v44 = vpop.f32.mrf.mxu0  ;;  %v4592_v60 = vpop.f32.mrf.mxu1  ;;  %5357 = vst [vmem:[#allocation36_spill] sm:$0xff] %v4595_v16  ;;  %vm1847_vm0 = vcmp.gt.f32.partialorder %v1269_v52, 0.0  ;;  %v1752_v6 = vadd.f32 %v4518_v23, %v4301_v7  ;;  %v4600_v9 = vsel %vm2023_vm13, %v1734_v29, %v2071_v36  ;;  %v4602_v39 = vsel %vm2024_vm14, %v1738_v56, %v2072_v37 }
 0x235   : > { %5358 = vst [vmem:[#allocation37_spill] sm:$0xff] %v4600_v9  ;;  %vm2026_vm2 = vcmp.gt.f32.partialorder %v1742_v14, 0.0  ;;  %v1283_v4 = vadd.f32 %v1282_v13, %v4283_v51  ;;  %v4607_v10 = vsel %vm2025_vm15, %v1740_v18, %v2073_v30  ;;  %v4610_v25 = vadd.f32 %v1974_v8, %v4448_v35 }
 0x236   : > { %v1296_v62 = vpop.f32.mrf.mxu0  ;;  %v4605_v63 = vpop.f32.mrf.mxu1  ;;  %v2075_v17 = vmul.f32 0.2, %v1744_v43  ;;  %v1285_v0 = vadd.f32 %v1284_v45, %v4283_v51  ;;  %v1975_v23 = vsel %vm1847_vm0, %v1269_v52, %v1911_v33  ;;  %vm2027_vm3 = vcmp.gt.f32.partialorder %v1744_v43, 0.0  ;;  %v5361_v45 = vld [vmem:[#allocation10_spill] sm:$0xff] }
 0x237   : > { %v4615_v29 = vadd.f32 %v4503_v49, %v4333_v15  ;;  %v1754_v13 = vadd.f32 %v4533_v42, %v4301_v7  ;;  %v4623_v18 = vsel %vm2026_vm2, %v1742_v14, %v2074_v34  ;;  %v4627_v35 = vadd.f32 %v4510_v21, %v4333_v15  ;;  %v5362_v49 = vld [vmem:[#allocation22_spill] sm:$0xff] }
 0x238   : > { %v4619_v56 = vpop.f32.mrf.mxu0  ;;  %v4621_v36 = vpop.f32.mrf.mxu1  ;;  %v2078_v51 = vmul.f32 0.2, %v1752_v6  ;;  %v1287_v52 = vadd.f32 %v1286_v27, %v5361_v45  ;;  %vm2030_vm4 = vcmp.gt.f32.partialorder %v1752_v6, 0.0  ;;  %v1916_v37 = vmul.f32 0.2, %v1283_v4 }
 0x239   : > { %5359 = vst [vmem:[#allocation38_spill] sm:$0xff] %v4615_v29  ;;  %5360 = vst [vmem:[#allocation39_spill] sm:$0xff] %v4627_v35  ;;  %v1758_v30 = vadd.f32 %v4545_v53, %v5362_v49  ;;  %v1760_v7 = vadd.f32 %v4554_v3, %v5362_v49  ;;  %v4639_v14 = vadd.f32 %v1975_v23, %v4459_v1  ;;  %vm1852_vm5 = vcmp.gt.f32.partialorder %v1283_v4, 0.0 }
 0x23a   : > { %v4634_v42 = vpop.f32.mrf.mxu0  ;;  %v4636_v8 = vpop.f32.mrf.mxu1  ;;  %v4642_v15 = vsel %vm2027_vm3, %v1744_v43, %v2075_v17  ;;  %v1917_v21 = vmul.f32 0.2, %v1285_v0  ;;  %v4645_v27 = vmul.f32 0.2, %v4615_v29  ;;  %v2079_v33 = vmul.f32 0.2, %v1754_v13 }
 0x23b   : > { %5363 = vst [vmem:[#allocation10_spill] sm:$0xff] %v4636_v8  ;;  %vm1853_vm6 = vcmp.gt.f32.partialorder %v1285_v0, 0.0  ;;  %v1289_v53 = vadd.f32 %v1288_v2, %v5361_v45  ;;  %v4653_v49 = vmul.f32 0.2, %v4627_v35  ;;  %v4656_v1 = vsel %vm2030_vm4, %v1752_v6, %v2078_v51  ;;  %v5369_v45 = vld [vmem:[#allocation17_spill] sm:$0xff]  ;;  %v5371_v51 = vld [vmem:[#allocation8_spill] sm:$0xff] }
 0x23c   : > { %5364 = vst [vmem:[#allocation22_spill] sm:$0xff] %v4645_v27  ;;  %v4648_v3 = vpop.f32.mrf.mxu0  ;;  %v4650_v34 = vpop.f32.mrf.mxu1  ;;  %5367 = vst [vmem:[#allocation42_spill] sm:$0xff] %v4656_v1  ;;  %vm2031_vm8 = vcmp.gt.f32.partialorder %v1754_v13, 0.0  ;;  %v1918_v43 = vmul.f32 0.2, %v1287_v52  ;;  %v1980_v17 = vsel %vm1852_vm5, %v1283_v4, %v1916_v37  ;;  %vm1854_vm9 = vcmp.gt.f32.partialorder %v1287_v52, 0.0 }
 0x23d   : > { %5365 = vst [vmem:[#allocation40_spill] sm:$0xff] %v4650_v34  ;;  %5366 = vst [vmem:[#allocation41_spill] sm:$0xff] %v4653_v49  ;;  %v2080_v23 = vmul.f32 0.2, %v1758_v30  ;;  %v2081_v8 = vmul.f32 0.2, %v1760_v7  ;;  %v1981_v2 = vsel %vm1853_vm6, %v1285_v0, %v1917_v21  ;;  %v1762_v34 = vadd.f32 %v4564_v47, %v5369_v45 }
 0x23e   : > { %v4658_v27 = vpop.f32.mrf.mxu0  ;;  %v4660_v9 = vpop.f32.mrf.mxu1  ;;  %vm2032_vm10 = vcmp.gt.f32.partialorder %v1758_v30, 0.0  ;;  %vm2033_vm11 = vcmp.gt.f32.partialorder %v1760_v7, 0.0  ;;  %v4664_v49 = vsel %vm2031_vm8, %v1754_v13, %v2079_v33  ;;  %v1919_v6 = vmul.f32 0.2, %v1289_v53  ;;  %v5374_v21 = vld [vmem:[#allocation9_spill] sm:$0xff]  ;;  %v5380_v35 = vld [vmem:[#allocation23_spill] sm:$0xff] }
 0x23f   : > { %5368 = vst [vmem:[#allocation43_spill] sm:$0xff] %v4660_v9  ;;  %5370 = vst [vmem:[#allocation17_spill] sm:$0xff] %v4664_v49  ;;  %v1293_v1 = vadd.f32 %v4580_v58, %v5371_v51  ;;  %v1295_v4 = vadd.f32 %v1294_v44, %v5371_v51  ;;  %v4674_v9 = vadd.f32 %v5373_v54, %v1980_v17  ;;  %vm1855_vm12 = vcmp.gt.f32.partialorder %v1289_v53, 0.0  ;;  %v5377_v17 = vld [vmem:[#allocation16_spill] sm:$0xff] }
 0x240   : > { %v4669_v37 = vpop.f32.mrf.mxu0  ;;  %v4671_v16 = vpop.f32.mrf.mxu1  ;;  %v1982_v0 = vsel %vm1854_vm9, %v1287_v52, %v1918_v43  ;;  %v1297_v29 = vadd.f32 %v1296_v62, %v5374_v21  ;;  %v4677_v47 = vsel %vm2032_vm10, %v1758_v30, %v2080_v23  ;;  %v4680_v13 = vadd.f32 %v4423_v38, %v1981_v2 }
 0x241   : > { %5372 = vst [vmem:[#allocation8_spill] sm:$0xff] %v4671_v16  ;;  %v4682_v33 = vsel %vm2033_vm11, %v1760_v7, %v2081_v8  ;;  %v1764_v58 = vadd.f32 %v4576_v48, %v5369_v45  ;;  %vm2034_vm13 = vcmp.gt.f32.partialorder %v1762_v34, 0.0  ;;  %v2082_v54 = vmul.f32 0.2, %v1762_v34  ;;  %v5378_v45 = vld [vmem:[#allocation12_spill] sm:$0xff] }
 0x242   : > { %5375 = vst [vmem:[#allocation25_spill] sm:$0xff] %v4682_v33  ;;  %v1312_v44 = vpop.f32.mrf.mxu0  ;;  %v4686_v51 = vpop.f32.mrf.mxu1  ;;  %v1768_v52 = vadd.f32 %v4582_v12, %v5377_v17  ;;  %v1770_v62 = vadd.f32 %v4592_v60, %v5377_v17  ;;  %v4693_v30 = vadd.f32 %v4429_v41, %v1982_v0  ;;  %v1983_v38 = vsel %vm1855_vm12, %v1289_v53, %v1919_v6 }
 0x243   : > { %5376 = vst [vmem:[#allocation9_spill] sm:$0xff] %v4686_v51  ;;  %v1920_v7 = vmul.f32 0.2, %v1293_v1  ;;  %v1921_v8 = vmul.f32 0.2, %v1295_v4  ;;  %vm1856_vm14 = vcmp.gt.f32.partialorder %v1293_v1, 0.0  ;;  %v1299_v2 = vadd.f32 %v4619_v56, %v5374_v21 }
 0x244   : > { %v1314_v43 = vpop.f32.mrf.mxu0  ;;  %v4695_v23 = vpop.f32.mrf.mxu1  ;;  %vm1857_vm15 = vcmp.gt.f32.partialorder %v1295_v4, 0.0  ;;  %v1922_v48 = vmul.f32 0.2, %v1297_v29  ;;  %vm2035_vm0 = vcmp.gt.f32.partialorder %v1764_v58, 0.0  ;;  %v2083_v12 = vmul.f32 0.2, %v1764_v58 }
 0x245   : > { %vm1858_vm2 = vcmp.gt.f32.partialorder %v1297_v29, 0.0  ;;  %v1772_v60 = vadd.f32 %v4605_v63, %v5378_v45  ;;  %v4704_v53 = vsel %vm2034_vm13, %v1762_v34, %v2082_v54  ;;  %v4707_v6 = vadd.f32 %v4435_v46, %v1983_v38  ;;  %v5381_v38 = vld [vmem:[#allocation7_spill] sm:$0xff] }
 0x246   : > { %v1316_v41 = vpop.f32.mrf.mxu0  ;;  %v4701_v0 = vpop.f32.mrf.mxu1  ;;  %5379 = vst [vmem:[#allocation16_spill] sm:$0xff] %v4704_v53  ;;  %v2084_v17 = vmul.f32 0.2, %v1768_v52  ;;  %v2085_v16 = vmul.f32 0.2, %v1770_v62  ;;  %v1984_v51 = vsel %vm1856_vm14, %v1293_v1, %v1920_v7  ;;  %vm2036_vm3 = vcmp.gt.f32.partialorder %v1768_v52, 0.0 }
 0x247   : > { %v1985_v56 = vsel %vm1857_vm15, %v1295_v4, %v1921_v8  ;;  %vm2037_vm4 = vcmp.gt.f32.partialorder %v1770_v62, 0.0  ;;  %v1986_v50 = vsel %vm1858_vm2, %v1297_v29, %v1922_v48  ;;  %v1923_v63 = vmul.f32 0.2, %v1299_v2  ;;  %v5382_v7 = vld [vmem:[#allocation27_spill] sm:$0xff] }
 0x248   : > { %v1318_v21 = vpop.f32.mrf.mxu0  ;;  %v4709_v49 = vpop.f32.mrf.mxu1  ;;  %v1774_v33 = vadd.f32 %v4621_v36, %v5378_v45  ;;  %v1313_v34 = vadd.f32 %v1312_v44, %v5380_v35  ;;  %v4715_v54 = vsel %vm2035_vm0, %v1764_v58, %v2083_v12  ;;  %v2086_v46 = vmul.f32 0.2, %v1772_v60 }
 0x249   : > { %vm1859_vm5 = vcmp.gt.f32.partialorder %v1299_v2, 0.0  ;;  %v1303_v1 = vadd.f32 %v4634_v42, %v5381_v38  ;;  %v4720_v8 = vadd.f32 %v5382_v7, %v1984_v51  ;;  %v4722_v53 = vsel %vm2036_vm3, %v1768_v52, %v2084_v17  ;;  %v5386_v17 = vld [vmem:[#allocation20_spill] sm:$0xff] }
 0x24a   : > { %v1322_v4 = vpop.f32.mrf.mxu0  ;;  %5383 = vst [vmem:[#allocation12_spill] sm:$0xff] %v4722_v53  ;;  %v4724_v29 = vsel %vm2037_vm4, %v1770_v62, %v2085_v16  ;;  %vm2038_vm6 = vcmp.gt.f32.partialorder %v1772_v60, 0.0  ;;  %v4726_v36 = vpop.f32.mrf.mxu1  ;;  %v4729_v44 = vadd.f32 %v4470_v31, %v1985_v56  ;;  %v4732_v58 = vadd.f32 %v4474_v40, %v1986_v50  ;;  %v5387_v40 = vld [vmem:[#allocation4_spill] sm:$0xff] }
 0x24b   : > { %5384 = vst [vmem:[#allocation23_spill] sm:$0xff] %v4724_v29  ;;  %vm1864_vm8 = vcmp.gt.f32.partialorder %v1313_v34, 0.0  ;;  %v1928_v48 = vmul.f32 0.2, %v1313_v34  ;;  %v1987_v12 = vsel %vm1859_vm5, %v1299_v2, %v1923_v63  ;;  %vm2039_vm9 = vcmp.gt.f32.partialorder %v1774_v33, 0.0 }
 0x24c   : > { %v1324_v42 = vpop.f32.mrf.mxu0  ;;  %v1305_v51 = vadd.f32 %v4648_v3, %v5381_v38  ;;  %v1315_v16 = vadd.f32 %v1314_v43, %v5380_v35  ;;  %v4737_v52 = vsel %vm2038_vm6, %v1772_v60, %v2086_v46  ;;  %v1924_v62 = vmul.f32 0.2, %v1303_v1  ;;  %v1799_v2 = vpop.f32.mrf.mxu1 }
 0x24d   : > { %5385 = vst [vmem:[#allocation7_spill] sm:$0xff] %v4737_v52  ;;  %v1992_v45 = vsel %vm1864_vm8, %v1313_v34, %v1928_v48  ;;  %v1317_v31 = vadd.f32 %v1316_v41, %v5386_v17  ;;  %vm1860_vm10 = vcmp.gt.f32.partialorder %v1303_v1, 0.0  ;;  %v1307_v50 = vadd.f32 %v4658_v27, %v5387_v40  ;;  %v5388_v34 = vld [vmem:[#allocation26_spill] sm:$0xff] }
 0x24e   : > { %v1326_v56 = vpop.f32.mrf.mxu0  ;;  %v2184_v7 = vadd.f32 %v4550_v57, %v1992_v45  ;;  %vm1865_vm11 = vcmp.gt.f32.partialorder %v1315_v16, 0.0  ;;  %v4744_v63 = vadd.f32 %v4496_v55, %v1987_v12  ;;  %v2087_v3 = vmul.f32 0.2, %v1774_v33  ;;  %v1801_v29 = vpop.f32.mrf.mxu1 }
 0x24f   : > { %v1929_v35 = vmul.f32 0.2, %v1315_v16  ;;  %vm1866_vm12 = vcmp.gt.f32.partialorder %v1317_v31, 0.0  ;;  %v1925_v60 = vmul.f32 0.2, %v1305_v51  ;;  %v1309_v41 = vadd.f32 %v4669_v37, %v5387_v40 }
 0x250   : > { %v1328_v43 = vpop.f32.mrf.mxu0  ;;  %v2200_v46 = vadd.f32 %v2184_v7, %v5388_v34  ;;  %v1930_v38 = vmul.f32 0.2, %v1317_v31  ;;  %v1988_v48 = vsel %vm1860_vm10, %v1303_v1, %v1924_v62  ;;  %vm1861_vm13 = vcmp.gt.f32.partialorder %v1305_v51, 0.0  ;;  %v5390_v34 = vld [vmem:[#allocation15_spill] sm:$0xff] }
 0x251   : > { %v1993_v27 = vsel %vm1865_vm11, %v1315_v16, %v1929_v35  ;;  %v1319_v57 = vadd.f32 %v1318_v21, %v5386_v17  ;;  %vm1862_vm14 = vcmp.gt.f32.partialorder %v1307_v50, 0.0  ;;  %v1926_v53 = vmul.f32 0.2, %v1307_v50  ;;  %v5389_v17 = vld [vmem:[#allocation21_spill] sm:$0xff] }
 0x252   : > { %v4750_v45 = vpop.f32.mrf.mxu0  ;;  %v4753_v55 = vadd.f32 %v2200_v46, %v4602_v39  ;;  %v2185_v12 = vadd.f32 %v4568_v11, %v1993_v27  ;;  %v1994_v52 = vsel %vm1866_vm12, %v1317_v31, %v1930_v38  ;;  %v1989_v62 = vsel %vm1861_vm13, %v1305_v51, %v1925_v60  ;;  %v5391_v38 = vld [vmem:[#allocation24_spill] sm:$0xff] }
 0x253   : > { %v2186_v37 = vadd.f32 %v4574_v32, %v1994_v52  ;;  %vm1867_vm15 = vcmp.gt.f32.partialorder %v1319_v57, 0.0  ;;  %v1931_v40 = vmul.f32 0.2, %v1319_v57  ;;  %v1927_v16 = vmul.f32 0.2, %v1309_v41  ;;  %v1803_v52 = vpop.f32.mrf.mxu1 }
 0x254   : > { %v1334_v1 = vpop.f32.mrf.mxu0  ;;  %v2201_v21 = vadd.f32 %v2185_v12, %v4453_v20  ;;  %v1323_v7 = vadd.f32 %v1322_v4, %v5389_v17  ;;  %v4760_v35 = vsel %vm2039_vm9, %v1774_v33, %v2087_v3  ;;  %vm1863_vm0 = vcmp.gt.f32.partialorder %v1309_v41, 0.0 }
 0x255   : > { %v2202_v11 = vadd.f32 %v2186_v37, %v4457_v28  ;;  %v1995_v39 = vsel %vm1867_vm15, %v1319_v57, %v1931_v40  ;;  %v4764_v31 = vadd.f32 %v4501_v22, %v1988_v48  ;;  %v4773_v4 = vadd.f32 %v4516_v19, %v1989_v62  ;;  %v5392_v57 = vld [vmem:[#allocation19_spill] sm:$0xff] }
 0x256   : > { %v4767_v32 = vadd.f32 %v2201_v21, %v4607_v10  ;;  %v2187_v51 = vadd.f32 %v4587_v61, %v1995_v39  ;;  %vm1868_vm2 = vcmp.gt.f32.partialorder %v1323_v7, 0.0  ;;  %v4770_v20 = vpop.f32.mrf.mxu0  ;;  %v1990_v33 = vsel %vm1862_vm14, %v1307_v50, %v1926_v53 }
 0x257   : > { %v4777_v28 = vadd.f32 %v2202_v11, %v4623_v18  ;;  %v1932_v3 = vmul.f32 0.2, %v1323_v7  ;;  %v1991_v22 = vsel %vm1863_vm0, %v1309_v41, %v1927_v16  ;;  %v1325_v10 = vadd.f32 %v1324_v42, %v5389_v17  ;;  %v4790_v42 = vpop.permute.xlu0 %1498  ;;  %v5394_v11 = vld [vmem:[#allocation14_spill] sm:$0xff] }
 0x258   : > { %v2203_v60 = vadd.f32 %v2187_v51, %v4465_v24  ;;  %v1327_v61 = vadd.f32 %v1326_v56, %v5390_v34  ;;  %v1798_v48 = vadd.f32 %v4726_v36, %v5391_v38  ;;  %v1800_v19 = vadd.f32 %v1799_v2, %v5391_v38  ;;  %v1807_v24 = vpop.f32.mrf.mxu1  ;;  %v1338_v41 = vpop.f32.mrf.mxu0 }
 0x259   : > { %v1996_v46 = vsel %vm1868_vm2, %v1323_v7, %v1932_v3  ;;  %v1329_v27 = vadd.f32 %v1328_v43, %v5390_v34  ;;  %vm1869_vm3 = vcmp.gt.f32.partialorder %v1325_v10, 0.0  ;;  %v1933_v50 = vmul.f32 0.2, %v1325_v10 }
 0x25a   : > { %v4787_v53 = vadd.f32 %v2203_v60, %v4642_v15  ;;  %v2188_v18 = vadd.f32 %v4674_v9, %v1996_v46  ;;  %v4793_v56 = vadd.f32 %v4610_v25, %v1990_v33  ;;  %vm1870_vm4 = vcmp.gt.f32.partialorder %v1327_v61, 0.0  ;;  %v5393_v9 = vld [vmem:[#allocation29_spill] sm:$0xff]  ;;  %v1342_v21 = vpop.f32.mrf.mxu0  ;;  %v5396_v60 = vld [vmem:[#allocation18_spill] sm:$0xff] }
 0x25b   : > { %v1934_v36 = vmul.f32 0.2, %v1327_v61  ;;  %v1802_v2 = vadd.f32 %v1801_v29, %v5392_v57  ;;  %v4797_v43 = vadd.f32 %v4639_v14, %v1991_v22  ;;  %v4801_v15 = vadd.f32 %v4695_v23, %v4790_v42  ;;  %v1809_v14 = vpop.f32.mrf.mxu1 }
 0x25c   : > { %v4804_v12 = vadd.f32 %v2188_v18, %v5393_v9  ;;  %v1997_v37 = vsel %vm1869_vm3, %v1325_v10, %v1933_v50  ;;  %vm2048_vm5 = vcmp.gt.f32.partialorder %v1798_v48, 0.0  ;;  %vm1871_vm6 = vcmp.gt.f32.partialorder %v1329_v27, 0.0  ;;  %v1344_v34 = vpop.f32.mrf.mxu0  ;;  %v5398_v9 = vld [vmem:[#allocation30_spill] sm:$0xff] }
 0x25d   : > { %v2189_v40 = vadd.f32 %v4680_v13, %v1997_v37  ;;  %v1998_v25 = vsel %vm1870_vm4, %v1327_v61, %v1934_v36  ;;  %v2096_v62 = vmul.f32 0.2, %v1798_v48  ;;  %vm2049_vm8 = vcmp.gt.f32.partialorder %v1800_v19, 0.0  ;;  %v1811_v61 = vpop.f32.mrf.mxu1  ;;  %v5397_v36 = vld [vmem:[#allocation11_spill] sm:$0xff] }
 0x25e   : > { %v2190_v29 = vadd.f32 %v4693_v30, %v1998_v25  ;;  %v1935_v16 = vmul.f32 0.2, %v1329_v27  ;;  %v2097_v23 = vmul.f32 0.2, %v1800_v19  ;;  %v2098_v7 = vmul.f32 0.2, %v1802_v2 }
 0x25f   : > { %v4809_v17 = vadd.f32 %v2189_v40, %v4523_v59  ;;  %v1333_v39 = vadd.f32 %v4750_v45, %v5394_v11  ;;  %v1804_v33 = vadd.f32 %v1803_v52, %v5392_v57  ;;  %v1335_v3 = vadd.f32 %v1334_v1, %v5394_v11  ;;  %v5395_v30 = vld [vmem:[#allocation28_spill] sm:$0xff] }
 0x260   : > { %v4814_v51 = vadd.f32 %v2190_v29, %v4526_v5  ;;  %v1999_v13 = vsel %vm1871_vm6, %v1329_v27, %v1935_v16  ;;  %v4820_v22 = vadd.f32 %v4701_v0, %v5395_v30  ;;  %vm2050_vm9 = vcmp.gt.f32.partialorder %v1802_v2, 0.0  ;;  %v5400_v29 = vld [vmem:[#allocation31_spill] sm:$0xff] }
 0x261   : > { %v2191_v59 = vadd.f32 %v4707_v6, %v1999_v13  ;;  %v1810_v10 = vadd.f32 %v1809_v14, %v5396_v60  ;;  %v4826_v45 = vadd.f32 %v4709_v49, %v5395_v30  ;;  %v4829_v5 = vsel %vm2048_vm5, %v1798_v48, %v2096_v62 }
 0x262   : > { %vm1872_vm10 = vcmp.gt.f32.partialorder %v1333_v39, 0.0  ;;  %v1936_v52 = vmul.f32 0.2, %v1333_v39  ;;  %v4832_v1 = vsel %vm2049_vm8, %v1800_v19, %v2097_v23  ;;  %vm1873_vm11 = vcmp.gt.f32.partialorder %v1335_v3, 0.0 }
 0x263   : > { %v4835_v0 = vadd.f32 %v2191_v59, %v4529_v26  ;;  %v1937_v6 = vmul.f32 0.2, %v1335_v3  ;;  %v4837_v46 = vsel %vm2050_vm9, %v1802_v2, %v2098_v7  ;;  %v2099_v38 = vmul.f32 0.2, %v1804_v33  ;;  %v1346_v2 = vpop.f32.mrf.mxu0 }
 0x264   : > { %v2000_v49 = vsel %vm1872_vm10, %v1333_v39, %v1936_v52  ;;  %v4840_v27 = vadd.f32 %v1807_v24, %v5396_v60  ;;  %v2101_v50 = vmul.f32 0.2, %v1810_v10  ;;  %v1337_v19 = vadd.f32 %v4770_v20, %v5397_v36  ;;  %v5399_v24 = vld [vmem:[#allocation13_spill] sm:$0xff] }
 0x265   : > { %v2192_v48 = vadd.f32 %v4720_v8, %v2000_v49  ;;  %v2001_v18 = vsel %vm1873_vm11, %v1335_v3, %v1937_v6  ;;  %vm2051_vm12 = vcmp.gt.f32.partialorder %v1804_v33, 0.0  ;;  %vm2053_vm13 = vcmp.gt.f32.partialorder %v1810_v10, 0.0  ;;  %v1813_v8 = vpop.f32.mrf.mxu1  ;;  %v1348_v30 = vpop.f32.mrf.mxu0 }
 0x266   : > { %v2193_v26 = vadd.f32 %v4729_v44, %v2001_v18  ;;  %v1339_v57 = vadd.f32 %v1338_v41, %v5397_v36  ;;  %vm1874_vm14 = vcmp.gt.f32.partialorder %v1337_v19, 0.0  ;;  %v1938_v40 = vmul.f32 0.2, %v1337_v19  ;;  %v5401_v41 = vld [vmem:[#allocation6_spill] sm:$0xff]  ;;  %v5405_v18 = vld [vmem:[#allocation39_spill] sm:$0xff] }
 0x267   : > { %v2208_v37 = vadd.f32 %v2192_v48, %v5398_v9  ;;  %v4849_v25 = vadd.f32 %v1811_v61, %v5399_v24  ;;  %v4852_v62 = vmul.f32 0.2, %v4840_v27  ;;  %v2147_v44 = vsel %vm2051_vm12, %v1804_v33, %v2099_v38  ;;  %v5404_v61 = vld [vmem:[#allocation33_spill] sm:$0xff]  ;;  %v5407_v9 = vld [vmem:[#allocation34_spill] sm:$0xff] }
 0x268   : > { %v2209_v20 = vadd.f32 %v2193_v26, %v5400_v29  ;;  %vm1875_vm15 = vcmp.gt.f32.partialorder %v1339_v57, 0.0  ;;  %v1939_v16 = vmul.f32 0.2, %v1339_v57  ;;  %v2149_v14 = vsel %vm2053_vm13, %v1810_v10, %v2101_v50  ;;  %v5402_v10 = vld [vmem:[#allocation32_spill] sm:$0xff]  ;;  %v5409_v29 = vld [vmem:[#allocation38_spill] sm:$0xff] }
 0x269   : > { %v2002_v23 = vsel %vm1874_vm14, %v1337_v19, %v1938_v40  ;;  %v1343_v7 = vadd.f32 %v1342_v21, %v5401_v41  ;;  %v1814_v13 = vadd.f32 %v1813_v8, %v5399_v24  ;;  %v1345_v3 = vadd.f32 %v1344_v34, %v5401_v41  ;;  %v5403_v21 = vld [vmem:[#allocation5_spill] sm:$0xff] }
 0x26a   : > { %v2194_v11 = vadd.f32 %v4732_v58, %v2002_v23  ;;  %v2003_v39 = vsel %vm1875_vm15, %v1339_v57, %v1939_v16  ;;  %vm2052_vm0 = vcmp.gt.f32.partialorder %v4840_v27, 0.0  ;;  %v2102_v59 = vmul.f32 0.2, %v4849_v25  ;;  %v5406_v57 = vld [vmem:[#allocation25_spill] sm:$0xff] }
 0x26b   : > { %v2195_v60 = vadd.f32 %v4744_v63, %v2003_v39  ;;  %vm1876_vm2 = vcmp.gt.f32.partialorder %v1343_v7, 0.0  ;;  %v1940_v33 = vmul.f32 0.2, %v1343_v7  ;;  %vm2054_vm3 = vcmp.gt.f32.partialorder %v4849_v25, 0.0  ;;  %v5411_v39 = vld [vmem:[#allocation12_spill] sm:$0xff] }
 0x26c   : > { %v2210_v52 = vadd.f32 %v2194_v11, %v5402_v10  ;;  %vm1877_vm4 = vcmp.gt.f32.partialorder %v1345_v3, 0.0  ;;  %v1941_v58 = vmul.f32 0.2, %v1345_v3  ;;  %v1347_v6 = vadd.f32 %v1346_v2, %v5403_v21 }
 0x26d   : > { %v2211_v38 = vadd.f32 %v2195_v60, %v5404_v61  ;;  %v2004_v34 = vsel %vm1876_vm2, %v1343_v7, %v1940_v33  ;;  %v1349_v49 = vadd.f32 %v1348_v30, %v5403_v21  ;;  %v2224_v48 = vadd.f32 %v2208_v37, %v4677_v47  ;;  %v5408_v47 = vld [vmem:[#allocation16_spill] sm:$0xff] }
 0x26e   : > { %vm2029_vm5 = vcmp.gt.f32.partialorder %v5405_v18, 0.0  ;;  %v2196_v63 = vadd.f32 %v4764_v31, %v2004_v34  ;;  %v2005_v50 = vsel %vm1877_vm4, %v1345_v3, %v1941_v58  ;;  %vm1878_vm6 = vcmp.gt.f32.partialorder %v1347_v6, 0.0  ;;  %v5410_v31 = vld [vmem:[#allocation35_spill] sm:$0xff]  ;;  %v5412_v3 = vld [vmem:[#allocation36_spill] sm:$0xff] }
 0x26f   : > { %v1942_v36 = vmul.f32 0.2, %v1347_v6  ;;  %v2197_v19 = vadd.f32 %v4773_v4, %v2005_v50  ;;  %vm1879_vm8 = vcmp.gt.f32.partialorder %v1349_v49, 0.0  ;;  %v1943_v26 = vmul.f32 0.2, %v1349_v49 }
 0x270   : > { %v2225_v2 = vadd.f32 %v2209_v20, %v5406_v57  ;;  %v2212_v40 = vadd.f32 %v2196_v63, %v5407_v9  ;;  %v4874_v8 = vadd.f32 %v2224_v48, %v4829_v5  ;;  %v2226_v37 = vadd.f32 %v2210_v52, %v5408_v47  ;;  %v5416_v63 = vld [vmem:[#allocation17_spill] sm:$0xff] }
 0x271   : > { %v2006_v24 = vsel %vm1878_vm6, %v1347_v6, %v1942_v36  ;;  %vm2028_vm9 = vcmp.gt.f32.partialorder %v5409_v29, 0.0  ;;  %v2213_v16 = vadd.f32 %v2197_v19, %v5410_v31  ;;  %v2007_v41 = vsel %vm1879_vm8, %v1349_v49, %v1943_v26  ;;  %v5415_v6 = vld [vmem:[#allocation7_spill] sm:$0xff]  ;;  %v5418_v57 = vld [vmem:[#allocation41_spill] sm:$0xff] }
 0x272   : > { %v2198_v23 = vadd.f32 %v4793_v56, %v2006_v24  ;;  %v4881_v4 = vadd.f32 %v2225_v2, %v4832_v1  ;;  %v2103_v7 = vmul.f32 0.2, %v1814_v13  ;;  %v2199_v20 = vadd.f32 %v4797_v43, %v2007_v41  ;;  %v5413_v56 = vld [vmem:[#allocation23_spill] sm:$0xff]  ;;  %v5414_v1 = vld [vmem:[#allocation37_spill] sm:$0xff] }
 0x273   : > { %v2227_v11 = vadd.f32 %v2211_v38, %v4715_v54  ;;  %v2228_v5 = vadd.f32 %v2212_v40, %v5411_v39  ;;  %v2229_v10 = vadd.f32 %v2213_v16, %v5413_v56  ;;  %vm2055_vm10 = vcmp.gt.f32.partialorder %v1814_v13, 0.0  ;;  %v5422_v31 = vld [vmem:[#allocation43_spill] sm:$0xff] }
 0x274   : > { %v2214_v30 = vadd.f32 %v2198_v23, %v5412_v3  ;;  %v2512_v60 = vadd.f32 %v4881_v4, %v4874_v8  ;;  %v2488_v33 = vmax.f32 %v4874_v8, %v4881_v4  ;;  %v2215_v52 = vadd.f32 %v2199_v20, %v5414_v1 }
 0x275   : > { %v4894_v58 = vadd.f32 %v2226_v37, %v4837_v46  ;;  %v4896_v43 = vadd.f32 %v2227_v11, %v2147_v44  ;;  %vm2047_vm11 = vcmp.gt.f32.partialorder %v4826_v45, 0.0  ;;  %v2095_v54 = vmul.f32 0.2, %v4826_v45  ;;  %v5421_v37 = vld [vmem:[#allocation22_spill] sm:$0xff] }
 0x276   : > { %2513 = vadd.xlane.f32.xlu0 %v2512_v60  ;;  %2489 = vmax.xlane.f32.xlu1 %v2488_v33  ;;  %v4900_v21 = vadd.f32 %v2229_v10, %v2149_v14  ;;  %v2230_v61 = vadd.f32 %v2214_v30, %v5415_v6  ;;  %v2148_v38 = vsel %vm2052_vm0, %v4840_v27, %v4852_v62  ;;  %v5417_v27 = vld [vmem:[#allocation9_spill] sm:$0xff]  ;;  %v2094_v36 = vmul.f32 0.2, %v4820_v22  ;;  %v5424_v30 = vld [vmem:[#allocation10_spill] sm:$0xff] }
 0x277   : > { %v2515_v46 = vadd.f32 %v4896_v43, %v4894_v58  ;;  %v2491_v44 = vmax.f32 %v4894_v58, %v4896_v43  ;;  %v2231_v34 = vadd.f32 %v2215_v52, %v4760_v35  ;;  %v2150_v14 = vsel %vm2054_vm3, %v4849_v25, %v2102_v59  ;;  %v1494_v35 = vpop.permute.xlu0 %1493  ;;  %v5420_v59 = vld [vmem:[#allocation8_spill] sm:$0xff] }
 0x278   : > { %v2151_v49 = vsel %vm2055_vm10, %v1814_v13, %v2103_v7  ;;  %v4915_v48 = vadd.f32 %v2228_v5, %v2148_v38  ;;  %v2223_v50 = vadd.f32 %v4835_v0, %v5416_v63  ;;  %v1788_v62 = vadd.f32 %v5417_v27, %v4790_v42  ;;  %v5419_v42 = vld [vmem:[#allocation42_spill] sm:$0xff] }
 0x279   : > { %v4922_v19 = vadd.f32 %v2230_v61, %v2150_v14  ;;  %v4924_v26 = vadd.f32 %v2231_v34, %v2151_v49  ;;  %v2125_v25 = vsel %vm2029_vm5, %v5405_v18, %v5418_v57  ;;  %vm2046_vm12 = vcmp.gt.f32.partialorder %v4820_v22, 0.0 }
 0x27a   : > { %2516 = vadd.xlane.f32.xlu0 %v2515_v46  ;;  %2492 = vmax.xlane.f32.xlu1 %v2491_v44  ;;  %v2494_v0 = vmax.f32 %v4915_v48, %v4900_v21  ;;  %v2222_v13 = vadd.f32 %v4814_v51, %v5419_v42  ;;  %v1784_v2 = vadd.f32 %v5420_v59, %v1494_v35  ;;  %v2093_v9 = vmul.f32 0.2, %v4801_v15 }
 0x27b   : > { %v2143_v40 = vsel %vm2047_vm11, %v4826_v45, %v2095_v54  ;;  %v2521_v18 = vadd.f32 %v4924_v26, %v4922_v19  ;;  %vm2045_vm13 = vcmp.gt.f32.partialorder %v4801_v15, 0.0  ;;  %v2221_v24 = vadd.f32 %v4809_v17, %v2125_v25  ;;  %v1489_v45 = vpop.permute.xlu1 %1488  ;;  %v5423_v17 = vld [vmem:[#allocation40_spill] sm:$0xff] }
 0x27c   : > { %v4944_v47 = vadd.f32 %v2223_v50, %v2143_v40  ;;  %v2124_v51 = vsel %vm2028_vm9, %v5409_v29, %v5421_v37  ;;  %v1782_v16 = vadd.f32 %v5422_v31, %v1494_v35  ;;  %v2092_v23 = vmul.f32 0.2, %v1788_v62 }
 0x27d   : > { %v2142_v41 = vsel %vm2046_vm12, %v4820_v22, %v2094_v36  ;;  %vm2044_vm14 = vcmp.gt.f32.partialorder %v1788_v62, 0.0  ;;  %v2220_v7 = vadd.f32 %v4804_v12, %v2124_v51  ;;  %v1780_v11 = vadd.f32 %v5423_v17, %v1489_v45 }
 0x27e   : > { %2495 = vmax.xlane.f32.xlu0 %v2494_v0  ;;  %2522 = vadd.xlane.f32.xlu1 %v2521_v18  ;;  %v4953_v20 = vadd.f32 %v2222_v13, %v2142_v41  ;;  %v2091_v39 = vmul.f32 0.2, %v1784_v2  ;;  %v2141_v5 = vsel %vm2045_vm13, %v4801_v15, %v2093_v9  ;;  %vm2043_vm15 = vcmp.gt.f32.partialorder %v1784_v2, 0.0 }
 0x27f   : > { %v2518_v29 = vadd.f32 %v4900_v21, %v4915_v48  ;;  %v4961_v3 = vadd.f32 %v2221_v24, %v2141_v5  ;;  %v1778_v12 = vadd.f32 %v5424_v30, %v1489_v45  ;;  %v2090_v60 = vmul.f32 0.2, %v1782_v16 }
 0x280   : > { %v2485_v22 = vmax.f32 %v4953_v20, %v4944_v47  ;;  %v2140_v33 = vsel %vm2044_vm14, %v1788_v62, %v2092_v23  ;;  %vm2042_vm0 = vcmp.gt.f32.partialorder %v1782_v16, 0.0  ;;  %v2089_v10 = vmul.f32 0.2, %v1780_v11 }
 0x281   : > { %v4964_v56 = vadd.f32 %v2220_v7, %v2140_v33  ;;  %v2139_v15 = vsel %vm2043_vm15, %v1784_v2, %v2091_v39  ;;  %vm2041_vm2 = vcmp.gt.f32.partialorder %v1780_v11, 0.0  ;;  %v2497_v1 = vmax.f32 %v4922_v19, %v4924_v26 }
 0x282   : > { %2519 = vadd.xlane.f32.xlu0 %v2518_v29  ;;  %2486 = vmax.xlane.f32.xlu1 %v2485_v22  ;;  %v4971_v54 = vadd.f32 %v4787_v53, %v2139_v15  ;;  %v2088_v6 = vmul.f32 0.2, %v1778_v12  ;;  %v2138_v61 = vsel %vm2042_vm0, %v1782_v16, %v2090_v60  ;;  %vm2040_vm3 = vcmp.gt.f32.partialorder %v1778_v12, 0.0 }
 0x283   : > { %v2482_v52 = vmax.f32 %v4964_v56, %v4961_v3  ;;  %v4974_v38 = vadd.f32 %v4777_v28, %v2138_v61  ;;  %v2137_v46 = vsel %vm2041_vm2, %v1780_v11, %v2089_v10  ;;  %v2509_v44 = vadd.f32 %v4944_v47, %v4953_v20 }
 0x284   : > { %v4981_v14 = vadd.f32 %v4767_v32, %v2137_v46  ;;  %v2136_v53 = vsel %vm2040_vm3, %v1778_v12, %v2088_v6  ;;  %v2506_v28 = vadd.f32 %v4961_v3, %v4964_v56  ;;  %v3770_v27 = vmov 0.0  }
 0x285   : > { %v2479_v34 = vmax.f32 %v4974_v38, %v4971_v54  ;;  %v4984_v49 = vadd.f32 %v4753_v55, %v2136_v53  ;;  %v2503_v50 = vadd.f32 %v4971_v54, %v4974_v38  ;;  %3599 = vmatprep.subr.mxu1 %v3770_v27  ;;  %vm3771_vm4 = vmmov 0  }
 0x286   : > { %2498 = vmax.xlane.f32.xlu0 %v2497_v1  ;;  %2483 = vmax.xlane.f32.xlu1 %v2482_v52  ;;  %v5425_v13 = vlaneseq  ;;  %vm2624_vm6 = vcmask 31744  }
 0x287   : > { %v2476_v63 = vmax.f32 %v4984_v49, %v4981_v14  ;;  %v2500_v32 = vadd.f32 %v4981_v14, %v4984_v49  ;;  %3615 = vmatprep.mubr.msk.f32.mxu1 %vm3771_vm4, %v3770_v27 }
 0x288   : > { %v2475_v59 = vand.u32 127, %v5425_v13  ;;  %v2271_v13 = vld [vmem:[%s5294_s8 + $0x30] sm:$0xff] }
 0x28a   : > { %2510 = vadd.xlane.f32.xlu0 %v2509_v44  ;;  %2480 = vmax.xlane.f32.xlu1 %v2479_v34  ;;  %vm2540_vm5 = vcmp.eq.s32.totalorder %v2475_v59, 0  ;;  %v2264_v34 = vld [vmem:[%s5293_s7] sm:$0xf]  ;;  %v2272_v59 = vld [vmem:[%s5294_s8 + $0x38] sm:$0xff] }
 0x28e   : > { %2507 = vadd.xlane.f32.xlu0 %v2506_v28  ;;  %2477 = vmax.xlane.f32.xlu1 %v2476_v63  ;;  %v2265_v28 = vld [vmem:[%s5294_s8] sm:$0xff] }
 0x292   : > { %2504 = vadd.xlane.f32.xlu0 %v2503_v50 }
 0x296   : > { %2501 = vadd.xlane.f32.xlu0 %v2500_v32 }
 0x2ff   : > { %v4994_v55 = vpop.xlane.xlu0 %2513  ;;  %v2490_v62 = vpop.xlane.xlu1 %2489 }
 0x300   : > { %v2528_v41 = vmul.f32 0.00055803574, %v4994_v55  ;;  %v2536_v45 = vmul.f32 0.14285715, %v2490_v62  ;;  %v2267_v62 = vld [vmem:[%s5294_s8 + $0x10] sm:$0xff] }
 0x302   : > { %v2545_v30 = vsel %vm2540_vm5, %v2528_v41, %v2536_v45 }
 0x303   : > { %v4996_v36 = vpop.xlane.xlu0 %2516  ;;  %v2493_v35 = vpop.xlane.xlu1 %2492 }
 0x304   : > { %v2529_v37 = vmul.f32 0.00055803574, %v4996_v36  ;;  %v2537_v51 = vmul.f32 0.14285715, %v2493_v35  ;;  %v2268_v35 = vld [vmem:[%s5294_s8 + $0x18] sm:$0xff] }
 0x306   : > { %v2546_v11 = vsel %vm2540_vm5, %v2529_v37, %v2537_v51 }
 0x307   : > { %v2496_v57 = vpop.xlane.xlu0 %2495  ;;  %v4998_v25 = vpop.xlane.xlu1 %2522 }
 0x308   : > { %v2531_v40 = vmul.f32 0.00055803574, %v4998_v25  ;;  %v2538_v31 = vmul.f32 0.14285715, %v2496_v57  ;;  %v2269_v57 = vld [vmem:[%s5294_s8 + $0x20] sm:$0xff] }
 0x30b   : > { %v5000_v0 = vpop.xlane.xlu0 %2519  ;;  %v2487_v42 = vpop.xlane.xlu1 %2486 }
 0x30c   : > { %v2530_v9 = vmul.f32 0.00055803574, %v5000_v0  ;;  %v2535_v29 = vmul.f32 0.14285715, %v2487_v42  ;;  %v2270_v42 = vld [vmem:[%s5294_s8 + $0x28] sm:$0xff] }
 0x30e   : > { %v2547_v7 = vsel %vm2540_vm5, %v2530_v9, %v2538_v31 }
 0x30f   : > { %v2499_v2 = vpop.xlane.xlu0 %2498  ;;  %v2484_v24 = vpop.xlane.xlu1 %2483 }
 0x310   : > { %v2539_v18 = vmul.f32 0.14285715, %v2499_v2  ;;  %v2534_v12 = vmul.f32 0.14285715, %v2484_v24 }
 0x312   : > { %v2548_v16 = vsel %vm2540_vm5, %v2531_v40, %v2539_v18 }
 0x313   : > { %3600 = vmatpush3.msra.mxu1 %v2548_v16  ;;  %v5007_v23 = vpop.xlane.xlu0 %2510  ;;  %v2481_v5 = vpop.xlane.xlu1 %2480 }
 0x314   : > { %3601 = vmatprep.subr.mxu1 %v3770_v27  ;;  %v2527_v17 = vmul.f32 0.00055803574, %v5007_v23  ;;  %v2533_v10 = vmul.f32 0.14285715, %v2481_v5 }
 0x315   : > { %3602 = vmatpush3.msra.mxu1 %v2547_v7 }
 0x316   : > { %3603 = vmatprep.subr.mxu1 %v3770_v27  ;;  %v2544_v60 = vsel %vm2540_vm5, %v2527_v17, %v2535_v29 }
 0x317   : > { %3604 = vmatpush3.msra.mxu1 %v2546_v11  ;;  %v5013_v39 = vpop.xlane.xlu0 %2507  ;;  %v2478_v52 = vpop.xlane.xlu1 %2477 }
 0x318   : > { %v2526_v22 = vmul.f32 0.00055803574, %v5013_v39  ;;  %3605 = vmatprep.subr.mxu1 %v3770_v27  ;;  %v2532_v46 = vmul.f32 0.14285715, %v2478_v52 }
 0x319   : > { %3606 = vmatpush3.msra.mxu1 %v2545_v30 }
 0x31a   : > { %3607 = vmatprep.subr.mxu1 %v3770_v27  ;;  %v2543_v1 = vsel %vm2540_vm5, %v2526_v22, %v2534_v12 }
 0x31b   : > { %3608 = vmatpush3.msra.mxu1 %v2544_v60  ;;  %v5018_v33 = vpop.xlane.xlu0 %2504 }
 0x31c   : > { %v2525_v15 = vmul.f32 0.00055803574, %v5018_v33  ;;  %3609 = vmatprep.subr.mxu1 %v3770_v27 }
 0x31d   : > { %3610 = vmatpush3.msra.mxu1 %v2543_v1 }
 0x31e   : > { %3611 = vmatprep.subr.mxu1 %v3770_v27  ;;  %v2542_v6 = vsel %vm2540_vm5, %v2525_v15, %v2533_v10 }
 0x31f   : > { %3612 = vmatpush3.msra.mxu1 %v2542_v6  ;;  %v5023_v61 = vpop.xlane.xlu0 %2501 }
 0x320   : > { %v2524_v44 = vmul.f32 0.00055803574, %v5023_v61  ;;  %3613 = vmatprep.subr.mxu1 %v3770_v27  ;;  %v2266_v27 = vld [vmem:[%s5294_s8 + $0x8] sm:$0xff] }
 0x322   : > { %v2541_v53 = vsel %vm2540_vm5, %v2524_v44, %v2532_v46 }
 0x323   : > { %3614 = vmatpush3.msra.mxu1 %v2541_v53 }
 0x324   : > { %3616 = vmatmul.mubr.msk.f32.vlgmr.msra.gmra.mxu1 %vm612_vm1, %v2264_v34 }
 0x325   : > { %3620 = vmatprep.mubr.msk.f32.mxu1 %vm2624_vm6, %v2265_v28 }
 0x3e4   : > { %v2619_v63 = vpop.f32.mrf.mxu1 }
 0x3e5   : > { %v2623_v50 = vmax.f32 %v2619_v63, 0.0 }
 0x3e6   : > { %v3617_v32 = vpop.f32.mrf.mxu1 }
 0x3e7   : > { %3618 = vmatprep.subr.msk.mxu1 %vm434_vm7, %v2623_v50 }
 0x3e8   : > { %3619 = vmatpush3.msk.msra.mxu1 %vm434_vm7, %v2623_v50  ;;  %vm2909_vm7 = vcmask 7168  }
 0x3e9   : > { %3621 = vmatmul.mubr.msk.f32.vlgmr.msra.gmra.mxu1 %vm2624_vm6, %v2266_v27 }
 0x3ea   : > { %3623 = vmatprep.mubr.msk.f32.mxu1 %vm2624_vm6, %v2267_v62 }
 0x3ed   : > { %3624 = vmatmul.mubr.msk.f32.gmra.mxu1 %vm2624_vm6, %v2268_v35 }
 0x3ee   : > { %3626 = vmatprep.mubr.msk.f32.mxu1 %vm2624_vm6, %v2269_v57 }
 0x3f1   : > { %3627 = vmatmul.mubr.msk.f32.gmra.mxu1 %vm2624_vm6, %v2270_v42 }
 0x3f2   : > { %3629 = vmatprep.mubr.msk.f32.mxu1 %vm2624_vm6, %v2271_v13 }
 0x3f5   : > { %3630 = vmatmul.mubr.msk.f32.gmra.mxu1 %vm2624_vm6, %v2272_v59 }
 0x4a9   : > { %v3622_v2 = vpop.f32.mrf.mxu1 }
 0x4aa   : > { %2767 = vrot.lane.b32.xlu0 %v3622_v2, %s3772_s2 }
 0x4ab   : > { %v2718_v9 = vpop.f32.mrf.mxu1 }
 0x4ac   : > { %2765 = vrot.lane.b32.xlu1 %v2718_v9, %s3772_s2 }
 0x4ad   : > { %v3625_v40 = vpop.f32.mrf.mxu1 }
 0x4af   : > { %v2728_v18 = vpop.f32.mrf.mxu1 }
 0x4b0   : > { %2771 = vrot.lane.b32.xlu1 %v3625_v40, %s3772_s2 }
 0x4b1   : > { %v3628_v24 = vpop.f32.mrf.mxu1 }
 0x4b3   : > { %v2738_v37 = vpop.f32.mrf.mxu1 }
 0x4b4   : > { %2769 = vrot.lane.b32.xlu1 %v2728_v18, %s3772_s2  ;;  %2773 = vrot.lane.b32.xlu0 %v2738_v37, %s3772_s2 }
 0x4b5   : > { %v3631_v51 = vpop.f32.mrf.mxu1 }
 0x4b7   : > { %v2748_v31 = vpop.f32.mrf.mxu1 }
 0x4b8   : > { %2775 = vrot.lane.b32.xlu1 %v3628_v24, %s3772_s2  ;;  %2777 = vrot.lane.b32.xlu0 %v2748_v31, %s3772_s2 }
 0x4bc   : > { %2779 = vrot.lane.b32.xlu1 %v3631_v51, %s3772_s2  ;;  %s5238_s2 = scalar_lea.vmem %s5297_s11, %s3580_s24 }
 0x51c   : > { %v2768_v16 = vpop.permute.xlu0 %2767 }
 0x51d   : > { %v2790_v41 = vadd.f32 %v3622_v2, %v2768_v16 }
 0x51e   : > { %v2766_v45 = vpop.permute.xlu1 %2765 }
 0x51f   : > { %v3571_v7 = vmul.f32 -1.442695, %v2790_v41  ;;  %v2789_v17 = vadd.f32 %v2766_v45, %v2718_v9 }
 0x521   : > { %3695 = vpow2.f32 %v3571_v7  ;;  %v3570_v11 = vmul.f32 -1.442695, %v2789_v17 }
 0x522   : > { %v2772_v5 = vpop.permute.xlu1 %2771 }
 0x523   : > { %3697 = vpow2.f32 %v3570_v11  ;;  %v2792_v29 = vadd.f32 %v3625_v40, %v2772_v5 }
 0x525   : > { %v3573_v22 = vmul.f32 -1.442695, %v2792_v29 }
 0x526   : > { %v2770_v30 = vpop.permute.xlu1 %2769  ;;  %v2774_v12 = vpop.permute.xlu0 %2773 }
 0x527   : > { %3699 = vpow2.f32 %v3573_v22  ;;  %v2791_v60 = vadd.f32 %v2770_v30, %v2728_v18  ;;  %v2793_v10 = vadd.f32 %v2774_v12, %v2738_v37 }
 0x529   : > { %v3572_v15 = vmul.f32 -1.442695, %v2791_v60  ;;  %v3574_v1 = vmul.f32 -1.442695, %v2793_v10 }
 0x52a   : > { %v2776_v52 = vpop.permute.xlu1 %2775  ;;  %v2778_v6 = vpop.permute.xlu0 %2777 }
 0x52b   : > { %3701 = vpow2.f32 %v3572_v15  ;;  %v2794_v46 = vadd.f32 %v3628_v24, %v2776_v52  ;;  %v2795_v44 = vadd.f32 %v2778_v6, %v2748_v31 }
 0x52c   : > { %3703 = vpow2.f32 %v3574_v1 }
 0x52d   : > { %v3575_v34 = vmul.f32 -1.442695, %v2794_v46  ;;  %v3576_v53 = vmul.f32 -1.442695, %v2795_v44 }
 0x52e   : > { %v3696_v28 = vpop.eup %3695  ;;  %v2780_v63 = vpop.permute.xlu1 %2779 }
 0x52f   : > { %v2822_v50 = vadd.f32 1.0, %v3696_v28  ;;  %3705 = vpow2.f32 %v3575_v34  ;;  %v2796_v27 = vadd.f32 %v3631_v51, %v2780_v63 }
 0x530   : > { %v3698_v32 = vpop.eup %3697  ;;  %3707 = vpow2.f32 %v3576_v53 }
 0x531   : > { %3709 = vrcp.f32 %v2822_v50  ;;  %v2821_v62 = vadd.f32 1.0, %v3698_v32  ;;  %v3577_v35 = vmul.f32 -1.442695, %v2796_v27 }
 0x533   : > { %3711 = vrcp.f32 %v2821_v62 }
 0x534   : > { %v3700_v57 = vpop.eup %3699  ;;  %3713 = vpow2.f32 %v3577_v35 }
 0x535   : > { %v2824_v42 = vadd.f32 1.0, %v3700_v57 }
 0x537   : > { %3715 = vrcp.f32 %v2824_v42 }
 0x538   : > { %v3702_v13 = vpop.eup %3701 }
 0x539   : > { %v3704_v59 = vpop.eup %3703  ;;  %v2823_v2 = vadd.f32 1.0, %v3702_v13 }
 0x53a   : > { %v2825_v9 = vadd.f32 1.0, %v3704_v59 }
 0x53b   : > { %3717 = vrcp.f32 %v2823_v2 }
 0x53c   : > { %v3706_v40 = vpop.eup %3705  ;;  %3719 = vrcp.f32 %v2825_v9 }
 0x53d   : > { %v3708_v18 = vpop.eup %3707  ;;  %v2826_v24 = vadd.f32 1.0, %v3706_v40 }
 0x53e   : > { %v3710_v37 = vpop.eup %3709  ;;  %v2827_v51 = vadd.f32 1.0, %v3708_v18 }
 0x53f   : > { %3721 = vrcp.f32 %v2826_v24  ;;  %2852 = vperm.xlu1 %3663, %v3710_v37   ;;  %v2902_v31 = vmul.f32 %v3710_v37, %v5018_v33 }
 0x540   : > { %v3712_v16 = vpop.eup %3711  ;;  %3723 = vrcp.f32 %v2827_v51 }
 0x541   : > { %v3714_v41 = vpop.eup %3713  ;;  %2847 = vperm.xlu0 %3664, %v3712_v16   ;;  %v2926_v45 = vsel %vm2909_vm7, %v2902_v31, 0.0  ;;  %v2901_v7 = vmul.f32 %v3712_v16, %v5023_v61 }
 0x542   : > { %v2828_v17 = vadd.f32 1.0, %v3714_v41  ;;  %v2927_v11 = vrot.slane %v2926_v45, 4 }
 0x543   : > { %v2910_v5 = vsel %vm2909_vm7, %v2901_v7, 0.0 }
 0x544   : > { %v3716_v29 = vpop.eup %3715  ;;  %3725 = vrcp.f32 %v2828_v17  ;;  %v2928_v22 = vadd.f32 %v2927_v11, %v2926_v45  ;;  %v2911_v30 = vrot.slane %v2910_v5, 4 }
 0x545   : > { %2862 = vperm.xlu1 %3663, %v3716_v29   ;;  %v2904_v12 = vmul.f32 %v3716_v29, %v5007_v23 }
 0x546   : > { %v2929_v33 = vrot.slane %v2928_v22, 2  ;;  %v2912_v60 = vadd.f32 %v2911_v30, %v2910_v5 }
 0x547   : > { %v2958_v10 = vsel %vm2909_vm7, %v2904_v12, 0.0 }
 0x548   : > { %v3718_v15 = vpop.eup %3717  ;;  %v2930_v1 = vadd.f32 %v2929_v33, %v2928_v22  ;;  %v2913_v52 = vrot.slane %v2912_v60, 2  ;;  %v2959_v6 = vrot.slane %v2958_v10, 4 }
 0x549   : > { %v3720_v61 = vpop.eup %3719  ;;  %2857 = vperm.xlu0 %3664, %v3718_v15   ;;  %v2903_v46 = vmul.f32 %v3718_v15, %v5013_v39 }
 0x54a   : > { %v2931_v44 = vrot.slane %v2930_v1, 1  ;;  %v2914_v34 = vadd.f32 %v2913_v52, %v2912_v60  ;;  %v2960_v53 = vadd.f32 %v2959_v6, %v2958_v10  ;;  %v2905_v28 = vmul.f32 %v3720_v61, %v4994_v55 }
 0x54b   : > { %v2942_v63 = vsel %vm2909_vm7, %v2903_v46, 0.0 }
 0x54c   : > { %v3722_v23 = vpop.eup %3721  ;;  %v2915_v50 = vrot.slane %v2914_v34, 1  ;;  %v2961_v27 = vrot.slane %v2960_v53, 2  ;;  %v2943_v32 = vrot.slane %v2942_v63, 4  ;;  %v2974_v57 = vsel %vm2909_vm7, %v2905_v28, 0.0 }
 0x54d   : > { %v3724_v62 = vpop.eup %3723  ;;  %2872 = vperm.xlu1 %3663, %v3722_v23   ;;  %2867 = vperm.xlu0 %3664, %v3720_v61   ;;  %v2906_v35 = vmul.f32 %v3722_v23, %v4996_v36  ;;  %v2932_v42 = vadd.f32 %v2931_v44, %v2930_v1  ;;  %v2975_v55 = vrot.slane %v2974_v57, 4 }
 0x54e   : > { %v2962_v39 = vadd.f32 %v2961_v27, %v2960_v53  ;;  %v2944_v13 = vadd.f32 %v2943_v32, %v2942_v63  ;;  %v2916_v59 = vadd.f32 %v2915_v50, %v2914_v34  ;;  %v2907_v9 = vmul.f32 %v3724_v62, %v5000_v0 }
 0x54f   : > { %v2990_v2 = vsel %vm2909_vm7, %v2906_v35, 0.0  ;;  %v2976_v51 = vadd.f32 %v2975_v55, %v2974_v57  ;;  %v2933_v45 = vmul.f32 0.00048828125, %v2932_v42  ;;  %v2249_v42 = vld [vmem:[%s5295_s9 + $0x8] sm:$0xff]  ;;  %v2251_v55 = vld [vmem:[%s5295_s9 + $0x18] sm:$0xff] }
 0x550   : > { %v2963_v40 = vrot.slane %v2962_v39, 1  ;;  %v2945_v18 = vrot.slane %v2944_v13, 2  ;;  %v2991_v24 = vrot.slane %v2990_v2, 4  ;;  %v3006_v31 = vsel %vm2909_vm7, %v2907_v9, 0.0  ;;  %v2253_v9 = vld [vmem:[%s5295_s9 + $0x28] sm:$0xff] }
 0x551   : > { %v3726_v37 = vpop.eup %3725  ;;  %2877 = vperm.xlu0 %3664, %v3724_v62   ;;  %v2917_v7 = vmul.f32 0.00048828125, %v2916_v59  ;;  %v2977_v17 = vrot.slane %v2976_v51, 2  ;;  %v3007_v11 = vrot.slane %v3006_v31, 4  ;;  %v2250_v59 = vld [vmem:[%s5295_s9 + $0x10] sm:$0xff] }
 0x552   : > { %2882 = vperm.xlu1 %3663, %v3726_v37   ;;  %v2946_v36 = vadd.f32 %v2945_v18, %v2944_v13  ;;  %v2992_v16 = vadd.f32 %v2991_v24, %v2990_v2  ;;  %v2908_v41 = vmul.f32 %v3726_v37, %v4998_v25  ;;  %v2964_v5 = vadd.f32 %v2963_v40, %v2962_v39  ;;  %v2248_v39 = vld [vmem:[%s5295_s9] sm:$0xff]  ;;  %v2254_v2 = vld [vmem:[%s5295_s9 + $0x30] sm:$0xff]  ;;  %v2255_v40 = vld [vmem:[%s5295_s9 + $0x38] sm:$0xff] }
 0x553   : > { %v2978_v30 = vadd.f32 %v2977_v17, %v2976_v51  ;;  %v3008_v33 = vadd.f32 %v3007_v11, %v3006_v31  ;;  %v2252_v13 = vld [vmem:[%s5295_s9 + $0x20] sm:$0xff] }
 0x554   : > { %v2947_v29 = vrot.slane %v2946_v36, 1  ;;  %v2993_v0 = vrot.slane %v2992_v16, 2  ;;  %v3022_v22 = vsel %vm2909_vm7, %v2908_v41, 0.0  ;;  %v2965_v25 = vmul.f32 0.00048828125, %v2964_v5 }
 0x555   : > { %3040 = vperm.xlu0 %3664, %v2917_v7   ;;  %v3023_v12 = vrot.slane %v3022_v22, 4  ;;  %v2979_v15 = vrot.slane %v2978_v30, 1  ;;  %v3009_v52 = vrot.slane %v3008_v33, 2 }
 0x556   : > { %3045 = vperm.xlu1 %3663, %v2933_v45   ;;  %v2948_v60 = vadd.f32 %v2947_v29, %v2946_v36  ;;  %v2994_v10 = vadd.f32 %v2993_v0, %v2992_v16 }
 0x557   : > { %v3024_v1 = vadd.f32 %v3023_v12, %v3022_v22  ;;  %v2980_v46 = vadd.f32 %v2979_v15, %v2978_v30  ;;  %v3010_v34 = vadd.f32 %v3009_v52, %v3008_v33 }
 0x558   : > { %v2949_v6 = vmul.f32 0.00048828125, %v2948_v60  ;;  %v2995_v61 = vrot.slane %v2994_v10, 1 }
 0x559   : > { %v3025_v44 = vrot.slane %v3024_v1, 2  ;;  %v3011_v63 = vrot.slane %v3010_v34, 1  ;;  %v2981_v50 = vmul.f32 0.00048828125, %v2980_v46 }
 0x55a   : > { %3055 = vperm.xlu1 %3663, %v2965_v25   ;;  %3050 = vperm.xlu0 %3664, %v2949_v6   ;;  %v2996_v53 = vadd.f32 %v2995_v61, %v2994_v10 }
 0x55b   : > { %v3026_v28 = vadd.f32 %v3025_v44, %v3024_v1  ;;  %v3012_v32 = vadd.f32 %v3011_v63, %v3010_v34 }
 0x55c   : > { %v2997_v23 = vmul.f32 0.00048828125, %v2996_v53 }
 0x55d   : > { %v3027_v27 = vrot.slane %v3026_v28, 1  ;;  %v3013_v35 = vmul.f32 0.00048828125, %v3012_v32 }
 0x55e   : > { %3065 = vperm.xlu1 %3663, %v2997_v23   ;;  %3060 = vperm.xlu0 %3664, %v2981_v50  }
 0x55f   : > { %v3028_v62 = vadd.f32 %v3027_v27, %v3026_v28 }
 0x561   : > { %v3029_v57 = vmul.f32 0.00048828125, %v3028_v62 }
 0x562   : > { %3070 = vperm.xlu0 %3664, %v3013_v35  }
 0x563   : > { %3075 = vperm.xlu1 %3663, %v3029_v57  }
 0x566   : > { %3293 = vperm.xlu0 %3664, %v2249_v42  }
 0x567   : > { %3288 = vperm.xlu1 %3663, %v2248_v39  }
 0x56a   : > { %3308 = vperm.xlu0 %3664, %v2252_v13  }
 0x56b   : > { %3298 = vperm.xlu1 %3663, %v2250_v59  }
 0x56e   : > { %3318 = vperm.xlu0 %3664, %v2254_v2  }
 0x56f   : > { %3303 = vperm.xlu1 %3663, %v2251_v55  }
 0x573   : > { %3313 = vperm.xlu1 %3663, %v2253_v9  }
 0x577   : > { %3323 = vperm.xlu1 %3663, %v2255_v40  }
 0x5ba   : > { %v2853_v18 = vpop.permute.xlu1 %2852 }
 0x5bb   : > { %v2887_v17 = vmul.f32 %v2853_v18, %v4974_v38  ;;  %v2888_v11 = vmul.f32 %v2853_v18, %v4971_v54 }
 0x5bc   : > { %v2848_v24 = vpop.permute.xlu0 %2847 }
 0x5bd   : > { %v2885_v45 = vmul.f32 %v2848_v24, %v4984_v49  ;;  %v2886_v7 = vmul.f32 %v2848_v24, %v4981_v14 }
 0x5c0   : > { %v2863_v37 = vpop.permute.xlu1 %2862 }
 0x5c1   : > { %v2891_v33 = vmul.f32 %v2863_v37, %v4953_v20  ;;  %v2892_v49 = vmul.f32 %v2863_v37, %v4944_v47  ;;  %v2257_v37 = vld [vmem:[%s5296_s10 + $0x8] sm:$0xff] }
 0x5c4   : > { %v2858_v51 = vpop.permute.xlu0 %2857 }
 0x5c5   : > { %v2889_v38 = vmul.f32 %v2858_v51, %v4964_v56  ;;  %v2890_v60 = vmul.f32 %v2858_v51, %v4961_v3  ;;  %v2256_v51 = vld [vmem:[%s5296_s10] sm:$0xff] }
 0x5c8   : > { %v2873_v31 = vpop.permute.xlu1 %2872  ;;  %v2868_v36 = vpop.permute.xlu0 %2867 }
 0x5c9   : > { %v2893_v3 = vmul.f32 %v2868_v36, %v4874_v8  ;;  %v2894_v46 = vmul.f32 %v2868_v36, %v4881_v4  ;;  %v2895_v53 = vmul.f32 %v2873_v31, %v4894_v58  ;;  %v2896_v28 = vmul.f32 %v2873_v31, %v4896_v43  ;;  %v2258_v31 = vld [vmem:[%s5296_s10 + $0x10] sm:$0xff]  ;;  %v2260_v36 = vld [vmem:[%s5296_s10 + $0x20] sm:$0xff] }
 0x5cc   : > { %v5105_v16 = vpop.permute.xlu0 %2877 }
 0x5cd   : > { %v2883_v41 = vpop.permute.xlu1 %2882 }
 0x5ce   : > { %v2899_v57 = vmul.f32 %v2883_v41, %v4922_v19  ;;  %v2900_v42 = vmul.f32 %v2883_v41, %v4924_v26 }
 0x5d0   : > { %v3041_v5 = vpop.permute.xlu0 %3040 }
 0x5d1   : > { %v3046_v29 = vpop.permute.xlu1 %3045  ;;  %v5111_v0 = vsub.f32 %v2885_v45, %v3041_v5  ;;  %v5113_v22 = vsub.f32 %v2886_v7, %v3041_v5  ;;  %v2262_v45 = vld [vmem:[%s5296_s10 + $0x30] sm:$0xff]  ;;  %v2897_v7 = vmul.f32 %v5105_v16, %v4915_v48  ;;  %v2259_v48 = vld [vmem:[%s5296_s10 + $0x18] sm:$0xff] }
 0x5d2   : > { %v5115_v30 = vsub.f32 %v2887_v17, %v3046_v29  ;;  %v5117_v12 = vsub.f32 %v2888_v11, %v3046_v29  ;;  %v2898_v17 = vmul.f32 %v5105_v16, %v4900_v21  ;;  %v2261_v21 = vld [vmem:[%s5296_s10 + $0x28] sm:$0xff]  ;;  %v2263_v16 = vld [vmem:[%s5296_s10 + $0x38] sm:$0xff] }
 0x5d3   : > { %v3094_v14 = vmul.f32 %v5111_v0, %v5111_v0  ;;  %v3095_v54 = vmul.f32 %v5113_v22, %v5113_v22 }
 0x5d4   : > { %v3096_v10 = vmul.f32 %v5115_v30, %v5115_v30  ;;  %v3097_v15 = vmul.f32 %v5117_v12, %v5117_v12 }
 0x5d5   : > { %v3056_v1 = vpop.permute.xlu1 %3055  ;;  %v3051_v20 = vpop.permute.xlu0 %3050  ;;  %v3110_v52 = vadd.f32 %v3095_v54, %v3094_v14 }
 0x5d6   : > { %v5131_v47 = vsub.f32 %v2891_v33, %v3056_v1  ;;  %v5133_v25 = vsub.f32 %v2892_v49, %v3056_v1  ;;  %v5135_v6 = vsub.f32 %v2889_v38, %v3051_v20  ;;  %v5137_v61 = vsub.f32 %v2890_v60, %v3051_v20 }
 0x5d7   : > { %v3113_v56 = vadd.f32 %v3097_v15, %v3096_v10  ;;  %3111 = vadd.xlane.f32.xlu0 %v3110_v52 }
 0x5d8   : > { %v3100_v44 = vmul.f32 %v5131_v47, %v5131_v47  ;;  %v3101_v34 = vmul.f32 %v5133_v25, %v5133_v25  ;;  %v3098_v50 = vmul.f32 %v5135_v6, %v5135_v6  ;;  %v3099_v8 = vmul.f32 %v5137_v61, %v5137_v61 }
 0x5d9   : > { %3114 = vadd.xlane.f32.xlu1 %v3113_v56  ;;  %v3066_v63 = vpop.permute.xlu1 %3065  ;;  %v3061_v23 = vpop.permute.xlu0 %3060 }
 0x5da   : > { %v5151_v4 = vsub.f32 %v2893_v3, %v3061_v23  ;;  %v5153_v27 = vsub.f32 %v2894_v46, %v3061_v23  ;;  %v5155_v32 = vsub.f32 %v2895_v53, %v3066_v63  ;;  %v5157_v62 = vsub.f32 %v2896_v28, %v3066_v63 }
 0x5db   : > { %v3119_v58 = vadd.f32 %v3101_v34, %v3100_v44  ;;  %v3116_v13 = vadd.f32 %v3099_v8, %v3098_v50 }
 0x5dc   : > { %v3102_v43 = vmul.f32 %v5151_v4, %v5151_v4  ;;  %v3103_v35 = vmul.f32 %v5153_v27, %v5153_v27  ;;  %v3104_v2 = vmul.f32 %v5155_v32, %v5155_v32  ;;  %v3105_v55 = vmul.f32 %v5157_v62, %v5157_v62 }
 0x5dd   : > { %3120 = vadd.xlane.f32.xlu0 %v3119_v58  ;;  %v3071_v41 = vpop.permute.xlu0 %3070 }
 0x5de   : > { %v3076_v39 = vpop.permute.xlu1 %3075  ;;  %v3122_v59 = vadd.f32 %v3103_v35, %v3102_v43  ;;  %v3125_v18 = vadd.f32 %v3105_v55, %v3104_v2  ;;  %v5196_v11 = vsub.f32 %v2897_v7, %v3071_v41  ;;  %v5198_v5 = vsub.f32 %v2898_v17, %v3071_v41 }
 0x5df   : > { %v5169_v9 = vsub.f32 %v2899_v57, %v3076_v39  ;;  %v5171_v40 = vsub.f32 %v2900_v42, %v3076_v39 }
 0x5e0   : > { %3123 = vadd.xlane.f32.xlu1 %v3122_v59  ;;  %v3106_v29 = vmul.f32 %v5196_v11, %v5196_v11  ;;  %v3107_v33 = vmul.f32 %v5198_v5, %v5198_v5 }
 0x5e1   : > { %3117 = vadd.xlane.f32.xlu0 %v3116_v13  ;;  %v3108_v19 = vmul.f32 %v5169_v9, %v5169_v9  ;;  %v3109_v26 = vmul.f32 %v5171_v40, %v5171_v40  ;;  %v5217_v38 = vpop.permute.xlu0 %3293 }
 0x5e2   : > { %v3128_v49 = vadd.f32 %v3107_v33, %v3106_v29  ;;  %v5213_v14 = vpop.permute.xlu1 %3288 }
 0x5e3   : > { %v3131_v24 = vadd.f32 %v3109_v26, %v3108_v19 }
 0x5e5   : > { %3126 = vadd.xlane.f32.xlu0 %v3125_v18  ;;  %v5221_v10 = vpop.permute.xlu0 %3308 }
 0x5e6   : > { %v5215_v54 = vpop.permute.xlu1 %3298 }
 0x5e9   : > { %3132 = vadd.xlane.f32.xlu0 %v3131_v24  ;;  %v5225_v1 = vpop.permute.xlu0 %3318 }
 0x5ea   : > { %v5219_v60 = vpop.permute.xlu1 %3303 }
 0x5ee   : > { %v5223_v15 = vpop.permute.xlu1 %3313 }
 0x5f1   : > { %3349 = vperm.xlu1 %3663, %v2257_v37  }
 0x5f2   : > { %v5227_v20 = vpop.permute.xlu1 %3323 }
 0x5ff   : > { %3344 = vperm.xlu0 %3664, %v2256_v51  }
 0x603   : > { %3354 = vperm.xlu0 %3664, %v2258_v31  }
 0x607   : > { %3364 = vperm.xlu0 %3664, %v2260_v36  }
 0x60b   : > { %3374 = vperm.xlu0 %3664, %v2262_v45  }
 0x615   : > { %3129 = vadd.xlane.f32.xlu1 %v3128_v49 }
 0x626   : > { %3359 = vperm.xlu1 %3663, %v2259_v48  }
 0x62a   : > { %3369 = vperm.xlu1 %3663, %v2261_v21  }
 0x62e   : > { %3379 = vperm.xlu1 %3663, %v2263_v16  }
 0x660   : > { %v3112_v52 = vpop.xlane.xlu0 %3111 }
 0x661   : > { %v3134_v56 = vrot.slane %v3112_v52, 4 }
 0x662   : > { %v3115_v3 = vpop.xlane.xlu1 %3114 }
 0x663   : > { %v3151_v46 = vrot.slane %v3115_v3, 4  ;;  %v3135_v44 = vadd.f32 %v3134_v56, %v3112_v52 }
 0x665   : > { %v3152_v34 = vadd.f32 %v3151_v46, %v3115_v3  ;;  %v3136_v53 = vrot.slane %v3135_v44, 2 }
 0x666   : > { %v3121_v28 = vpop.xlane.xlu0 %3120 }
 0x667   : > { %v3153_v63 = vrot.slane %v3152_v34, 2  ;;  %v3137_v23 = vadd.f32 %v3136_v53, %v3135_v44  ;;  %v3185_v13 = vrot.slane %v3121_v28, 4 }
 0x669   : > { %v3154_v50 = vadd.f32 %v3153_v63, %v3152_v34  ;;  %v3138_v8 = vrot.slane %v3137_v23, 1  ;;  %v3124_v58 = vpop.xlane.xlu1 %3123  ;;  %v3186_v31 = vadd.f32 %v3185_v13, %v3121_v28 }
 0x66a   : > { %v3118_v43 = vpop.xlane.xlu0 %3117  ;;  %v3202_v35 = vrot.slane %v3124_v58, 4 }
 0x66b   : > { %v3155_v57 = vrot.slane %v3154_v50, 1  ;;  %v3139_v42 = vadd.f32 %v3138_v8, %v3137_v23  ;;  %v3168_v39 = vrot.slane %v3118_v43, 4  ;;  %v3187_v49 = vrot.slane %v3186_v31, 2 }
 0x66c   : > { %v3203_v59 = vadd.f32 %v3202_v35, %v3124_v58 }
 0x66d   : > { %v3156_v2 = vadd.f32 %v3155_v57, %v3154_v50  ;;  %v3140_v55 = vmul.f32 0.00048828125, %v3139_v42  ;;  %v3169_v19 = vadd.f32 %v3168_v39, %v3118_v43  ;;  %v3188_v46 = vadd.f32 %v3187_v49, %v3186_v31 }
 0x66e   : > { %v3204_v26 = vrot.slane %v3203_v59, 2  ;;  %v3127_v18 = vpop.xlane.xlu0 %3126 }
 0x66f   : > { %v3157_v24 = vmul.f32 0.00048828125, %v3156_v2  ;;  %v3141_v37 = vadd.f32 0.00049, %v3140_v55  ;;  %v3170_v51 = vrot.slane %v3169_v19, 2  ;;  %v3219_v41 = vrot.slane %v3127_v18, 4 }
 0x670   : > { %v3205_v36 = vadd.f32 %v3204_v26, %v3203_v59  ;;  %v3189_v63 = vrot.slane %v3188_v46, 1  ;;  %v3350_v26 = vpop.permute.xlu1 %3349 }
 0x671   : > { %v3158_v45 = vadd.f32 0.00049, %v3157_v24  ;;  %3727 = vrsqrt.f32 %v3141_v37  ;;  %v3171_v7 = vadd.f32 %v3170_v51, %v3169_v19  ;;  %v3220_v21 = vadd.f32 %v3219_v41, %v3127_v18 }
 0x672   : > { %v3206_v17 = vrot.slane %v3205_v36, 1  ;;  %v3133_v29 = vpop.xlane.xlu0 %3132  ;;  %v3190_v42 = vadd.f32 %v3189_v63, %v3188_v46 }
 0x673   : > { %3729 = vrsqrt.f32 %v3158_v45  ;;  %v3172_v33 = vrot.slane %v3171_v7, 1  ;;  %v3253_v52 = vrot.slane %v3133_v29, 4  ;;  %v3221_v34 = vrot.slane %v3220_v21, 2 }
 0x674   : > { %v3207_v48 = vadd.f32 %v3206_v17, %v3205_v36  ;;  %v3191_v24 = vmul.f32 0.00048828125, %v3190_v42 }
 0x675   : > { %v3173_v16 = vadd.f32 %v3172_v33, %v3171_v7  ;;  %v3254_v28 = vadd.f32 %v3253_v52, %v3133_v29  ;;  %v3222_v23 = vadd.f32 %v3221_v34, %v3220_v21 }
 0x676   : > { %v3208_v56 = vmul.f32 0.00048828125, %v3207_v48  ;;  %v3192_v17 = vadd.f32 0.00049, %v3191_v24 }
 0x677   : > { %v3174_v3 = vmul.f32 0.00048828125, %v3173_v16  ;;  %v3255_v50 = vrot.slane %v3254_v28, 2  ;;  %v3223_v39 = vrot.slane %v3222_v23, 1 }
 0x678   : > { %v3209_v44 = vadd.f32 0.00049, %v3208_v56 }
 0x679   : > { %v3175_v53 = vadd.f32 0.00049, %v3174_v3  ;;  %v3256_v2 = vadd.f32 %v3255_v50, %v3254_v28 }
 0x67a   : > { %3731 = vrsqrt.f32 %v3209_v44  ;;  %v3345_v35 = vpop.permute.xlu0 %3344 }
 0x67b   : > { %3733 = vrsqrt.f32 %v3175_v53  ;;  %v3257_v31 = vrot.slane %v3256_v2, 1 }
 0x67c   : > { %3735 = vrsqrt.f32 %v3192_v17 }
 0x67d   : > { %v3258_v29 = vadd.f32 %v3257_v31, %v3256_v2 }
 0x67e   : > { %v3728_v8 = vpop.eup %3727  ;;  %v3355_v36 = vpop.permute.xlu0 %3354 }
 0x67f   : > { %v3270_v58 = vmul.f32 %v3728_v8, %v5111_v0  ;;  %v3271_v43 = vmul.f32 %v3728_v8, %v5113_v22  ;;  %v3259_v46 = vmul.f32 0.00048828125, %v3258_v29 }
 0x680   : > { %v3730_v57 = vpop.eup %3729 }
 0x681   : > { %v3272_v13 = vmul.f32 %v3730_v57, %v5115_v30  ;;  %v3273_v59 = vmul.f32 %v3730_v57, %v5117_v12  ;;  %v3326_v55 = vmul.f32 %v5213_v14, %v3270_v58  ;;  %v3327_v0 = vmul.f32 %v5213_v14, %v3271_v43 }
 0x682   : > { %v3224_v12 = vadd.f32 %v3223_v39, %v3222_v23  ;;  %v3365_v52 = vpop.permute.xlu0 %3364 }
 0x683   : > { %v3328_v22 = vmul.f32 %v5217_v38, %v3272_v13  ;;  %v3329_v30 = vmul.f32 %v5217_v38, %v3273_v59  ;;  %v3382_v19 = vadd.f32 %v3345_v35, %v3326_v55  ;;  %v3383_v18 = vadd.f32 %v3345_v35, %v3327_v0 }
 0x684   : > { %v3225_v45 = vmul.f32 0.00048828125, %v3224_v12 }
 0x685   : > { %v3384_v37 = vadd.f32 %v3350_v26, %v3328_v22  ;;  %v3385_v51 = vadd.f32 %v3350_v26, %v3329_v30  ;;  %3398 = vst [vmem:[%s5238_s2] sm:$0xff] %v3382_v19  ;;  %3399 = vst [vmem:[%s5238_s2 + $0x8] sm:$0xff] %v3383_v18 }
 0x687   : > { %v3732_v41 = vpop.eup %3731  ;;  %3400 = vst [vmem:[%s5238_s2 + $0x10] sm:$0xff] %v3384_v37  ;;  %3401 = vst [vmem:[%s5238_s2 + $0x18] sm:$0xff] %v3385_v51 }
 0x688   : > { %v3734_v14 = vpop.eup %3733  ;;  %v3278_v7 = vmul.f32 %v3732_v41, %v5151_v4  ;;  %v3279_v38 = vmul.f32 %v3732_v41, %v5153_v27  ;;  %v3226_v27 = vadd.f32 0.00049, %v3225_v45 }
 0x689   : > { %v3274_v33 = vmul.f32 %v3734_v14, %v5135_v6  ;;  %v3275_v49 = vmul.f32 %v3734_v14, %v5137_v61  ;;  %v3260_v61 = vadd.f32 0.00049, %v3259_v46 }
 0x68a   : > { %v3334_v48 = vmul.f32 %v5221_v10, %v3278_v7  ;;  %v3335_v21 = vmul.f32 %v5221_v10, %v3279_v38  ;;  %3737 = vrsqrt.f32 %v3226_v27  ;;  %v3736_v10 = vpop.eup %3735 }
 0x68b   : > { %v3330_v16 = vmul.f32 %v5215_v54, %v3274_v33  ;;  %v3331_v4 = vmul.f32 %v5215_v54, %v3275_v49  ;;  %3739 = vrsqrt.f32 %v3260_v61  ;;  %v3276_v53 = vmul.f32 %v3736_v10, %v5131_v47 }
 0x68c   : > { %v3390_v56 = vadd.f32 %v3365_v52, %v3334_v48  ;;  %v3391_v3 = vadd.f32 %v3365_v52, %v3335_v21  ;;  %v3277_v54 = vmul.f32 %v3736_v10, %v5133_v25 }
 0x68d   : > { %v3386_v44 = vadd.f32 %v3355_v36, %v3330_v16  ;;  %v3387_v6 = vadd.f32 %v3355_v36, %v3331_v4  ;;  %v3332_v8 = vmul.f32 %v5219_v60, %v3276_v53 }
 0x68e   : > { %3406 = vst [vmem:[%s5238_s2 + $0x40] sm:$0xff] %v3390_v56  ;;  %3407 = vst [vmem:[%s5238_s2 + $0x48] sm:$0xff] %v3391_v3  ;;  %v3333_v58 = vmul.f32 %v5219_v60, %v3277_v54 }
 0x68f   : > { %3402 = vst [vmem:[%s5238_s2 + $0x20] sm:$0xff] %v3386_v44  ;;  %3403 = vst [vmem:[%s5238_s2 + $0x28] sm:$0xff] %v3387_v6 }
 0x697   : > { %v3738_v34 = vpop.eup %3737 }
 0x698   : > { %v3280_v23 = vmul.f32 %v3738_v34, %v5155_v32  ;;  %v3281_v43 = vmul.f32 %v3738_v34, %v5157_v62  ;;  %v3740_v35 = vpop.eup %3739 }
 0x699   : > { %v3284_v59 = vmul.f32 %v3740_v35, %v5169_v9  ;;  %v3285_v60 = vmul.f32 %v3740_v35, %v5171_v40 }
 0x69a   : > { %v3336_v25 = vmul.f32 %v5223_v15, %v3280_v23  ;;  %v3337_v32 = vmul.f32 %v5223_v15, %v3281_v43 }
 0x69b   : > { %v3340_v30 = vmul.f32 %v5227_v20, %v3284_v59  ;;  %v3341_v19 = vmul.f32 %v5227_v20, %v3285_v60  ;;  %v3375_v20 = vpop.permute.xlu0 %3374 }
 0x69e   : > { %v3130_v28 = vpop.xlane.xlu1 %3129 }
 0x69f   : > { %v3236_v63 = vrot.slane %v3130_v28, 4 }
 0x6a1   : > { %v3237_v50 = vadd.f32 %v3236_v63, %v3130_v28 }
 0x6a2   : > { %v3360_v57 = vpop.permute.xlu1 %3359 }
 0x6a3   : > { %v3238_v42 = vrot.slane %v3237_v50, 2  ;;  %v3388_v47 = vadd.f32 %v3360_v57, %v3332_v8  ;;  %v3389_v39 = vadd.f32 %v3360_v57, %v3333_v58 }
 0x6a5   : > { %v3239_v13 = vadd.f32 %v3238_v42, %v3237_v50  ;;  %3404 = vst [vmem:[%s5238_s2 + $0x30] sm:$0xff] %v3388_v47  ;;  %3405 = vst [vmem:[%s5238_s2 + $0x38] sm:$0xff] %v3389_v39 }
 0x6a6   : > { %v3370_v62 = vpop.permute.xlu1 %3369 }
 0x6a7   : > { %v3240_v2 = vrot.slane %v3239_v13, 1  ;;  %v3392_v55 = vadd.f32 %v3370_v62, %v3336_v25  ;;  %v3393_v0 = vadd.f32 %v3370_v62, %v3337_v32 }
 0x6a9   : > { %v3241_v22 = vadd.f32 %v3240_v2, %v3239_v13  ;;  %3408 = vst [vmem:[%s5238_s2 + $0x50] sm:$0xff] %v3392_v55  ;;  %3409 = vst [vmem:[%s5238_s2 + $0x58] sm:$0xff] %v3393_v0 }
 0x6aa   : > { %v3380_v12 = vpop.permute.xlu1 %3379 }
 0x6ab   : > { %v3242_v15 = vmul.f32 0.00048828125, %v3241_v22  ;;  %v3396_v9 = vadd.f32 %v3380_v12, %v3340_v30  ;;  %v3397_v26 = vadd.f32 %v3380_v12, %v3341_v19 }
 0x6ad   : > { %v3243_v18 = vadd.f32 0.00049, %v3242_v15  ;;  %3412 = vst [vmem:[%s5238_s2 + $0x70] sm:$0xff] %v3396_v9  ;;  %3413 = vst [vmem:[%s5238_s2 + $0x78] sm:$0xff] %v3397_v26 }
 0x6af   : > { %3741 = vrsqrt.f32 %v3243_v18 }
 0x6bc   : > { %v3742_v40 = vpop.eup %3741 }
 0x6bd   : > { %v3282_v24 = vmul.f32 %v3742_v40, %v5196_v11  ;;  %v3283_v37 = vmul.f32 %v3742_v40, %v5198_v5 }
 0x6bf   : > { %v3338_v51 = vmul.f32 %v5225_v1, %v3282_v24  ;;  %v3339_v31 = vmul.f32 %v5225_v1, %v3283_v37 }
 0x6c1   : > { %v3394_v36 = vadd.f32 %v3375_v20, %v3338_v51  ;;  %v3395_v41 = vadd.f32 %v3375_v20, %v3339_v31 }
 0x6c3   : > { %3410 = vst [vmem:[%s5238_s2 + $0x60] sm:$0xff] %v3394_v36  ;;  %3411 = vst [vmem:[%s5238_s2 + $0x68] sm:$0xff] %v3395_v41 }
 0x6c4 PF: > { %s21_s16 = sadd.s32 1, %s3749_s16  }
 0x6c5   : > { %p18_p4 = scmp.ge.s32.totalorder %s21_s16, 4  }
 0x6c7   :  { %20 = sbr.rel (!%p18_p4) target bundleno = 1 (0x1), region = 94 }

</bundles_post_ra>
